<compile_context>
chip_gen: v5e
topology: v5e:2x2
jax: 0.10.0
libtpu: 0.0.40
codegen_flags: <defaults>
</compile_context>

<pallas_src>
import functools

import jax
import jax.numpy as jnp
from jax import lax
from jax.experimental import pallas as pl
from jax.experimental.pallas import tpu as pltpu


def _mf_kernel(ids1_ref, ids2_ref, table_t_ref, out_ref, *, n_nodes_pad, tb):
    """One grid step computes `tb` embedding dot products.

    ids1_ref / ids2_ref : VMEM int32 refs, shape (1, 1, tb)          (per-tile ids)
    table_t_ref         : VMEM ref, shape (n_factors, n_nodes_pad)   (resident, 1-buffered)
    out_ref             : VMEM f32 ref, shape (1, 1, tb)             (lane-dense block)
    """
    tab = table_t_ref[...]                                  # (n_factors, n_nodes_pad)
    ids1 = ids1_ref[0]                                      # (1, tb) int32
    ids2 = ids2_ref[0]                                      # (1, tb) int32

    # Transposed one-hot gather masks: onehot[n, t] = (n == ids[t]).
    node_iota = lax.broadcasted_iota(jnp.int32, (n_nodes_pad, tb), 0)
    onehot1 = (node_iota == ids1).astype(tab.dtype)         # (n_nodes_pad, tb)
    onehot2 = (node_iota == ids2).astype(tab.dtype)         # (n_nodes_pad, tb)

    # MXU gather: table_T @ onehot -> gathered rows, already transposed so the
    # factor axis sits on sublanes and the batch axis on lanes.
    e1t = jnp.dot(tab, onehot1, preferred_element_type=jnp.float32)  # (n_factors, tb)
    e2t = jnp.dot(tab, onehot2, preferred_element_type=jnp.float32)  # (n_factors, tb)

    # Fused multiply + factor (sublane) reduction -> lane-major (1, tb) row.
    dots = jnp.sum(e1t * e2t, axis=0, keepdims=True)        # (1, tb)
    out_ref[...] = dots[None]                               # (1, 1, tb) lane-dense store


def matrix_factorization_forward(node1, node2, table, *, tb=512):
    """Computes (table[node1] * table[node2]).sum(-1) with a Pallas TPU kernel."""
    assert node1.shape == node2.shape and node1.ndim == 1
    b = node1.shape[0]
    n_nodes, n_factors = table.shape

    # Lane-dense tiles: tb must be a multiple of 128; don't over-pad tiny batches.
    tb = max(128, min(tb, 128 * pl.cdiv(b, 128)))
    num_tiles = pl.cdiv(b, tb)
    b_pad = num_tiles * tb

    # Clamp ids (matches well-formed Embedding inputs; out-of-range would just
    # produce a zero one-hot otherwise) and pad the batch to a tile multiple.
    node1 = jnp.clip(node1.astype(jnp.int32), 0, n_nodes - 1)
    node2 = jnp.clip(node2.astype(jnp.int32), 0, n_nodes - 1)
    if b_pad != b:
        pad = b_pad - b
        zeros = jnp.zeros((pad,), jnp.int32)
        node1 = jnp.concatenate([node1, zeros])
        node2 = jnp.concatenate([node2, zeros])
    ids1 = node1.reshape(num_tiles, 1, tb)
    ids2 = node2.reshape(num_tiles, 1, tb)

    # Transposed, node-padded table so the gathered tiles come out (n_factors, tb).
    n_nodes_pad = 128 * pl.cdiv(n_nodes, 128)
    table_t = jnp.transpose(table)                          # (n_factors, n_nodes)
    if n_nodes_pad != n_nodes:
        table_t = jnp.pad(table_t, ((0, 0), (0, n_nodes_pad - n_nodes)))

    # Generation-aware VMEM budget (v5e/v6e: 128 MiB, v7x: 64 MiB per TensorCore).
    itemsize = jnp.dtype(table.dtype).itemsize
    needed = (
        n_factors * n_nodes_pad * itemsize          # resident table (single-buffered)
        + 2 * n_nodes_pad * tb * itemsize           # two one-hot masks
        + n_nodes_pad * tb * 4                      # iota / compare temporaries
        + 3 * n_factors * tb * 4                    # e1t, e2t, product
        + 2 * 2 * 2 * tb * 4                        # ids blocks, double-buffered
        + 2 * tb * 4                                # output blocks, double-buffered
    )
    try:
        vmem_cap = getattr(pltpu.get_tpu_info(), "vmem_capacity_bytes", 64 << 20)
    except Exception:  # pragma: no cover - conservative fallback
        vmem_cap = 64 << 20
    vmem_limit = int(min(max(needed + (8 << 20), 32 << 20), vmem_cap - (4 << 20)))

    kernel = functools.partial(_mf_kernel, n_nodes_pad=n_nodes_pad, tb=tb)

    out = pl.pallas_call(
        kernel,
        out_shape=jax.ShapeDtypeStruct((num_tiles, 1, tb), jnp.float32),
        grid_spec=pltpu.PrefetchScalarGridSpec(
            num_scalar_prefetch=0,
            grid=(num_tiles,),
            in_specs=[
                # Per-tile id blocks (pipelined with compute, SMEM untouched).
                pl.BlockSpec((1, 1, tb), lambda i: (i, 0, 0)),
                pl.BlockSpec((1, 1, tb), lambda i: (i, 0, 0)),
                # Full (transposed) embedding table resident in VMEM; constant
                # block index, so single-buffer it to halve its footprint.
                # TODO(synk): HBM (pl.ANY) + manual DMA row-gather path for
                # tables that do not fit in VMEM (notably on v7x's 64 MiB/TC).
                pl.BlockSpec(
                    (n_factors, n_nodes_pad),
                    lambda i: (0, 0),
                    pipeline_mode=pl.Buffered(1),
                ),
            ],
            out_specs=pl.BlockSpec((1, 1, tb), lambda i: (i, 0, 0)),
        ),
        compiler_params=pltpu.CompilerParams(
            dimension_semantics=("parallel",),
            vmem_limit_bytes=vmem_limit,
        ),
    )(ids1, ids2, table_t)

    return out.reshape(b_pad)[:b]  # (B,)


if __name__ == "__main__":
    # Small, deterministic setup consistent with the module ("1k" nodes).
    n_nodes = 1000
    n_factors = 64        # nn.Embedding(n_nodes, n_factors) default
    batch = 200           # not a multiple of 128 -> exercises the padding path

    key = jax.random.PRNGKey(0)
    k_tab, k_i1, k_i2 = jax.random.split(key, 3)

    # torch.nn.Embedding default init is N(0, 1).
    table = jax.random.normal(k_tab, (n_nodes, n_factors), dtype=jnp.float32)
    node1 = jax.random.randint(k_i1, (batch,), 0, n_nodes, dtype=jnp.int32)
    node2 = jax.random.randint(k_i2, (batch,), 0, n_nodes, dtype=jnp.int32)

    out = matrix_factorization_forward(node1, node2, table)
    out = jax.block_until_ready(out)

    # Pure-JAX reference check (same semantics as the PyTorch forward).
    # Tolerance leaves margin for MXU matmul rounding of the one-hot gather.
    ref = jnp.sum(table[node1] * table[node2], axis=1)
    assert out.shape == (batch,)
    assert jnp.allclose(out, ref, atol=1e-2, rtol=1e-2), float(
        jnp.max(jnp.abs(out - ref)))

    print("KERNEL_OK")
</pallas_src>

<mosaic_0001>
module attributes {stable_mosaic.version = 11 : i64} {
  func.func @_mf_kernel(%arg0: i32, %arg1: memref<1x1x256xi32, #tpu.memory_space<vmem>>, %arg2: memref<1x1x256xi32, #tpu.memory_space<vmem>>, %arg3: memref<64x1024xf32, #tpu.memory_space<vmem>>, %arg4: memref<1x1x256xf32, #tpu.memory_space<vmem>>) attributes {dimension_semantics = [#tpu.dimension_semantics<parallel>], iteration_bounds = array<i64: 1>, scalar_prefetch = 0 : i64, scratch_operands = 0 : i64, tpu.core_type = #tpu.core_type<tc>, window_params = [{transform_indices = @transform_0, window_bounds = array<i64: 1, 1, 256>}, {transform_indices = @transform_1, window_bounds = array<i64: 1, 1, 256>}, {pipeline_mode = #tpu.pipeline_mode<synchronous>, transform_indices = @transform_2, window_bounds = array<i64: 64, 1024>}, {transform_indices = @transform_3, window_bounds = array<i64: 1, 1, 256>}]} {
    %c0 = arith.constant 0 : index
    %c0_0 = arith.constant 0 : index
    %0 = vector.load %arg3[%c0, %c0_0] : memref<64x1024xf32, #tpu.memory_space<vmem>>, vector<64x1024xf32>
    %c0_1 = arith.constant 0 : index
    %c0_2 = arith.constant 0 : index
    %c0_3 = arith.constant 0 : index
    %1 = vector.load %arg1[%c0_1, %c0_2, %c0_3] : memref<1x1x256xi32, #tpu.memory_space<vmem>>, vector<1x1x256xi32>
    %2 = vector.shape_cast %1 : vector<1x1x256xi32> to vector<1x256xi32>
    %c0_4 = arith.constant 0 : index
    %c0_5 = arith.constant 0 : index
    %c0_6 = arith.constant 0 : index
    %3 = vector.load %arg2[%c0_4, %c0_5, %c0_6] : memref<1x1x256xi32, #tpu.memory_space<vmem>>, vector<1x1x256xi32>
    %4 = vector.shape_cast %3 : vector<1x1x256xi32> to vector<1x256xi32>
    %5 = tpu.iota {dimensions = array<i32: 0>} : vector<1024x256xi32>
    %6 = vector.broadcast %2 : vector<1x256xi32> to vector<1024x256xi32>
    %7 = arith.cmpi eq, %5, %6 : vector<1024x256xi32>
    %8 = arith.extui %7 : vector<1024x256xi1> to vector<1024x256xi32>
    %9 = arith.sitofp %8 : vector<1024x256xi32> to vector<1024x256xf32>
    %10 = vector.broadcast %4 : vector<1x256xi32> to vector<1024x256xi32>
    %11 = arith.cmpi eq, %5, %10 : vector<1024x256xi32>
    %12 = arith.extui %11 : vector<1024x256xi1> to vector<1024x256xi32>
    %13 = arith.sitofp %12 : vector<1024x256xi32> to vector<1024x256xf32>
    %cst = arith.constant dense<0.000000e+00> : vector<64x256xf32>
    %14 = tpu.matmul %0, %9, %cst {dimension_numbers = #tpu.dot_dimension_numbers<[1], [0], [0], [1], [0, 0, 1, 1], [], []>} : vector<64x1024xf32>, vector<1024x256xf32>, vector<64x256xf32> -> vector<64x256xf32>
    %cst_7 = arith.constant dense<0.000000e+00> : vector<64x256xf32>
    %15 = tpu.matmul %0, %13, %cst_7 {dimension_numbers = #tpu.dot_dimension_numbers<[1], [0], [0], [1], [0, 0, 1, 1], [], []>} : vector<64x1024xf32>, vector<1024x256xf32>, vector<64x256xf32> -> vector<64x256xf32>
    %16 = arith.mulf %14, %15 : vector<64x256xf32>
    %cst_8 = arith.constant dense<0.000000e+00> : vector<256xf32>
    %17 = vector.multi_reduction <add>, %16, %cst_8 [0] : vector<64x256xf32> to vector<256xf32>
    %18 = vector.shape_cast %17 : vector<256xf32> to vector<1x256xf32>
    %19 = vector.shape_cast %18 : vector<1x256xf32> to vector<1x1x256xf32>
    %c0_9 = arith.constant 0 : index
    %c0_10 = arith.constant 0 : index
    %c0_11 = arith.constant 0 : index
    %20 = vector.load %arg4[%c0_9, %c0_10, %c0_11] : memref<1x1x256xf32, #tpu.memory_space<vmem>>, vector<1x1x256xf32>
    tpu.vector_store %arg4[%c0_9, %c0_10, %c0_11], %19 {strides = array<i32>} : memref<1x1x256xf32, #tpu.memory_space<vmem>>, vector<1x1x256xf32>,
    return
  }
  func.func @transform_0(%arg0: i32) -> (i32, i32, i32) {
    %c0_i32 = arith.constant 0 : i32
    %c0_i32_0 = arith.constant 0 : i32
    %c0_i32_1 = arith.constant 0 : i32
    return %arg0, %c0_i32, %c0_i32_0 : i32, i32, i32
  }
  func.func @transform_1(%arg0: i32) -> (i32, i32, i32) {
    %c0_i32 = arith.constant 0 : i32
    %c0_i32_0 = arith.constant 0 : i32
    %c0_i32_1 = arith.constant 0 : i32
    return %arg0, %c0_i32, %c0_i32_0 : i32, i32, i32
  }
  func.func @transform_2(%arg0: i32) -> (i32, i32) {
    %c0_i32 = arith.constant 0 : i32
    %c0_i32_0 = arith.constant 0 : i32
    %c0_i32_1 = arith.constant 0 : i32
    return %c0_i32, %c0_i32_0 : i32, i32
  }
  func.func @transform_3(%arg0: i32) -> (i32, i32, i32) {
    %c0_i32 = arith.constant 0 : i32
    %c0_i32_0 = arith.constant 0 : i32
    %c0_i32_1 = arith.constant 0 : i32
    return %arg0, %c0_i32, %c0_i32_0 : i32, i32, i32
  }
}

</mosaic_0001>

<bundles_post_ra>
// kernel: tpu_custom_call.1
= control target key start
LH: loop header
LB: loop body
LE: loop exit
PB: predicated region body
PF: predicated region fallthrough
CT: control target
= control target key end

     0   :  { %8 = vsyncpa [#allocation3], 0  ;;  %s7153_s0 = inlined_call_operand.hbm [shape: s32[1,1,256], index: 0, kind: input, shape index: {}]   ;;  %s7154_s1 = inlined_call_operand.hbm [shape: s32[1,1,256], index: 1, kind: input, shape index: {}]   ;;  %s7155_s2 = inlined_call_operand.hbm [shape: f32[64,1024], index: 2, kind: input, shape index: {}]   ;;  %s7156_s3 = inlined_call_operand.hbm [shape: f32[1,1,256], index: 3, kind: output, shape index: {}]  }
   0x1   :  { %9 = vsyncpa [#allocation6], 0  ;;  %s27_s14 = sshll.u32 %s7154_s1, 4  ;;  %s28_s14 = int_to_ptr.hbm [resolvable:$true] %s27_s14 }
   0x2   :  { %10 = vsyncpa [#allocation4], 0  ;;  %s4375_s15 = smov [#allocation5]   ;;  %s16_s19 = sshll.u32 %s7153_s0, 4  ;;  %s17_s19 = int_to_ptr.hbm [resolvable:$true] %s16_s19 }
   0x3   :  { %s29_s16 = sshll.u32 %s4375_s15, 4  ;;  %s4376_s20 = smov [#allocation2]   ;;  %s30_s16 = int_to_ptr.vmem [resolvable:$true] %s29_s16 }
   0x4   :  { %32 = dma.hbm_to_vmem [thread:$0]  %s28_s14, 32, %s30_s16, [#allocation6]  }
   0x5   :  { %s18_s21 = sshll.u32 %s4376_s20, 4  ;;  %s37_s24 = sshll.u32 %s7155_s2, 4  ;;  %s19_s21 = int_to_ptr.vmem [resolvable:$true] %s18_s21  ;;  %s38_s24 = int_to_ptr.hbm [resolvable:$true] %s37_s24 }
   0x6   :  { %21 = dma.hbm_to_vmem [thread:$0]  %s17_s19, 32, %s19_s21, [#allocation3]  }
   0x7   :  { %s4377_s1 = smov [#allocation7]   ;;  %s4378_s26 = smov 1024  }
   0x8   :  { %s39_s25 = sshll.u32 %s4377_s1, 4  ;;  %s4379_s27 = smov 64   ;;  %s40_s25 = int_to_ptr.vmem [resolvable:$true] %s39_s25 }
   0x9   :  { %45 = dma.hbm_to_vmem [thread:$0]  %s38_s24, 8192, %s40_s25, [#allocation6], %s4378_s26, %s4378_s26, %s4379_s27  }
   0xa   :  { %4369 = dma.done.wait [#allocation3], 32  }
   0xb   :  { %4370 = vsyncadd [#allocation3], 4294967264 }
   0xc   :  { %4371 = dma.done.wait [#allocation6], 8224  }
   0xd   :  { %4372 = vsyncadd [#allocation6], 4294959072  ;;  %v7157_v0 = vlaneseq  ;;  %v4435_v9 = vld [vmem:[#allocation2] sm:$0x3]  ;;  %v7188_v22 = vmov 1.0   ;;  %s4381_s0 = smov [#allocation8]  }
   0xe   :  { %v4450_v14 = vperm.slane %v4435_v9, 0  ;;  %s3163_s2 = sshll.u32 %s4381_s0, 4  ;;  %s3165_s30 = sshll.u32 %s7156_s3, 4  ;;  %s3164_s2 = int_to_ptr.vmem [resolvable:$true] %s3163_s2  ;;  %s3166_s30 = int_to_ptr.hbm [resolvable:$true] %s3165_s30 }
   0xf   :  { %v4412_v1 = vshrl.u32 %v7157_v0, 7 }
  0x11   :  { %7425 = vst [vmem:[#allocation12_spill] sm:$0xff] %v4412_v1  ;;  %v4415_v2 = vadd.s32 120, %v4412_v1  ;;  %v4418_v3 = vadd.s32 376, %v4412_v1  ;;  %v4421_v4 = vadd.s32 112, %v4412_v1  ;;  %v4424_v5 = vadd.s32 248, %v4412_v1 }
  0x12   :  { %v4427_v6 = vadd.s32 368, %v4412_v1  ;;  %v4430_v7 = vadd.s32 504, %v4412_v1  ;;  %v4433_v8 = vadd.s32 104, %v4412_v1  ;;  %v4438_v10 = vadd.s32 240, %v4412_v1 }
  0x13   :  { %v4441_v11 = vadd.s32 360, %v4412_v1  ;;  %v4444_v12 = vadd.s32 496, %v4412_v1  ;;  %v4447_v13 = vadd.s32 96, %v4412_v1  ;;  %v4453_v15 = vadd.s32 232, %v4412_v1 }
  0x14   :  { %v4456_v16 = vadd.s32 352, %v4412_v1  ;;  %v4459_v17 = vadd.s32 488, %v4412_v1  ;;  %v4462_v18 = vadd.s32 88, %v4412_v1  ;;  %v4465_v19 = vadd.s32 224, %v4412_v1 }
  0x15   :  { %v4468_v20 = vadd.s32 344, %v4412_v1  ;;  %v4471_v21 = vadd.s32 480, %v4412_v1  ;;  %vm285_vm0 = vcmp.eq.s32.totalorder %v4415_v2, %v4450_v14  ;;  %vm349_vm1 = vcmp.eq.s32.totalorder %v4418_v3, %v4450_v14 }
  0x16   :  { %7426 = vst [vmem:[#allocation13_spill] sm:$0xff] %v4462_v18  ;;  %vm283_vm2 = vcmp.eq.s32.totalorder %v4421_v4, %v4450_v14  ;;  %vm317_vm3 = vcmp.eq.s32.totalorder %v4424_v5, %v4450_v14  ;;  %3688 = vmatpush.msk.msra.mxu0 %vm285_vm0, %v7188_v22  ;;  %3720 = vmatpush.msk.msra.mxu2 %vm349_vm1, %v7188_v22  ;;  %v4490_v23 = vadd.s32 80, %v4412_v1  ;;  %v4501_v24 = vadd.s32 216, %v4412_v1 }
  0x17   :  { %7427 = vst [vmem:[#allocation14_spill] sm:$0xff] %v4468_v20  ;;  %vm347_vm4 = vcmp.eq.s32.totalorder %v4427_v6, %v4450_v14  ;;  %vm381_vm5 = vcmp.eq.s32.totalorder %v4430_v7, %v4450_v14  ;;  %vm281_vm6 = vcmp.eq.s32.totalorder %v4433_v8, %v4450_v14  ;;  %3704 = vmatpush.msk.msra.mxu1 %vm317_vm3, %v7188_v22  ;;  %v4516_v25 = vadd.s32 336, %v4412_v1 }
  0x18   :  { %3736 = vmatpush.msk.msra.mxu3 %vm381_vm5, %v7188_v22  ;;  %vm315_vm7 = vcmp.eq.s32.totalorder %v4438_v10, %v4450_v14  ;;  %vm345_vm8 = vcmp.eq.s32.totalorder %v4441_v11, %v4450_v14  ;;  %vm379_vm9 = vcmp.eq.s32.totalorder %v4444_v12, %v4450_v14  ;;  %3689 = vmatpush.msk.msra.mxu0 %vm283_vm2, %v7188_v22  ;;  %v4519_v26 = vadd.s32 472, %v4412_v1 }
  0x19   :  { %3721 = vmatpush.msk.msra.mxu2 %vm347_vm4, %v7188_v22  ;;  %vm279_vm10 = vcmp.eq.s32.totalorder %v4447_v13, %v4450_v14  ;;  %vm313_vm11 = vcmp.eq.s32.totalorder %v4453_v15, %v4450_v14  ;;  %3705 = vmatpush.msk.msra.mxu1 %vm315_vm7, %v7188_v22  ;;  %vm343_vm12 = vcmp.eq.s32.totalorder %v4456_v16, %v4450_v14  ;;  %v4533_v27 = vadd.s32 72, %v4412_v1 }
  0x1a   :  { %3737 = vmatpush.msk.msra.mxu3 %vm379_vm9, %v7188_v22  ;;  %vm377_vm13 = vcmp.eq.s32.totalorder %v4459_v17, %v4450_v14  ;;  %3690 = vmatpush.msk.msra.mxu0 %vm281_vm6, %v7188_v22  ;;  %vm277_vm14 = vcmp.eq.s32.totalorder %v4462_v18, %v4450_v14  ;;  %vm311_vm15 = vcmp.eq.s32.totalorder %v4465_v19, %v4450_v14  ;;  %v4544_v28 = vadd.s32 208, %v4412_v1 }
  0x1b   :  { %3722 = vmatpush.msk.msra.mxu2 %vm345_vm8, %v7188_v22  ;;  %vm375_vm0 = vcmp.eq.s32.totalorder %v4471_v21, %v4450_v14  ;;  %3706 = vmatpush.msk.msra.mxu1 %vm313_vm11, %v7188_v22  ;;  %vm341_vm1 = vcmp.eq.s32.totalorder %v4468_v20, %v4450_v14  ;;  %vm275_vm2 = vcmp.eq.s32.totalorder %v4490_v23, %v4450_v14  ;;  %v4557_v29 = vadd.s32 328, %v4412_v1 }
  0x1c   :  { %3738 = vmatpush.msk.msra.mxu3 %vm377_vm13, %v7188_v22  ;;  %vm309_vm3 = vcmp.eq.s32.totalorder %v4501_v24, %v4450_v14  ;;  %3691 = vmatpush.msk.msra.mxu0 %vm279_vm10, %v7188_v22  ;;  %vm373_vm4 = vcmp.eq.s32.totalorder %v4519_v26, %v4450_v14  ;;  %v4560_v30 = vadd.s32 464, %v4412_v1  ;;  %v4563_v31 = vadd.s32 64, %v4412_v1 }
  0x1d   :  { %3723 = vmatpush.msk.msra.mxu2 %vm343_vm12, %v7188_v22  ;;  %3707 = vmatpush.msk.msra.mxu1 %vm311_vm15, %v7188_v22  ;;  %vm339_vm5 = vcmp.eq.s32.totalorder %v4516_v25, %v4450_v14  ;;  %v4570_v32 = vadd.s32 200, %v4412_v1  ;;  %v4573_v33 = vadd.s32 320, %v4412_v1  ;;  %v4576_v34 = vadd.s32 456, %v4412_v1 }
  0x1e   :  { %7428 = vst [vmem:[#allocation15_spill] sm:$0xff] %v4563_v31  ;;  %3739 = vmatpush.msk.msra.mxu3 %vm375_vm0, %v7188_v22  ;;  %3692 = vmatpush.msk.msra.mxu0 %vm277_vm14, %v7188_v22  ;;  %vm273_vm6 = vcmp.eq.s32.totalorder %v4533_v27, %v4450_v14  ;;  %vm307_vm7 = vcmp.eq.s32.totalorder %v4544_v28, %v4450_v14  ;;  %v4593_v35 = vadd.s32 56, %v4412_v1  ;;  %v4610_v36 = vadd.s32 192, %v4412_v1 }
  0x1f   :  { %7429 = vst [vmem:[#allocation16_spill] sm:$0xff] %v4570_v32  ;;  %3724 = vmatpush.msk.msra.mxu2 %vm341_vm1, %v7188_v22  ;;  %vm371_vm8 = vcmp.eq.s32.totalorder %v4560_v30, %v4450_v14  ;;  %3708 = vmatpush.msk.msra.mxu1 %vm309_vm3, %v7188_v22  ;;  %vm337_vm9 = vcmp.eq.s32.totalorder %v4557_v29, %v4450_v14  ;;  %v4623_v37 = vadd.s32 312, %v4412_v1  ;;  %v4626_v38 = vadd.s32 448, %v4412_v1 }
  0x20   :  { %7430 = vst [vmem:[#allocation17_spill] sm:$0xff] %v4593_v35  ;;  %3740 = vmatpush.msk.msra.mxu3 %vm373_vm4, %v7188_v22  ;;  %vm271_vm10 = vcmp.eq.s32.totalorder %v4563_v31, %v4450_v14  ;;  %vm305_vm11 = vcmp.eq.s32.totalorder %v4570_v32, %v4450_v14  ;;  %3693 = vmatpush.msk.msra.mxu0 %vm275_vm2, %v7188_v22  ;;  %v4629_v39 = vadd.s32 48, %v4412_v1  ;;  %v4636_v40 = vadd.s32 184, %v4412_v1 }
  0x21   :  { %3725 = vmatpush.msk.msra.mxu2 %vm339_vm5, %v7188_v22  ;;  %vm369_vm12 = vcmp.eq.s32.totalorder %v4576_v34, %v4450_v14  ;;  %3709 = vmatpush.msk.msra.mxu1 %vm307_vm7, %v7188_v22  ;;  %vm335_vm13 = vcmp.eq.s32.totalorder %v4573_v33, %v4450_v14  ;;  %v4639_v41 = vadd.s32 304, %v4412_v1  ;;  %v4642_v42 = vadd.s32 440, %v4412_v1 }
  0x22   :  { %7431 = vst [vmem:[#allocation18_spill] sm:$0xff] %v4629_v39  ;;  %3741 = vmatpush.msk.msra.mxu3 %vm371_vm8, %v7188_v22  ;;  %3694 = vmatpush.msk.msra.mxu0 %vm273_vm6, %v7188_v22  ;;  %vm269_vm14 = vcmp.eq.s32.totalorder %v4593_v35, %v4450_v14  ;;  %vm303_vm15 = vcmp.eq.s32.totalorder %v4610_v36, %v4450_v14  ;;  %v4659_v43 = vadd.s32 40, %v4412_v1  ;;  %v4676_v44 = vadd.s32 176, %v4412_v1 }
  0x23   :  { %7432 = vst [vmem:[#allocation19_spill] sm:$0xff] %v4636_v40  ;;  %3726 = vmatpush.msk.msra.mxu2 %vm337_vm9, %v7188_v22  ;;  %vm367_vm0 = vcmp.eq.s32.totalorder %v4626_v38, %v4450_v14  ;;  %3710 = vmatpush.msk.msra.mxu1 %vm305_vm11, %v7188_v22  ;;  %vm333_vm1 = vcmp.eq.s32.totalorder %v4623_v37, %v4450_v14  ;;  %v4689_v45 = vadd.s32 296, %v4412_v1  ;;  %v4692_v46 = vadd.s32 432, %v4412_v1 }
  0x24   :  { %7433 = vst [vmem:[#allocation20_spill] sm:$0xff] %v4639_v41  ;;  %3742 = vmatpush.msk.msra.mxu3 %vm369_vm12, %v7188_v22  ;;  %vm267_vm2 = vcmp.eq.s32.totalorder %v4629_v39, %v4450_v14  ;;  %vm301_vm3 = vcmp.eq.s32.totalorder %v4636_v40, %v4450_v14  ;;  %3695 = vmatpush.msk.msra.mxu0 %vm271_vm10, %v7188_v22  ;;  %v4695_v47 = vadd.s32 32, %v4412_v1  ;;  %v4702_v48 = vadd.s32 168, %v4412_v1 }
  0x25   :  { %7434 = vst [vmem:[#allocation21_spill] sm:$0xff] %v4642_v42  ;;  %3727 = vmatpush.msk.msra.mxu2 %vm335_vm13, %v7188_v22  ;;  %vm365_vm4 = vcmp.eq.s32.totalorder %v4642_v42, %v4450_v14  ;;  %3711 = vmatpush.msk.msra.mxu1 %vm303_vm15, %v7188_v22  ;;  %vm331_vm5 = vcmp.eq.s32.totalorder %v4639_v41, %v4450_v14  ;;  %v4705_v49 = vadd.s32 288, %v4412_v1  ;;  %v4708_v50 = vadd.s32 424, %v4412_v1 }
  0x26   :  { %7435 = vst [vmem:[#allocation22_spill] sm:$0xff] %v4659_v43  ;;  %3743 = vmatpush.msk.msra.mxu3 %vm367_vm0, %v7188_v22  ;;  %3696 = vmatpush.msk.msra.mxu0 %vm269_vm14, %v7188_v22  ;;  %vm265_vm6 = vcmp.eq.s32.totalorder %v4659_v43, %v4450_v14  ;;  %vm299_vm7 = vcmp.eq.s32.totalorder %v4676_v44, %v4450_v14  ;;  %v4725_v51 = vadd.s32 24, %v4412_v1  ;;  %v4742_v52 = vadd.s32 160, %v4412_v1 }
  0x27   :  { %7436 = vst [vmem:[#allocation23_spill] sm:$0xff] %v4676_v44  ;;  %3728 = vmatpush.msk.msra.mxu2 %vm333_vm1, %v7188_v22  ;;  %vm363_vm8 = vcmp.eq.s32.totalorder %v4692_v46, %v4450_v14  ;;  %3712 = vmatpush.msk.msra.mxu1 %vm301_vm3, %v7188_v22  ;;  %vm329_vm9 = vcmp.eq.s32.totalorder %v4689_v45, %v4450_v14  ;;  %v4755_v53 = vadd.s32 280, %v4412_v1  ;;  %v4758_v54 = vadd.s32 416, %v4412_v1 }
  0x28   :  { %7437 = vst [vmem:[#allocation24_spill] sm:$0xff] %v4689_v45  ;;  %3744 = vmatpush.msk.msra.mxu3 %vm365_vm4, %v7188_v22  ;;  %vm263_vm10 = vcmp.eq.s32.totalorder %v4695_v47, %v4450_v14  ;;  %vm297_vm11 = vcmp.eq.s32.totalorder %v4702_v48, %v4450_v14  ;;  %3697 = vmatpush.msk.msra.mxu0 %vm267_vm2, %v7188_v22  ;;  %v4761_v55 = vadd.s32 16, %v4412_v1  ;;  %v4768_v56 = vadd.s32 152, %v4412_v1 }
  0x29   :  { %7438 = vst [vmem:[#allocation25_spill] sm:$0xff] %v4692_v46  ;;  %3729 = vmatpush.msk.msra.mxu2 %vm331_vm5, %v7188_v22  ;;  %vm361_vm12 = vcmp.eq.s32.totalorder %v4708_v50, %v4450_v14  ;;  %3713 = vmatpush.msk.msra.mxu1 %vm299_vm7, %v7188_v22  ;;  %vm327_vm13 = vcmp.eq.s32.totalorder %v4705_v49, %v4450_v14  ;;  %v4771_v57 = vadd.s32 272, %v4412_v1  ;;  %v4774_v58 = vadd.s32 408, %v4412_v1 }
  0x2a   :  { %7439 = vst [vmem:[#allocation26_spill] sm:$0xff] %v4695_v47  ;;  %3745 = vmatpush.msk.msra.mxu3 %vm363_vm8, %v7188_v22  ;;  %3698 = vmatpush.msk.msra.mxu0 %vm265_vm6, %v7188_v22  ;;  %vm261_vm14 = vcmp.eq.s32.totalorder %v4725_v51, %v4450_v14  ;;  %vm295_vm15 = vcmp.eq.s32.totalorder %v4742_v52, %v4450_v14  ;;  %v4803_v59 = vadd.s32 8, %v4412_v1  ;;  %v4806_v60 = vadd.s32 144, %v4412_v1 }
  0x2b   :  { %7440 = vst [vmem:[#allocation27_spill] sm:$0xff] %v4702_v48  ;;  %3730 = vmatpush.msk.msra.mxu2 %vm329_vm9, %v7188_v22  ;;  %vm359_vm0 = vcmp.eq.s32.totalorder %v4758_v54, %v4450_v14  ;;  %3714 = vmatpush.msk.msra.mxu1 %vm297_vm11, %v7188_v22  ;;  %vm325_vm1 = vcmp.eq.s32.totalorder %v4755_v53, %v4450_v14  ;;  %v4821_v61 = vadd.s32 264, %v4412_v1  ;;  %v4824_v62 = vadd.s32 400, %v4412_v1 }
  0x2c   :  { %7441 = vst [vmem:[#allocation28_spill] sm:$0xff] %v4705_v49  ;;  %3746 = vmatpush.msk.msra.mxu3 %vm361_vm12, %v7188_v22  ;;  %vm259_vm2 = vcmp.eq.s32.totalorder %v4761_v55, %v4450_v14  ;;  %3699 = vmatpush.msk.msra.mxu0 %vm263_vm10, %v7188_v22  ;;  %vm293_vm3 = vcmp.eq.s32.totalorder %v4768_v56, %v4450_v14  ;;  %v4831_v63 = vadd.s32 136, %v4412_v1  ;;  %v4834_v0 = vadd.s32 256, %v4412_v1 }
  0x2d   :  { %7442 = vst [vmem:[#allocation29_spill] sm:$0xff] %v4708_v50  ;;  %3731 = vmatpush.msk.msra.mxu2 %vm327_vm13, %v7188_v22  ;;  %vm357_vm4 = vcmp.eq.s32.totalorder %v4774_v58, %v4450_v14  ;;  %3715 = vmatpush.msk.msra.mxu1 %vm295_vm15, %v7188_v22  ;;  %vm323_vm5 = vcmp.eq.s32.totalorder %v4771_v57, %v4450_v14  ;;  %v7472_v47 = vmov 1.0  }
  0x2e   :  { %7443 = vst [vmem:[#allocation30_spill] sm:$0xff] %v4725_v51  ;;  %3747 = vmatpush.msk.msra.mxu3 %vm359_vm0, %v7188_v22  ;;  %3700 = vmatpush.msk.msra.mxu0 %vm261_vm14, %v7188_v22  ;;  %vm291_vm6 = vcmp.eq.s32.totalorder %v4806_v60, %v4450_v14  ;;  %vm355_vm7 = vcmp.eq.s32.totalorder %v4824_v62, %v4450_v14  ;;  %v4908_v51 = vld [vmem:[#allocation7 + $0x8] sm:$0xff] }
  0x2f   :  { %7444 = vst [vmem:[#allocation31_spill] sm:$0xff] %v4742_v52  ;;  %3732 = vmatpush.msk.msra.mxu2 %vm325_vm1, %v7188_v22  ;;  %3716 = vmatpush.msk.msra.mxu1 %vm293_vm3, %v7188_v22  ;;  %vm257_vm8 = vcmp.eq.s32.totalorder %v4803_v59, %v4450_v14  ;;  %vm321_vm9 = vcmp.eq.s32.totalorder %v4821_v61, %v4450_v14  ;;  %v4914_v52 = vadd.s32 752, %v4412_v1 }
  0x30   :  { %7445 = vst [vmem:[#allocation32_spill] sm:$0xff] %v4755_v53  ;;  %3748 = vmatpush.msk.msra.mxu3 %vm357_vm4, %v7188_v22  ;;  %3701 = vmatpush.msk.msra.mxu0 %vm259_vm2, %v7188_v22  ;;  %vm289_vm10 = vcmp.eq.s32.totalorder %v4831_v63, %v4450_v14  ;;  %vm255_vm12 = vcmp.eq.s32.totalorder %v4412_v1, %v4450_v14  ;;  %v4911_v53 = vadd.s32 1008, %v4412_v1 }
  0x31   :  { %7446 = vst [vmem:[#allocation33_spill] sm:$0xff] %v4758_v54  ;;  %3733 = vmatpush.msk.msra.mxu2 %vm323_vm5, %v7188_v22  ;;  %3717 = vmatpush.msk.msra.mxu1 %vm291_vm6, %v7188_v22  ;;  %vm319_vm13 = vcmp.eq.s32.totalorder %v4834_v0, %v4450_v14  ;;  %v4916_v54 = vld [vmem:[#allocation7 + $0x18] sm:$0xff] }
  0x32   :  { %7447 = vst [vmem:[#allocation34_spill] sm:$0xff] %v4761_v55  ;;  %3749 = vmatpush.msk.msra.mxu3 %vm355_vm7, %v7188_v22  ;;  %3702 = vmatpush.msk.msra.mxu0 %vm257_vm8, %v7188_v22  ;;  %v4902_v55 = vadd.s32 624, %v4412_v1  ;;  %vm507_vm6 = vcmp.eq.s32.totalorder %v4911_v53, %v4450_v14  ;;  %vm443_vm7 = vcmp.eq.s32.totalorder %v4914_v52, %v4450_v14 }
  0x33   :  { %7448 = vst [vmem:[#allocation35_spill] sm:$0xff] %v4768_v56  ;;  %v4837_v56 = vadd.s32 392, %v4412_v1  ;;  %3734 = vmatpush.msk.msra.mxu2 %vm321_vm9, %v7188_v22  ;;  %3718 = vmatpush.msk.msra.mxu1 %vm289_vm10, %v7188_v22 }
  0x34   :  { %7449 = vst [vmem:[#allocation36_spill] sm:$0xff] %v4771_v57  ;;  %v4858_v57 = vadd.s32 888, %v4412_v1  ;;  %3703 = vmatpush.msk.msra.mxu0 %vm255_vm12, %v7188_v22  ;;  %vm411_vm5 = vcmp.eq.s32.totalorder %v4902_v55, %v4450_v14 }
  0x35   :  { %7450 = vst [vmem:[#allocation37_spill] sm:$0xff] %v4774_v58  ;;  %v4861_v58 = vadd.s32 128, %v4412_v1  ;;  %vm353_vm11 = vcmp.eq.s32.totalorder %v4837_v56, %v4450_v14  ;;  %3735 = vmatpush.msk.msra.mxu2 %vm319_vm13, %v7188_v22 }
  0x36   :  { %7451 = vst [vmem:[#allocation38_spill] sm:$0xff] %v4803_v59  ;;  %v4873_v59 = vadd.s32 384, %v4412_v1  ;;  %3750 = vmatpush.msk.msra.mxu3 %vm353_vm11, %v7188_v22  ;;  %vm477_vm14 = vcmp.eq.s32.totalorder %v4858_v57, %v4450_v14  ;;  %v4921_v22 = vadd.s32 872, %v4412_v1 }
  0x37   :  { %7452 = vst [vmem:[#allocation39_spill] sm:$0xff] %v4806_v60  ;;  %v4887_v60 = vadd.s32 1016, %v4412_v1  ;;  %vm287_vm15 = vcmp.eq.s32.totalorder %v4861_v58, %v4450_v14  ;;  %3784 = vmatpush.msk.msrb.mxu2 %vm477_vm14, %v7472_v47 }
  0x38   :  { %7453 = vst [vmem:[#allocation40_spill] sm:$0xff] %v4821_v61  ;;  %v4882_v61 = vadd.s32 632, %v4412_v1  ;;  %vm351_vm0 = vcmp.eq.s32.totalorder %v4873_v59, %v4450_v14  ;;  %3719 = vmatpush.msk.msra.mxu1 %vm287_vm15, %v7472_v47  ;;  %vm473_vm8 = vcmp.eq.s32.totalorder %v4921_v22, %v4450_v14 }
  0x39   :  { %7454 = vst [vmem:[#allocation41_spill] sm:$0xff] %v4824_v62  ;;  %v4890_v62 = vadd.s32 760, %v4412_v1  ;;  %vm509_vm2 = vcmp.eq.s32.totalorder %v4887_v60, %v4450_v14  ;;  %3751 = vmatpush.msk.msra.mxu3 %vm351_vm0, %v7472_v47  ;;  %1850 = vmatmul.f32.vlgmr.msra.gmra.mxu1 %v4908_v51 }
  0x3a   :  { %7455 = vst [vmem:[#allocation42_spill] sm:$0xff] %v4831_v63  ;;  %v58_v63 = vld [vmem:[#allocation7] sm:$0xff]  ;;  %vm413_vm1 = vcmp.eq.s32.totalorder %v4882_v61, %v4450_v14  ;;  %1932 = vmatmul.f32.vlgmr.msra.gmra.mxu3 %v4916_v54 }
  0x3b   :  { %7456 = vst [vmem:[#allocation43_spill] sm:$0xff] %v4834_v0  ;;  %v4899_v0 = vadd.s32 880, %v4412_v1  ;;  %1809 = vmatmul.f32.vlgmr.msra.gmra.mxu0 %v58_v63  ;;  %vm445_vm3 = vcmp.eq.s32.totalorder %v4890_v62, %v4450_v14  ;;  %v4948_v63 = vadd.s32 744, %v4412_v1  ;;  %3800 = vmatpush.msk.msrb.mxu3 %vm509_vm2, %v7472_v47 }
  0x3c   :  { %7457 = vst [vmem:[#allocation44_spill] sm:$0xff] %v4837_v56  ;;  %v60_v56 = vld [vmem:[#allocation7 + $0x10] sm:$0xff]  ;;  %3752 = vmatpush.msk.msrb.mxu0 %vm413_vm1, %v7472_v47  ;;  %3768 = vmatpush.msk.msrb.mxu1 %vm445_vm3, %v7472_v47 }
  0x3d   :  { %7458 = vst [vmem:[#allocation45_spill] sm:$0xff] %v4858_v57  ;;  %1891 = vmatmul.f32.vlgmr.msra.gmra.mxu2 %v60_v56  ;;  %vm475_vm4 = vcmp.eq.s32.totalorder %v4899_v0, %v4450_v14  ;;  %v4945_v56 = vadd.s32 1000, %v4412_v1  ;;  %3801 = vmatpush.msk.msrb.mxu3 %vm507_vm6, %v7472_v47  ;;  %vm441_vm11 = vcmp.eq.s32.totalorder %v4948_v63, %v4450_v14  ;;  %v5005_v57 = vadd.s32 728, %v4412_v1 }
  0x3e   :  { %7459 = vst [vmem:[#allocation46_spill] sm:$0xff] %v4861_v58  ;;  %3785 = vmatpush.msk.msrb.mxu2 %vm475_vm4, %v7472_v47  ;;  %3753 = vmatpush.msk.msrb.mxu0 %vm411_vm5, %v7472_v47  ;;  %v5009_v58 = vld [vmem:[#allocation7 + $0x58] sm:$0xff] }
  0x3f   :  { %7460 = vst [vmem:[#allocation47_spill] sm:$0xff] %v4873_v59  ;;  %v4924_v59 = vadd.s32 616, %v4412_v1  ;;  %3769 = vmatpush.msk.msrb.mxu1 %vm443_vm7, %v7472_v47  ;;  %vm505_vm10 = vcmp.eq.s32.totalorder %v4945_v56, %v4450_v14  ;;  %vm437_vm3 = vcmp.eq.s32.totalorder %v5005_v57, %v4450_v14 }
  0x40   :  { %7461 = vst [vmem:[#allocation48_spill] sm:$0xff] %v4882_v61  ;;  %3786 = vmatpush.msk.msrb.mxu2 %vm473_vm8, %v7472_v47  ;;  %v5002_v61 = vadd.s32 984, %v4412_v1  ;;  %3802 = vmatpush.msk.msrb.mxu3 %vm505_vm10, %v7472_v47 }
  0x41   :  { %7462 = vst [vmem:[#allocation49_spill] sm:$0xff] %v4887_v60  ;;  %vm409_vm9 = vcmp.eq.s32.totalorder %v4924_v59, %v4450_v14  ;;  %v4993_v60 = vld [vmem:[#allocation7 + $0x48] sm:$0xff]  ;;  %3770 = vmatpush.msk.msrb.mxu1 %vm441_vm11, %v7472_v47 }
  0x42   :  { %7463 = vst [vmem:[#allocation50_spill] sm:$0xff] %v4890_v62  ;;  %v4990_v62 = vadd.s32 600, %v4412_v1  ;;  %3754 = vmatpush.msk.msrb.mxu0 %vm409_vm9, %v7472_v47  ;;  %1853 = vmatmul.f32.gmra.mxu1 %v4993_v60  ;;  %vm501_vm2 = vcmp.eq.s32.totalorder %v5002_v61, %v4450_v14 }
  0x43   :  { %7464 = vst [vmem:[#allocation51_spill] sm:$0xff] %v4899_v0  ;;  %v4978_v0 = vadd.s32 736, %v4412_v1  ;;  %1935 = vmatmul.f32.gmra.mxu3 %v5009_v58 }
  0x44   :  { %7465 = vst [vmem:[#allocation52_spill] sm:$0xff] %v4902_v55  ;;  %v4975_v55 = vadd.s32 992, %v4412_v1  ;;  %vm405_vm1 = vcmp.eq.s32.totalorder %v4990_v62, %v4450_v14 }
  0x45   :  { %7466 = vst [vmem:[#allocation53_spill] sm:$0xff] %v4908_v51  ;;  %v4957_v51 = vadd.s32 864, %v4412_v1  ;;  %vm439_vm15 = vcmp.eq.s32.totalorder %v4978_v0, %v4450_v14 }
  0x46   :  { %7467 = vst [vmem:[#allocation54_spill] sm:$0xff] %v4911_v53  ;;  %v4972_v53 = vld [vmem:[#allocation7 + $0x50] sm:$0xff]  ;;  %vm503_vm14 = vcmp.eq.s32.totalorder %v4975_v55, %v4450_v14  ;;  %3771 = vmatpush.msk.msrb.mxu1 %vm439_vm15, %v7472_v47 }
  0x47   :  { %7468 = vst [vmem:[#allocation55_spill] sm:$0xff] %v4914_v52  ;;  %v4970_v52 = vld [vmem:[#allocation7 + $0x40] sm:$0xff]  ;;  %vm471_vm12 = vcmp.eq.s32.totalorder %v4957_v51, %v4450_v14  ;;  %1894 = vmatmul.f32.gmra.mxu2 %v4972_v53  ;;  %3803 = vmatpush.msk.msrb.mxu3 %vm503_vm14, %v7472_v47 }
  0x48   :  { %7469 = vst [vmem:[#allocation56_spill] sm:$0xff] %v4916_v54  ;;  %v4966_v54 = vadd.s32 608, %v4412_v1  ;;  %1812 = vmatmul.f32.gmra.mxu0 %v4970_v52  ;;  %3787 = vmatpush.msk.msrb.mxu2 %vm471_vm12, %v7472_v47 }
  0x49   :  { %7470 = vst [vmem:[#allocation57_spill] sm:$0xff] %v4921_v22  ;;  %v4987_v22 = vadd.s32 856, %v4412_v1  ;;  %3804 = vmatpush.msk.msrb.mxu3 %vm501_vm2, %v7472_v47  ;;  %3772 = vmatpush.msk.msrb.mxu1 %vm437_vm3, %v7472_v47 }
  0x4a   :  { %7471 = vst [vmem:[#allocation58_spill] sm:$0xff] %v4924_v59  ;;  %vm407_vm13 = vcmp.eq.s32.totalorder %v4966_v54, %v4450_v14  ;;  %v5014_v59 = vadd.s32 848, %v4412_v1 }
  0x4b   :  { %7473 = vst [vmem:[#allocation59_spill] sm:$0xff] %v4945_v56  ;;  %vm469_vm0 = vcmp.eq.s32.totalorder %v4987_v22, %v4450_v14  ;;  %3755 = vmatpush.msk.msrb.mxu0 %vm407_vm13, %v7472_v47  ;;  %v5107_v56 = vadd.s32 704, %v4412_v1 }
  0x4c   :  { %7474 = vst [vmem:[#allocation60_spill] sm:$0xff] %v4948_v63  ;;  %vm467_vm4 = vcmp.eq.s32.totalorder %v5014_v59, %v4450_v14  ;;  %3788 = vmatpush.msk.msrb.mxu2 %vm469_vm0, %v7472_v47  ;;  %v5104_v63 = vadd.s32 960, %v4412_v1 }
  0x4d   :  { %7475 = vst [vmem:[#allocation61_spill] sm:$0xff] %v4957_v51  ;;  %v5017_v51 = vadd.s32 592, %v4412_v1  ;;  %3756 = vmatpush.msk.msrb.mxu0 %vm405_vm1, %v7472_v47  ;;  %vm431_vm15 = vcmp.eq.s32.totalorder %v5107_v56, %v4450_v14 }
  0x4e   :  { %7476 = vst [vmem:[#allocation62_spill] sm:$0xff] %v4966_v54  ;;  %v5091_v54 = vld [vmem:[#allocation7 + $0x88] sm:$0xff]  ;;  %3789 = vmatpush.msk.msrb.mxu2 %vm467_vm4, %v7472_v47  ;;  %vm495_vm14 = vcmp.eq.s32.totalorder %v5104_v63, %v4450_v14 }
  0x4f   :  { %7477 = vst [vmem:[#allocation63_spill] sm:$0xff] %v4970_v52  ;;  %v5041_v52 = vadd.s32 720, %v4412_v1  ;;  %vm403_vm5 = vcmp.eq.s32.totalorder %v5017_v51, %v4450_v14  ;;  %1856 = vmatmul.f32.gmra.mxu1 %v5091_v54 }
  0x50   :  { %7478 = vst [vmem:[#allocation64_spill] sm:$0xff] %v4972_v53  ;;  %v5038_v53 = vadd.s32 976, %v4412_v1  ;;  %3757 = vmatpush.msk.msrb.mxu0 %vm403_vm5, %v7472_v47 }
  0x51   :  { %7479 = vst [vmem:[#allocation65_spill] sm:$0xff] %v4975_v55  ;;  %v5077_v55 = vadd.s32 712, %v4412_v1  ;;  %vm435_vm7 = vcmp.eq.s32.totalorder %v5041_v52, %v4450_v14 }
  0x52   :  { %7480 = vst [vmem:[#allocation66_spill] sm:$0xff] %v4978_v0  ;;  %v5063_v0 = vld [vmem:[#allocation7 + $0x90] sm:$0xff]  ;;  %vm499_vm6 = vcmp.eq.s32.totalorder %v5038_v53, %v4450_v14  ;;  %3773 = vmatpush.msk.msrb.mxu1 %vm435_vm7, %v7472_v47 }
  0x53   :  { %7481 = vst [vmem:[#allocation67_spill] sm:$0xff] %v4987_v22  ;;  %v5086_v22 = vadd.s32 832, %v4412_v1  ;;  %1897 = vmatmul.f32.gmra.mxu2 %v5063_v0  ;;  %3805 = vmatpush.msk.msrb.mxu3 %vm499_vm6, %v7472_v47  ;;  %vm433_vm11 = vcmp.eq.s32.totalorder %v5077_v55, %v4450_v14 }
  0x54   :  { %7482 = vst [vmem:[#allocation68_spill] sm:$0xff] %v4990_v62  ;;  %v5089_v62 = vadd.s32 576, %v4412_v1  ;;  %3774 = vmatpush.msk.msrb.mxu1 %vm433_vm11, %v7472_v47 }
  0x55   :  { %7483 = vst [vmem:[#allocation69_spill] sm:$0xff] %v4993_v60  ;;  %v5050_v60 = vadd.s32 840, %v4412_v1  ;;  %vm463_vm12 = vcmp.eq.s32.totalorder %v5086_v22, %v4450_v14 }
  0x56   :  { %7484 = vst [vmem:[#allocation70_spill] sm:$0xff] %v5002_v61  ;;  %v5061_v61 = vld [vmem:[#allocation7 + $0x80] sm:$0xff]  ;;  %vm399_vm13 = vcmp.eq.s32.totalorder %v5089_v62, %v4450_v14  ;;  %3775 = vmatpush.msk.msrb.mxu1 %vm431_vm15, %v7472_v47 }
  0x57   :  { %7485 = vst [vmem:[#allocation71_spill] sm:$0xff] %v5005_v57  ;;  %v5074_v57 = vadd.s32 968, %v4412_v1  ;;  %vm465_vm8 = vcmp.eq.s32.totalorder %v5050_v60, %v4450_v14  ;;  %1815 = vmatmul.f32.gmra.mxu0 %v5061_v61 }
  0x58   :  { %7486 = vst [vmem:[#allocation72_spill] sm:$0xff] %v5009_v58  ;;  %v5059_v58 = vadd.s32 584, %v4412_v1  ;;  %3790 = vmatpush.msk.msrb.mxu2 %vm465_vm8, %v7472_v47 }
  0x59   :  { %7487 = vst [vmem:[#allocation73_spill] sm:$0xff] %v5014_v59  ;;  %v5111_v59 = vld [vmem:[#allocation7 + $0x98] sm:$0xff]  ;;  %vm497_vm10 = vcmp.eq.s32.totalorder %v5074_v57, %v4450_v14 }
  0x5a   :  { %7488 = vst [vmem:[#allocation74_spill] sm:$0xff] %v5017_v51  ;;  %vm401_vm9 = vcmp.eq.s32.totalorder %v5059_v58, %v4450_v14  ;;  %v5116_v51 = vadd.s32 824, %v4412_v1  ;;  %1938 = vmatmul.f32.gmra.mxu3 %v5111_v59  ;;  %3791 = vmatpush.msk.msrb.mxu2 %vm463_vm12, %v7472_v47 }
  0x5b   :  { %7489 = vst [vmem:[#allocation75_spill] sm:$0xff] %v5038_v53  ;;  %3758 = vmatpush.msk.msrb.mxu0 %vm401_vm9, %v7472_v47  ;;  %3806 = vmatpush.msk.msrb.mxu3 %vm497_vm10, %v7472_v47  ;;  %v5209_v53 = vadd.s32 680, %v4412_v1 }
  0x5c   :  { %7490 = vst [vmem:[#allocation76_spill] sm:$0xff] %v5041_v52  ;;  %vm461_vm0 = vcmp.eq.s32.totalorder %v5116_v51, %v4450_v14  ;;  %v5206_v52 = vadd.s32 936, %v4412_v1 }
  0x5d   :  { %7491 = vst [vmem:[#allocation77_spill] sm:$0xff] %v5050_v60  ;;  %v5119_v60 = vadd.s32 568, %v4412_v1  ;;  %3759 = vmatpush.msk.msrb.mxu0 %vm399_vm13, %v7472_v47  ;;  %3807 = vmatpush.msk.msrb.mxu3 %vm495_vm14, %v7472_v47  ;;  %vm425_vm11 = vcmp.eq.s32.totalorder %v5209_v53, %v4450_v14 }
  0x5e   :  { %7492 = vst [vmem:[#allocation78_spill] sm:$0xff] %v5059_v58  ;;  %v5193_v58 = vld [vmem:[#allocation7 + $0xc8] sm:$0xff]  ;;  %3792 = vmatpush.msk.msrb.mxu2 %vm461_vm0, %v7472_v47  ;;  %vm489_vm10 = vcmp.eq.s32.totalorder %v5206_v52, %v4450_v14 }
  0x5f   :  { %7493 = vst [vmem:[#allocation79_spill] sm:$0xff] %v5061_v61  ;;  %v5143_v61 = vadd.s32 696, %v4412_v1  ;;  %vm397_vm1 = vcmp.eq.s32.totalorder %v5119_v60, %v4450_v14  ;;  %1859 = vmatmul.f32.gmra.mxu1 %v5193_v58 }
  0x60   :  { %7494 = vst [vmem:[#allocation80_spill] sm:$0xff] %v5063_v0  ;;  %v5140_v0 = vadd.s32 952, %v4412_v1  ;;  %3760 = vmatpush.msk.msrb.mxu0 %vm397_vm1, %v7472_v47 }
  0x61   :  { %7495 = vst [vmem:[#allocation81_spill] sm:$0xff] %v5074_v57  ;;  %v5179_v57 = vadd.s32 688, %v4412_v1  ;;  %vm429_vm3 = vcmp.eq.s32.totalorder %v5143_v61, %v4450_v14 }
  0x62   :  { %7496 = vst [vmem:[#allocation82_spill] sm:$0xff] %v5077_v55  ;;  %v5165_v55 = vld [vmem:[#allocation7 + $0xd0] sm:$0xff]  ;;  %vm493_vm2 = vcmp.eq.s32.totalorder %v5140_v0, %v4450_v14  ;;  %3776 = vmatpush.msk.msrb.mxu1 %vm429_vm3, %v7472_v47 }
  0x63   :  { %7497 = vst [vmem:[#allocation83_spill] sm:$0xff] %v5086_v22  ;;  %v5188_v22 = vadd.s32 808, %v4412_v1  ;;  %1900 = vmatmul.f32.gmra.mxu2 %v5165_v55  ;;  %3808 = vmatpush.msk.msrb.mxu3 %vm493_vm2, %v7472_v47  ;;  %vm427_vm7 = vcmp.eq.s32.totalorder %v5179_v57, %v4450_v14 }
  0x64   :  { %7498 = vst [vmem:[#allocation84_spill] sm:$0xff] %v5089_v62  ;;  %v5191_v62 = vadd.s32 552, %v4412_v1  ;;  %3777 = vmatpush.msk.msrb.mxu1 %vm427_vm7, %v7472_v47 }
  0x65   :  { %7499 = vst [vmem:[#allocation85_spill] sm:$0xff] %v5091_v54  ;;  %v5152_v54 = vadd.s32 816, %v4412_v1  ;;  %vm457_vm8 = vcmp.eq.s32.totalorder %v5188_v22, %v4450_v14 }
  0x66   :  { %7500 = vst [vmem:[#allocation86_spill] sm:$0xff] %v5104_v63  ;;  %v5163_v63 = vld [vmem:[#allocation7 + $0xc0] sm:$0xff]  ;;  %vm393_vm9 = vcmp.eq.s32.totalorder %v5191_v62, %v4450_v14  ;;  %3778 = vmatpush.msk.msrb.mxu1 %vm425_vm11, %v7472_v47 }
  0x67   :  { %7501 = vst [vmem:[#allocation87_spill] sm:$0xff] %v5107_v56  ;;  %v5176_v56 = vadd.s32 944, %v4412_v1  ;;  %vm459_vm4 = vcmp.eq.s32.totalorder %v5152_v54, %v4450_v14  ;;  %1818 = vmatmul.f32.gmra.mxu0 %v5163_v63 }
  0x68   :  { %7502 = vst [vmem:[#allocation88_spill] sm:$0xff] %v5111_v59  ;;  %v5161_v59 = vadd.s32 560, %v4412_v1  ;;  %3793 = vmatpush.msk.msrb.mxu2 %vm459_vm4, %v7472_v47 }
  0x69   :  { %7503 = vst [vmem:[#allocation89_spill] sm:$0xff] %v5116_v51  ;;  %v5213_v51 = vld [vmem:[#allocation7 + $0xd8] sm:$0xff]  ;;  %vm491_vm6 = vcmp.eq.s32.totalorder %v5176_v56, %v4450_v14 }
  0x6a   :  { %7504 = vst [vmem:[#allocation90_spill] sm:$0xff] %v5119_v60  ;;  %vm395_vm5 = vcmp.eq.s32.totalorder %v5161_v59, %v4450_v14  ;;  %v5218_v60 = vadd.s32 800, %v4412_v1  ;;  %1941 = vmatmul.f32.gmra.mxu3 %v5213_v51  ;;  %3794 = vmatpush.msk.msrb.mxu2 %vm457_vm8, %v7472_v47 }
  0x6b   :  { %7505 = vst [vmem:[#allocation91_spill] sm:$0xff] %v5140_v0  ;;  %3761 = vmatpush.msk.msrb.mxu0 %vm395_vm5, %v7472_v47  ;;  %3809 = vmatpush.msk.msrb.mxu3 %vm491_vm6, %v7472_v47  ;;  %v5311_v0 = vadd.s32 656, %v4412_v1 }
  0x6c   :  { %7506 = vst [vmem:[#allocation92_spill] sm:$0xff] %v5143_v61  ;;  %vm455_vm12 = vcmp.eq.s32.totalorder %v5218_v60, %v4450_v14  ;;  %v5308_v61 = vadd.s32 912, %v4412_v1 }
  0x6d   :  { %7507 = vst [vmem:[#allocation93_spill] sm:$0xff] %v5152_v54  ;;  %v5221_v54 = vadd.s32 544, %v4412_v1  ;;  %3762 = vmatpush.msk.msrb.mxu0 %vm393_vm9, %v7472_v47  ;;  %3810 = vmatpush.msk.msrb.mxu3 %vm489_vm10, %v7472_v47  ;;  %vm419_vm7 = vcmp.eq.s32.totalorder %v5311_v0, %v4450_v14 }
  0x6e   :  { %7508 = vst [vmem:[#allocation94_spill] sm:$0xff] %v5161_v59  ;;  %v5295_v59 = vld [vmem:[#allocation7 + $0x108] sm:$0xff]  ;;  %3795 = vmatpush.msk.msrb.mxu2 %vm455_vm12, %v7472_v47  ;;  %vm483_vm6 = vcmp.eq.s32.totalorder %v5308_v61, %v4450_v14 }
  0x6f   :  { %7509 = vst [vmem:[#allocation95_spill] sm:$0xff] %v5163_v63  ;;  %v5245_v63 = vadd.s32 672, %v4412_v1  ;;  %vm391_vm13 = vcmp.eq.s32.totalorder %v5221_v54, %v4450_v14  ;;  %1862 = vmatmul.f32.gmra.mxu1 %v5295_v59 }
  0x70   :  { %7510 = vst [vmem:[#allocation96_spill] sm:$0xff] %v5165_v55  ;;  %v5242_v55 = vadd.s32 928, %v4412_v1  ;;  %3763 = vmatpush.msk.msrb.mxu0 %vm391_vm13, %v7472_v47 }
  0x71   :  { %7511 = vst [vmem:[#allocation97_spill] sm:$0xff] %v5176_v56  ;;  %v5281_v56 = vadd.s32 664, %v4412_v1  ;;  %vm423_vm15 = vcmp.eq.s32.totalorder %v5245_v63, %v4450_v14 }
  0x72   :  { %7512 = vst [vmem:[#allocation98_spill] sm:$0xff] %v5179_v57  ;;  %v5267_v57 = vld [vmem:[#allocation7 + $0x110] sm:$0xff]  ;;  %vm487_vm14 = vcmp.eq.s32.totalorder %v5242_v55, %v4450_v14  ;;  %3779 = vmatpush.msk.msrb.mxu1 %vm423_vm15, %v7472_v47 }
  0x73   :  { %7513 = vst [vmem:[#allocation99_spill] sm:$0xff] %v5188_v22  ;;  %v5290_v22 = vadd.s32 784, %v4412_v1  ;;  %1903 = vmatmul.f32.gmra.mxu2 %v5267_v57  ;;  %3811 = vmatpush.msk.msrb.mxu3 %vm487_vm14, %v7472_v47  ;;  %vm421_vm3 = vcmp.eq.s32.totalorder %v5281_v56, %v4450_v14 }
  0x74   :  { %7514 = vst [vmem:[#allocation100_spill] sm:$0xff] %v5191_v62  ;;  %v5293_v62 = vadd.s32 528, %v4412_v1  ;;  %3780 = vmatpush.msk.msrb.mxu1 %vm421_vm3, %v7472_v47 }
  0x75   :  { %7515 = vst [vmem:[#allocation101_spill] sm:$0xff] %v5193_v58  ;;  %v5254_v58 = vadd.s32 792, %v4412_v1  ;;  %vm451_vm4 = vcmp.eq.s32.totalorder %v5290_v22, %v4450_v14 }
  0x76   :  { %7516 = vst [vmem:[#allocation102_spill] sm:$0xff] %v5206_v52  ;;  %v5265_v52 = vld [vmem:[#allocation7 + $0x100] sm:$0xff]  ;;  %vm387_vm5 = vcmp.eq.s32.totalorder %v5293_v62, %v4450_v14  ;;  %3781 = vmatpush.msk.msrb.mxu1 %vm419_vm7, %v7472_v47 }
  0x77   :  { %7517 = vst [vmem:[#allocation103_spill] sm:$0xff] %v5209_v53  ;;  %v5278_v53 = vadd.s32 920, %v4412_v1  ;;  %vm453_vm0 = vcmp.eq.s32.totalorder %v5254_v58, %v4450_v14  ;;  %1821 = vmatmul.f32.gmra.mxu0 %v5265_v52 }
  0x78   :  { %7518 = vst [vmem:[#allocation104_spill] sm:$0xff] %v5213_v51  ;;  %v5263_v51 = vadd.s32 536, %v4412_v1  ;;  %3796 = vmatpush.msk.msrb.mxu2 %vm453_vm0, %v7472_v47 }
  0x79   :  { %7519 = vst [vmem:[#allocation105_spill] sm:$0xff] %v5218_v60  ;;  %v5315_v60 = vld [vmem:[#allocation7 + $0x118] sm:$0xff]  ;;  %vm485_vm2 = vcmp.eq.s32.totalorder %v5278_v53, %v4450_v14 }
  0x7a   :  { %7520 = vst [vmem:[#allocation106_spill] sm:$0xff] %v5221_v54  ;;  %vm389_vm1 = vcmp.eq.s32.totalorder %v5263_v51, %v4450_v14  ;;  %v5320_v54 = vadd.s32 776, %v4412_v1  ;;  %1944 = vmatmul.f32.gmra.mxu3 %v5315_v60  ;;  %3797 = vmatpush.msk.msrb.mxu2 %vm451_vm4, %v7472_v47 }
  0x7b   :  { %7521 = vst [vmem:[#allocation107_spill] sm:$0xff] %v5242_v55  ;;  %3764 = vmatpush.msk.msrb.mxu0 %vm389_vm1, %v7472_v47  ;;  %3812 = vmatpush.msk.msrb.mxu3 %vm485_vm2, %v7472_v47 }
  0x7c   :  { %7522 = vst [vmem:[#allocation108_spill] sm:$0xff] %v5245_v63  ;;  %vm449_vm8 = vcmp.eq.s32.totalorder %v5320_v54, %v4450_v14 }
  0x7d   :  { %7523 = vst [vmem:[#allocation109_spill] sm:$0xff] %v5254_v58  ;;  %v5323_v58 = vadd.s32 520, %v4412_v1  ;;  %3765 = vmatpush.msk.msrb.mxu0 %vm387_vm5, %v7472_v47  ;;  %3813 = vmatpush.msk.msrb.mxu3 %vm483_vm6, %v7472_v47 }
  0x7e   :  { %7524 = vst [vmem:[#allocation110_spill] sm:$0xff] %v5263_v51  ;;  %3798 = vmatpush.msk.msrb.mxu2 %vm449_vm8, %v7472_v47 }
  0x7f   :  { %7525 = vst [vmem:[#allocation111_spill] sm:$0xff] %v5265_v52  ;;  %v5347_v52 = vadd.s32 648, %v4412_v1  ;;  %vm385_vm9 = vcmp.eq.s32.totalorder %v5323_v58, %v4450_v14 }
  0x80   :  { %7526 = vst [vmem:[#allocation112_spill] sm:$0xff] %v5267_v57  ;;  %v5344_v57 = vadd.s32 904, %v4412_v1  ;;  %3766 = vmatpush.msk.msrb.mxu0 %vm385_vm9, %v7472_v47 }
  0x81   :  { %7527 = vst [vmem:[#allocation113_spill] sm:$0xff] %v5278_v53  ;;  %vm417_vm11 = vcmp.eq.s32.totalorder %v5347_v52, %v4450_v14 }
  0x82   :  { %7528 = vst [vmem:[#allocation114_spill] sm:$0xff] %v5281_v56  ;;  %v5369_v56 = vld [vmem:[#allocation7 + $0x150] sm:$0xff]  ;;  %vm481_vm10 = vcmp.eq.s32.totalorder %v5344_v57, %v4450_v14  ;;  %3782 = vmatpush.msk.msrb.mxu1 %vm417_vm11, %v7472_v47 }
  0x83   :  { %7529 = vst [vmem:[#allocation115_spill] sm:$0xff] %v5290_v22  ;;  %1906 = vmatmul.f32.gmra.mxu2 %v5369_v56  ;;  %3814 = vmatpush.msk.msrb.mxu3 %vm481_vm10, %v7472_v47 }
  0x84   :  { %7530 = vst [vmem:[#allocation116_spill] sm:$0xff] %v5293_v62  ;;  %v5394_v62 = vld [vmem:[#allocation7 + $0x148] sm:$0xff] }
  0x85   :  { %7531 = vst [vmem:[#allocation117_spill] sm:$0xff] %v5295_v59  ;;  %v5356_v59 = vadd.s32 768, %v4412_v1  ;;  %1865 = vmatmul.f32.gmra.mxu1 %v5394_v62 }
  0x86   :  { %7532 = vst [vmem:[#allocation118_spill] sm:$0xff] %v5308_v61  ;;  %v5367_v61 = vld [vmem:[#allocation7 + $0x140] sm:$0xff] }
  0x87   :  { %7533 = vst [vmem:[#allocation119_spill] sm:$0xff] %v5311_v0  ;;  %v5386_v0 = vperm.slane %v4435_v9, 1  ;;  %vm447_vm12 = vcmp.eq.s32.totalorder %v5356_v59, %v4450_v14  ;;  %1824 = vmatmul.f32.gmra.mxu0 %v5367_v61  ;;  %v5402_v9 = vld [vmem:[#allocation7 + $0x158] sm:$0xff] }
  0x88   :  { %7534 = vst [vmem:[#allocation120_spill] sm:$0xff] %v5315_v60  ;;  %v5365_v60 = vadd.s32 512, %v4412_v1  ;;  %3799 = vmatpush.msk.msrb.mxu2 %vm447_vm12, %v7472_v47  ;;  %1947 = vmatmul.f32.gmra.mxu3 %v5402_v9 }
  0x89   :  { %7535 = vst [vmem:[#allocation121_spill] sm:$0xff] %v5320_v54  ;;  %v5380_v54 = vadd.s32 896, %v4412_v1  ;;  %vm350_vm0 = vcmp.eq.s32.totalorder %v4418_v3, %v5386_v0  ;;  %vm286_vm1 = vcmp.eq.s32.totalorder %v4415_v2, %v5386_v0  ;;  %vm382_vm2 = vcmp.eq.s32.totalorder %v4430_v7, %v5386_v0 }
  0x8a   :  { %7536 = vst [vmem:[#allocation122_spill] sm:$0xff] %v5323_v58  ;;  %v5383_v58 = vadd.s32 640, %v4412_v1  ;;  %vm383_vm13 = vcmp.eq.s32.totalorder %v5365_v60, %v4450_v14  ;;  %vm318_vm3 = vcmp.eq.s32.totalorder %v4424_v5, %v5386_v0  ;;  %vm348_vm4 = vcmp.eq.s32.totalorder %v4427_v6, %v5386_v0  ;;  %3848 = vmatpush.msk.msra.mxu2 %vm350_vm0, %v7472_v47 }
  0x8b   :  { %7537 = vst [vmem:[#allocation123_spill] sm:$0xff] %v5344_v57  ;;  %vm479_vm14 = vcmp.eq.s32.totalorder %v5380_v54, %v4450_v14  ;;  %3767 = vmatpush.msk.msrb.mxu0 %vm383_vm13, %v7472_v47  ;;  %vm284_vm5 = vcmp.eq.s32.totalorder %v4421_v4, %v5386_v0  ;;  %vm380_vm6 = vcmp.eq.s32.totalorder %v4444_v12, %v5386_v0 }
  0x8c   :  { %7538 = vst [vmem:[#allocation124_spill] sm:$0xff] %v5356_v59  ;;  %vm415_vm15 = vcmp.eq.s32.totalorder %v5383_v58, %v4450_v14  ;;  %3815 = vmatpush.msk.msrb.mxu3 %vm479_vm14, %v7472_v47  ;;  %v5430_v14 = vld [vmem:[#allocation7 + $0x180] sm:$0xff]  ;;  %vm316_vm7 = vcmp.eq.s32.totalorder %v4438_v10, %v5386_v0  ;;  %3849 = vmatpush.msk.msra.mxu2 %vm348_vm4, %v7472_v47 }
  0x8d   :  { %7539 = vst [vmem:[#allocation125_spill] sm:$0xff] %v5369_v56  ;;  %3783 = vmatpush.msk.msrb.mxu1 %vm415_vm15, %v7472_v47  ;;  %3816 = vmatpush.msk.msra.mxu0 %vm286_vm1, %v7472_v47  ;;  %vm346_vm8 = vcmp.eq.s32.totalorder %v4441_v11, %v5386_v0  ;;  %v5450_v56 = vld [vmem:[#allocation7 + $0x198] sm:$0xff]  ;;  %vm282_vm9 = vcmp.eq.s32.totalorder %v4433_v8, %v5386_v0 }
  0x8e   :  { %7540 = vst [vmem:[#allocation126_spill] sm:$0xff] %v5380_v54  ;;  %3864 = vmatpush.msk.msra.mxu3 %vm382_vm2, %v7472_v47  ;;  %vm378_vm10 = vcmp.eq.s32.totalorder %v4459_v17, %v5386_v0  ;;  %vm314_vm11 = vcmp.eq.s32.totalorder %v4453_v15, %v5386_v0  ;;  %3850 = vmatpush.msk.msra.mxu2 %vm346_vm8, %v7472_v47 }
  0x8f   :  { %7541 = vst [vmem:[#allocation127_spill] sm:$0xff] %v5394_v62  ;;  %3832 = vmatpush.msk.msra.mxu1 %vm318_vm3, %v7472_v47  ;;  %v5442_v62 = vld [vmem:[#allocation7 + $0x188] sm:$0xff]  ;;  %3817 = vmatpush.msk.msra.mxu0 %vm284_vm5, %v7472_v47  ;;  %vm344_vm12 = vcmp.eq.s32.totalorder %v4456_v16, %v5386_v0  ;;  %vm280_vm13 = vcmp.eq.s32.totalorder %v4447_v13, %v5386_v0 }
  0x90   :  { %7542 = vst [vmem:[#allocation128_spill] sm:$0xff] %v5402_v9  ;;  %v5432_v9 = vld [vmem:[#allocation7 + $0x190] sm:$0xff]  ;;  %1827 = vmatmul.f32.gmra.mxu0 %v5430_v14  ;;  %3865 = vmatpush.msk.msra.mxu3 %vm380_vm6, %v7472_v47  ;;  %vm376_vm14 = vcmp.eq.s32.totalorder %v4471_v21, %v5386_v0  ;;  %vm312_vm15 = vcmp.eq.s32.totalorder %v4465_v19, %v5386_v0 }
  0x91   :  { %7543 = vst [vmem:[#allocation129_spill] sm:$0xff] %v5442_v62  ;;  %1909 = vmatmul.f32.gmra.mxu2 %v5432_v9  ;;  %3833 = vmatpush.msk.msra.mxu1 %vm316_vm7, %v7472_v47  ;;  %vm342_vm0 = vcmp.eq.s32.totalorder %v4468_v20, %v5386_v0  ;;  %vm278_vm1 = vcmp.eq.s32.totalorder %v4462_v18, %v5386_v0  ;;  %v5490_v20 = vld [vmem:[#allocation7 + $0x1c8] sm:$0xff]  ;;  %v5498_v18 = vld [vmem:[#allocation7 + $0x1d8] sm:$0xff] }
  0x92   :  { %7544 = vst [vmem:[#allocation130_spill] sm:$0xff] %v5450_v56  ;;  %1868 = vmatmul.f32.gmra.mxu1 %v5442_v62  ;;  %1950 = vmatmul.f32.gmra.mxu3 %v5450_v56  ;;  %v5478_v62 = vld [vmem:[#allocation7 + $0x1c0] sm:$0xff]  ;;  %v5480_v56 = vld [vmem:[#allocation7 + $0x1d0] sm:$0xff]  ;;  %vm374_vm2 = vcmp.eq.s32.totalorder %v4519_v26, %v5386_v0  ;;  %vm310_vm3 = vcmp.eq.s32.totalorder %v4501_v24, %v5386_v0 }
  0x93   :  { %3818 = vmatpush.msk.msra.mxu0 %vm282_vm9, %v7472_v47  ;;  %3866 = vmatpush.msk.msra.mxu3 %vm378_vm10, %v7472_v47  ;;  %7545 = vst [vmem:[#allocation131_spill] sm:$0xff] %v5490_v20  ;;  %vm340_vm4 = vcmp.eq.s32.totalorder %v4516_v25, %v5386_v0  ;;  %vm276_vm5 = vcmp.eq.s32.totalorder %v4490_v23, %v5386_v0 }
  0x94   :  { %3834 = vmatpush.msk.msra.mxu1 %vm314_vm11, %v7472_v47  ;;  %3851 = vmatpush.msk.msra.mxu2 %vm344_vm12, %v7472_v47  ;;  %7546 = vst [vmem:[#allocation132_spill] sm:$0xff] %v5498_v18  ;;  %vm372_vm6 = vcmp.eq.s32.totalorder %v4560_v30, %v5386_v0  ;;  %vm308_vm7 = vcmp.eq.s32.totalorder %v4544_v28, %v5386_v0 }
  0x95   :  { %3819 = vmatpush.msk.msra.mxu0 %vm280_vm13, %v7472_v47  ;;  %3867 = vmatpush.msk.msra.mxu3 %vm376_vm14, %v7472_v47  ;;  %vm338_vm8 = vcmp.eq.s32.totalorder %v4557_v29, %v5386_v0  ;;  %vm274_vm9 = vcmp.eq.s32.totalorder %v4533_v27, %v5386_v0  ;;  %vm370_vm10 = vcmp.eq.s32.totalorder %v4576_v34, %v5386_v0 }
  0x96   :  { %3835 = vmatpush.msk.msra.mxu1 %vm312_vm15, %v7472_v47  ;;  %3852 = vmatpush.msk.msra.mxu2 %vm342_vm0, %v7472_v47  ;;  %vm306_vm11 = vcmp.eq.s32.totalorder %v4570_v32, %v5386_v0  ;;  %vm336_vm12 = vcmp.eq.s32.totalorder %v4573_v33, %v5386_v0  ;;  %vm272_vm13 = vcmp.eq.s32.totalorder %v4563_v31, %v5386_v0  ;;  %v5536_v32 = vld [vmem:[#allocation7 + $0x28] sm:$0xff]  ;;  %v5542_v31 = vld [vmem:[#allocation7 + $0x38] sm:$0xff] }
  0x97   :  { %3820 = vmatpush.msk.msra.mxu0 %vm278_vm1, %v7472_v47  ;;  %3868 = vmatpush.msk.msra.mxu3 %vm374_vm2, %v7472_v47  ;;  %vm368_vm14 = vcmp.eq.s32.totalorder %v4626_v38, %v5386_v0  ;;  %7547 = vst [vmem:[#allocation133_spill] sm:$0xff] %v5542_v31  ;;  %vm304_vm15 = vcmp.eq.s32.totalorder %v4610_v36, %v5386_v0 }
  0x98   :  { %1830 = vmatmul.f32.gmra.mxu0 %v5478_v62  ;;  %3836 = vmatpush.msk.msra.mxu1 %vm310_vm3, %v7472_v47  ;;  %vm334_vm0 = vcmp.eq.s32.totalorder %v4623_v37, %v5386_v0  ;;  %vm270_vm1 = vcmp.eq.s32.totalorder %v4593_v35, %v5386_v0  ;;  %vm366_vm2 = vcmp.eq.s32.totalorder %v4642_v42, %v5386_v0  ;;  %v5567_v35 = vld [vmem:[#allocation7 + $0x60] sm:$0xff] }
  0x99   :  { %1912 = vmatmul.f32.gmra.mxu2 %v5480_v56  ;;  %3821 = vmatpush.msk.msra.mxu0 %vm276_vm5, %v7472_v47  ;;  %vm302_vm3 = vcmp.eq.s32.totalorder %v4636_v40, %v5386_v0  ;;  %vm268_vm5 = vcmp.eq.s32.totalorder %v4629_v39, %v5386_v0  ;;  %7548 = vst [vmem:[#allocation134_spill] sm:$0xff] %v5567_v35  ;;  %v5579_v39 = vld [vmem:[#allocation7 + $0x78] sm:$0xff] }
  0x9a   :  { %1871 = vmatmul.f32.gmra.mxu1 %v5490_v20  ;;  %3853 = vmatpush.msk.msra.mxu2 %vm340_vm4, %v7472_v47  ;;  %v5528_v20 = vld [vmem:[#allocation7 + $0x30] sm:$0xff]  ;;  %vm332_vm4 = vcmp.eq.s32.totalorder %v4639_v41, %v5386_v0  ;;  %v5575_v41 = vld [vmem:[#allocation7 + $0x68] sm:$0xff]  ;;  %7551 = vst [vmem:[#allocation137_spill] sm:$0xff] %v5579_v39 }
  0x9b   :  { %1953 = vmatmul.f32.gmra.mxu3 %v5498_v18  ;;  %3837 = vmatpush.msk.msra.mxu1 %vm308_vm7, %v7472_v47  ;;  %v5526_v18 = vld [vmem:[#allocation7 + $0x20] sm:$0xff]  ;;  %7550 = vst [vmem:[#allocation136_spill] sm:$0xff] %v5575_v41  ;;  %vm300_vm7 = vcmp.eq.s32.totalorder %v4676_v44, %v5386_v0 }
  0x9c   :  { %3869 = vmatpush.msk.msra.mxu3 %vm372_vm6, %v7472_v47  ;;  %3854 = vmatpush.msk.msra.mxu2 %vm338_vm8, %v7472_v47  ;;  %vm364_vm6 = vcmp.eq.s32.totalorder %v4692_v46, %v5386_v0  ;;  %vm330_vm8 = vcmp.eq.s32.totalorder %v4689_v45, %v5386_v0  ;;  %v5605_v45 = vld [vmem:[#allocation7 + $0xb0] sm:$0xff] }
  0x9d   :  { %3822 = vmatpush.msk.msra.mxu0 %vm274_vm9, %v7472_v47  ;;  %3838 = vmatpush.msk.msra.mxu1 %vm306_vm11, %v7472_v47  ;;  %vm266_vm9 = vcmp.eq.s32.totalorder %v4659_v43, %v5386_v0  ;;  %vm298_vm11 = vcmp.eq.s32.totalorder %v4702_v48, %v5386_v0  ;;  %v5603_v43 = vld [vmem:[#allocation7 + $0xa0] sm:$0xff]  ;;  %7555 = vst [vmem:[#allocation139_spill] sm:$0xff] %v5605_v45 }
  0x9e   :  { %3870 = vmatpush.msk.msra.mxu3 %vm370_vm10, %v7472_v47  ;;  %3855 = vmatpush.msk.msra.mxu2 %vm336_vm12, %v7472_v47  ;;  %vm362_vm10 = vcmp.eq.s32.totalorder %v4708_v50, %v5386_v0  ;;  %vm328_vm12 = vcmp.eq.s32.totalorder %v4705_v49, %v5386_v0  ;;  %7554 = vst [vmem:[#allocation138_spill] sm:$0xff] %v5603_v43  ;;  %v5611_v49 = vld [vmem:[#allocation7 + $0xa8] sm:$0xff]  ;;  %v7562_v50 = vld [vmem:[#allocation35_spill] sm:$0xff] }
  0x9f   :  { %3823 = vmatpush.msk.msra.mxu0 %vm272_vm13, %v7472_v47  ;;  %3839 = vmatpush.msk.msra.mxu1 %vm304_vm15, %v7472_v47  ;;  %7556 = vst [vmem:[#allocation140_spill] sm:$0xff] %v5611_v49  ;;  %v7559_v48 = vld [vmem:[#allocation32_spill] sm:$0xff] }
  0xa0   :  { %1973 = vmatmul.f32.vlgmr.msrb.gmra.mxu0 %v5526_v18  ;;  %3871 = vmatpush.msk.msra.mxu3 %vm368_vm14, %v7472_v47 }
  0xa1   :  { %2055 = vmatmul.f32.vlgmr.msrb.gmra.mxu2 %v5528_v20  ;;  %3824 = vmatpush.msk.msra.mxu0 %vm270_vm1, %v7472_v47 }
  0xa2   :  { %2014 = vmatmul.f32.vlgmr.msrb.gmra.mxu1 %v5536_v32  ;;  %3856 = vmatpush.msk.msra.mxu2 %vm334_vm0, %v7472_v47  ;;  %vm326_vm0 = vcmp.eq.s32.totalorder %v7559_v48, %v5386_v0  ;;  %v5641_v48 = vld [vmem:[#allocation7 + $0xf0] sm:$0xff] }
  0xa3   :  { %2096 = vmatmul.f32.vlgmr.msrb.gmra.mxu3 %v5542_v31  ;;  %v5569_v31 = vld [vmem:[#allocation7 + $0x70] sm:$0xff]  ;;  %3840 = vmatpush.msk.msra.mxu1 %vm302_vm3, %v7472_v47  ;;  %vm294_vm3 = vcmp.eq.s32.totalorder %v7562_v50, %v5386_v0  ;;  %7567 = vst [vmem:[#allocation143_spill] sm:$0xff] %v5641_v48  ;;  %v7571_v50 = vld [vmem:[#allocation40_spill] sm:$0xff] }
  0xa4   :  { %3872 = vmatpush.msk.msra.mxu3 %vm366_vm2, %v7472_v47  ;;  %7549 = vst [vmem:[#allocation135_spill] sm:$0xff] %v5569_v31  ;;  %3857 = vmatpush.msk.msra.mxu2 %vm332_vm4, %v7472_v47 }
  0xa5   :  { %3825 = vmatpush.msk.msra.mxu0 %vm268_vm5, %v7472_v47  ;;  %3841 = vmatpush.msk.msra.mxu1 %vm300_vm7, %v7472_v47 }
  0xa6   :  { %3873 = vmatpush.msk.msra.mxu3 %vm364_vm6, %v7472_v47  ;;  %3858 = vmatpush.msk.msra.mxu2 %vm330_vm8, %v7472_v47  ;;  %vm322_vm8 = vcmp.eq.s32.totalorder %v7571_v50, %v5386_v0  ;;  %v5671_v50 = vld [vmem:[#allocation7 + $0x120] sm:$0xff] }
  0xa7   :  { %3826 = vmatpush.msk.msra.mxu0 %vm266_vm9, %v7472_v47  ;;  %3842 = vmatpush.msk.msra.mxu1 %vm298_vm11, %v7472_v47  ;;  %7576 = vst [vmem:[#allocation146_spill] sm:$0xff] %v5671_v50 }
  0xa8   :  { %1976 = vmatmul.f32.gmra.mxu0 %v5567_v35  ;;  %3874 = vmatpush.msk.msra.mxu3 %vm362_vm10, %v7472_v47  ;;  %v7640_v35 = vld [vmem:[#allocation99_spill] sm:$0xff] }
  0xa9   :  { %2058 = vmatmul.f32.gmra.mxu2 %v5569_v31  ;;  %v7637_v31 = vld [vmem:[#allocation63_spill] sm:$0xff] }
  0xaa   :  { %2017 = vmatmul.f32.gmra.mxu1 %v5575_v41  ;;  %v7552_v41 = vld [vmem:[#allocation26_spill] sm:$0xff]  ;;  %3859 = vmatpush.msk.msra.mxu2 %vm328_vm12, %v7472_v47 }
  0xab   :  { %2099 = vmatmul.f32.gmra.mxu3 %v5579_v39  ;;  %vm264_vm13 = vcmp.eq.s32.totalorder %v7552_v41, %v5386_v0  ;;  %v7553_v39 = vld [vmem:[#allocation33_spill] sm:$0xff]  ;;  %v5615_v41 = vld [vmem:[#allocation7 + $0xb8] sm:$0xff] }
  0xac   :  { %vm360_vm14 = vcmp.eq.s32.totalorder %v7553_v39, %v5386_v0  ;;  %3827 = vmatpush.msk.msra.mxu0 %vm264_vm13, %v7472_v47  ;;  %7557 = vst [vmem:[#allocation141_spill] sm:$0xff] %v5615_v41  ;;  %v7558_v39 = vld [vmem:[#allocation31_spill] sm:$0xff]  ;;  %3860 = vmatpush.msk.msra.mxu2 %vm326_vm0, %v7472_v47  ;;  %vm256_vm13 = vcmp.eq.s32.totalorder %v4412_v1, %v5386_v0  ;;  %v7582_v1 = vld [vmem:[#allocation45_spill] sm:$0xff] }
  0xad   :  { %3875 = vmatpush.msk.msra.mxu3 %vm360_vm14, %v7472_v47  ;;  %vm296_vm15 = vcmp.eq.s32.totalorder %v7558_v39, %v5386_v0  ;;  %v7563_v39 = vld [vmem:[#allocation36_spill] sm:$0xff]  ;;  %vm478_vm0 = vcmp.eq.s32.totalorder %v7582_v1, %v5386_v0  ;;  %v7585_v1 = vld [vmem:[#allocation50_spill] sm:$0xff] }
  0xae   :  { %3843 = vmatpush.msk.msra.mxu1 %vm296_vm15, %v7472_v47  ;;  %vm324_vm4 = vcmp.eq.s32.totalorder %v7563_v39, %v5386_v0  ;;  %v5647_v39 = vld [vmem:[#allocation7 + $0xe8] sm:$0xff] }
  0xaf   :  { %3861 = vmatpush.msk.msra.mxu2 %vm324_vm4, %v7472_v47  ;;  %7568 = vst [vmem:[#allocation144_spill] sm:$0xff] %v5647_v39 }
  0xb0   :  { %1979 = vmatmul.f32.gmra.mxu0 %v5603_v43  ;;  %v7560_v43 = vld [vmem:[#allocation30_spill] sm:$0xff]  ;;  %3844 = vmatpush.msk.msra.mxu1 %vm294_vm3, %v7472_v47  ;;  %vm446_vm3 = vcmp.eq.s32.totalorder %v7585_v1, %v5386_v0  ;;  %v7593_v1 = vld [vmem:[#allocation55_spill] sm:$0xff] }
  0xb1   :  { %2061 = vmatmul.f32.gmra.mxu2 %v5605_v45  ;;  %vm262_vm1 = vcmp.eq.s32.totalorder %v7560_v43, %v5386_v0  ;;  %v7561_v45 = vld [vmem:[#allocation37_spill] sm:$0xff]  ;;  %v5639_v43 = vld [vmem:[#allocation7 + $0xe0] sm:$0xff] }
  0xb2   :  { %2020 = vmatmul.f32.gmra.mxu1 %v5611_v49  ;;  %vm358_vm2 = vcmp.eq.s32.totalorder %v7561_v45, %v5386_v0  ;;  %3828 = vmatpush.msk.msra.mxu0 %vm262_vm1, %v7472_v47  ;;  %v7564_v49 = vld [vmem:[#allocation34_spill] sm:$0xff]  ;;  %7566 = vst [vmem:[#allocation142_spill] sm:$0xff] %v5639_v43 }
  0xb3   :  { %2102 = vmatmul.f32.gmra.mxu3 %v5615_v41  ;;  %vm260_vm5 = vcmp.eq.s32.totalorder %v7564_v49, %v5386_v0  ;;  %v7565_v41 = vld [vmem:[#allocation41_spill] sm:$0xff]  ;;  %v5651_v49 = vld [vmem:[#allocation7 + $0xf8] sm:$0xff]  ;;  %3862 = vmatpush.msk.msra.mxu2 %vm322_vm8, %v7472_v47 }
  0xb4   :  { %3876 = vmatpush.msk.msra.mxu3 %vm358_vm2, %v7472_v47  ;;  %vm356_vm6 = vcmp.eq.s32.totalorder %v7565_v41, %v5386_v0  ;;  %3829 = vmatpush.msk.msra.mxu0 %vm260_vm5, %v7472_v47  ;;  %7569 = vst [vmem:[#allocation145_spill] sm:$0xff] %v5651_v49  ;;  %v7570_v41 = vld [vmem:[#allocation39_spill] sm:$0xff]  ;;  %v7574_v45 = vld [vmem:[#allocation42_spill] sm:$0xff] }
  0xb5   :  { %vm292_vm7 = vcmp.eq.s32.totalorder %v7570_v41, %v5386_v0  ;;  %vm290_vm11 = vcmp.eq.s32.totalorder %v7574_v45, %v5386_v0  ;;  %v7575_v41 = vld [vmem:[#allocation43_spill] sm:$0xff] }
  0xb6   :  { %3877 = vmatpush.msk.msra.mxu3 %vm356_vm6, %v7472_v47  ;;  %3845 = vmatpush.msk.msra.mxu1 %vm292_vm7, %v7472_v47  ;;  %vm320_vm12 = vcmp.eq.s32.totalorder %v7575_v41, %v5386_v0  ;;  %v7578_v45 = vld [vmem:[#allocation47_spill] sm:$0xff]  ;;  %v5683_v41 = vld [vmem:[#allocation7 + $0x128] sm:$0xff]  ;;  %vm444_vm7 = vcmp.eq.s32.totalorder %v7593_v1, %v5386_v0 }
  0xb7   :  { %3863 = vmatpush.msk.msra.mxu2 %vm320_vm12, %v7472_v47  ;;  %vm352_vm14 = vcmp.eq.s32.totalorder %v7578_v45, %v5386_v0  ;;  %7579 = vst [vmem:[#allocation148_spill] sm:$0xff] %v5683_v41  ;;  %v5707_v45 = vld [vmem:[#allocation7 + $0x160] sm:$0xff] }
  0xb8   :  { %1982 = vmatmul.f32.gmra.mxu0 %v5639_v43  ;;  %v7572_v43 = vld [vmem:[#allocation38_spill] sm:$0xff]  ;;  %3846 = vmatpush.msk.msra.mxu1 %vm290_vm11, %v7472_v47  ;;  %7587 = vst [vmem:[#allocation150_spill] sm:$0xff] %v5707_v45  ;;  %v7596_v1 = vld [vmem:[#allocation59_spill] sm:$0xff] }
  0xb9   :  { %2064 = vmatmul.f32.gmra.mxu2 %v5641_v48  ;;  %vm258_vm9 = vcmp.eq.s32.totalorder %v7572_v43, %v5386_v0  ;;  %v7573_v48 = vld [vmem:[#allocation44_spill] sm:$0xff]  ;;  %v7581_v43 = vld [vmem:[#allocation46_spill] sm:$0xff] }
  0xba   :  { %2023 = vmatmul.f32.gmra.mxu1 %v5647_v39  ;;  %vm354_vm10 = vcmp.eq.s32.totalorder %v7573_v48, %v5386_v0  ;;  %3830 = vmatpush.msk.msra.mxu0 %vm258_vm9, %v7472_v47  ;;  %v5673_v39 = vld [vmem:[#allocation7 + $0x130] sm:$0xff]  ;;  %v5687_v48 = vld [vmem:[#allocation7 + $0x138] sm:$0xff]  ;;  %vm288_vm15 = vcmp.eq.s32.totalorder %v7581_v43, %v5386_v0 }
  0xbb   :  { %2105 = vmatmul.f32.gmra.mxu3 %v5651_v49  ;;  %7577 = vst [vmem:[#allocation147_spill] sm:$0xff] %v5673_v39  ;;  %3847 = vmatpush.msk.msra.mxu1 %vm288_vm15, %v7472_v47  ;;  %v7586_v43 = vld [vmem:[#allocation51_spill] sm:$0xff]  ;;  %v7594_v49 = vld [vmem:[#allocation57_spill] sm:$0xff] }
  0xbc   :  { %3878 = vmatpush.msk.msra.mxu3 %vm354_vm10, %v7472_v47  ;;  %3831 = vmatpush.msk.msra.mxu0 %vm256_vm13, %v7472_v47  ;;  %7580 = vst [vmem:[#allocation149_spill] sm:$0xff] %v5687_v48  ;;  %vm476_vm4 = vcmp.eq.s32.totalorder %v7586_v43, %v5386_v0  ;;  %v5721_v43 = vld [vmem:[#allocation7 + $0x178] sm:$0xff]  ;;  %vm474_vm8 = vcmp.eq.s32.totalorder %v7594_v49, %v5386_v0  ;;  %v7597_v49 = vld [vmem:[#allocation60_spill] sm:$0xff] }
  0xbd   :  { %3912 = vmatpush.msk.msrb.mxu2 %vm478_vm0, %v7472_v47  ;;  %3896 = vmatpush.msk.msrb.mxu1 %vm446_vm3, %v7472_v47  ;;  %7592 = vst [vmem:[#allocation153_spill] sm:$0xff] %v5721_v43  ;;  %vm506_vm10 = vcmp.eq.s32.totalorder %v7596_v1, %v5386_v0  ;;  %vm442_vm11 = vcmp.eq.s32.totalorder %v7597_v49, %v5386_v0  ;;  %v7602_v1 = vld [vmem:[#allocation62_spill] sm:$0xff] }
  0xbe   :  { %3879 = vmatpush.msk.msra.mxu3 %vm352_vm14, %v7472_v47  ;;  %vm408_vm13 = vcmp.eq.s32.totalorder %v7602_v1, %v5386_v0  ;;  %v7605_v49 = vld [vmem:[#allocation66_spill] sm:$0xff]  ;;  %v7618_v1 = vld [vmem:[#allocation77_spill] sm:$0xff] }
  0xbf   :  { %3913 = vmatpush.msk.msrb.mxu2 %vm476_vm4, %v7472_v47  ;;  %3897 = vmatpush.msk.msrb.mxu1 %vm444_vm7, %v7472_v47  ;;  %vm440_vm15 = vcmp.eq.s32.totalorder %v7605_v49, %v5386_v0  ;;  %v7608_v49 = vld [vmem:[#allocation70_spill] sm:$0xff] }
  0xc0   :  { %1985 = vmatmul.f32.gmra.mxu0 %v5671_v50  ;;  %v7583_v50 = vld [vmem:[#allocation48_spill] sm:$0xff]  ;;  %v1892_v44 = vpop.f32.mrf.mxu2 }
  0xc1   :  { %2067 = vmatmul.f32.gmra.mxu2 %v5673_v39  ;;  %vm414_vm1 = vcmp.eq.s32.totalorder %v7583_v50, %v5386_v0  ;;  %v7584_v39 = vld [vmem:[#allocation49_spill] sm:$0xff]  ;;  %3898 = vmatpush.msk.msrb.mxu1 %vm442_vm11, %v7472_v47 }
  0xc2   :  { %2026 = vmatmul.f32.gmra.mxu1 %v5683_v41  ;;  %vm510_vm2 = vcmp.eq.s32.totalorder %v7584_v39, %v5386_v0  ;;  %3880 = vmatpush.msk.msrb.mxu0 %vm414_vm1, %v7472_v47  ;;  %v5709_v41 = vld [vmem:[#allocation7 + $0x170] sm:$0xff]  ;;  %v5713_v50 = vld [vmem:[#allocation7 + $0x168] sm:$0xff] }
  0xc3   :  { %2108 = vmatmul.f32.gmra.mxu3 %v5687_v48  ;;  %7588 = vst [vmem:[#allocation151_spill] sm:$0xff] %v5709_v41  ;;  %v7590_v39 = vld [vmem:[#allocation52_spill] sm:$0xff]  ;;  %v7591_v48 = vld [vmem:[#allocation54_spill] sm:$0xff]  ;;  %3914 = vmatpush.msk.msrb.mxu2 %vm474_vm8, %v7472_v47  ;;  %vm466_vm8 = vcmp.eq.s32.totalorder %v7618_v1, %v5386_v0 }
  0xc4   :  { %3928 = vmatpush.msk.msrb.mxu3 %vm510_vm2, %v7472_v47  ;;  %7589 = vst [vmem:[#allocation152_spill] sm:$0xff] %v5713_v50  ;;  %vm412_vm5 = vcmp.eq.s32.totalorder %v7590_v39, %v5386_v0  ;;  %vm508_vm6 = vcmp.eq.s32.totalorder %v7591_v48, %v5386_v0  ;;  %v7603_v48 = vld [vmem:[#allocation65_spill] sm:$0xff]  ;;  %v7606_v39 = vld [vmem:[#allocation67_spill] sm:$0xff]  ;;  %3899 = vmatpush.msk.msrb.mxu1 %vm440_vm15, %v7472_v47  ;;  %v7621_v1 = vld [vmem:[#allocation82_spill] sm:$0xff] }
  0xc5   :  { %3881 = vmatpush.msk.msrb.mxu0 %vm412_vm5, %v7472_v47  ;;  %vm504_vm14 = vcmp.eq.s32.totalorder %v7603_v48, %v5386_v0  ;;  %vm470_vm0 = vcmp.eq.s32.totalorder %v7606_v39, %v5386_v0  ;;  %vm502_vm2 = vcmp.eq.s32.totalorder %v7608_v49, %v5386_v0  ;;  %v7609_v39 = vld [vmem:[#allocation71_spill] sm:$0xff]  ;;  %v7614_v49 = vld [vmem:[#allocation74_spill] sm:$0xff]  ;;  %vm434_vm11 = vcmp.eq.s32.totalorder %v7621_v1, %v5386_v0 }
  0xc6   :  { %3929 = vmatpush.msk.msrb.mxu3 %vm508_vm6, %v7472_v47  ;;  %vm438_vm3 = vcmp.eq.s32.totalorder %v7609_v39, %v5386_v0  ;;  %vm404_vm5 = vcmp.eq.s32.totalorder %v7614_v49, %v5386_v0  ;;  %v7615_v48 = vld [vmem:[#allocation75_spill] sm:$0xff]  ;;  %v7617_v39 = vld [vmem:[#allocation76_spill] sm:$0xff]  ;;  %v5824_v1 = vld [vmem:[#allocation7 + $0x10] sm:$0xff] }
  0xc7   :  { %3900 = vmatpush.msk.msrb.mxu1 %vm438_vm3, %v7472_v47  ;;  %vm500_vm6 = vcmp.eq.s32.totalorder %v7615_v48, %v5386_v0  ;;  %vm436_vm7 = vcmp.eq.s32.totalorder %v7617_v39, %v5386_v0  ;;  %v7620_v39 = vld [vmem:[#allocation81_spill] sm:$0xff]  ;;  %v5821_v48 = vld [vmem:[#allocation7] sm:$0xff]  ;;  %7626 = vst [vmem:[#allocation163_spill] sm:$0xff] %v5824_v1 }
  0xc8   :  { %1988 = vmatmul.f32.gmra.mxu0 %v5707_v45  ;;  %3930 = vmatpush.msk.msrb.mxu3 %vm506_vm10, %v7472_v47  ;;  %v5743_v45 = vld [vmem:[#allocation7 + $0x1a0] sm:$0xff]  ;;  %vm498_vm10 = vcmp.eq.s32.totalorder %v7620_v39, %v5386_v0  ;;  %v7624_v39 = vld [vmem:[#allocation86_spill] sm:$0xff]  ;;  %7625 = vst [vmem:[#allocation162_spill] sm:$0xff] %v5821_v48  ;;  %v7628_v49 = vld [vmem:[#allocation89_spill] sm:$0xff] }
  0xc9   :  { %2070 = vmatmul.f32.gmra.mxu2 %v5709_v41  ;;  %v7595_v41 = vld [vmem:[#allocation58_spill] sm:$0xff]  ;;  %7599 = vst [vmem:[#allocation154_spill] sm:$0xff] %v5743_v45  ;;  %3901 = vmatpush.msk.msrb.mxu1 %vm436_vm7, %v7472_v47 }
  0xca   :  { %2029 = vmatmul.f32.gmra.mxu1 %v5713_v50  ;;  %vm410_vm9 = vcmp.eq.s32.totalorder %v7595_v41, %v5386_v0  ;;  %v7598_v50 = vld [vmem:[#allocation61_spill] sm:$0xff]  ;;  %3931 = vmatpush.msk.msrb.mxu3 %vm504_vm14, %v7472_v47  ;;  %vm496_vm14 = vcmp.eq.s32.totalorder %v7624_v39, %v5386_v0 }
  0xcb   :  { %2111 = vmatmul.f32.gmra.mxu3 %v5721_v43  ;;  %3882 = vmatpush.msk.msrb.mxu0 %vm410_vm9, %v7472_v47  ;;  %vm472_vm12 = vcmp.eq.s32.totalorder %v7598_v50, %v5386_v0  ;;  %v5745_v43 = vld [vmem:[#allocation7 + $0x1b0] sm:$0xff]  ;;  %v5749_v41 = vld [vmem:[#allocation7 + $0x1a8] sm:$0xff]  ;;  %v5757_v50 = vld [vmem:[#allocation7 + $0x1b8] sm:$0xff] }
  0xcc   :  { %7600 = vst [vmem:[#allocation155_spill] sm:$0xff] %v5745_v43  ;;  %3915 = vmatpush.msk.msrb.mxu2 %vm472_vm12, %v7472_v47  ;;  %3932 = vmatpush.msk.msrb.mxu3 %vm502_vm2, %v7472_v47  ;;  %v7629_v39 = vld [vmem:[#allocation53_spill] sm:$0xff] }
  0xcd   :  { %7601 = vst [vmem:[#allocation156_spill] sm:$0xff] %v5749_v41  ;;  %3883 = vmatpush.msk.msrb.mxu0 %vm408_vm13, %v7472_v47  ;;  %3902 = vmatpush.msk.msrb.mxu1 %vm434_vm11, %v7472_v47 }
  0xce   :  { %7604 = vst [vmem:[#allocation157_spill] sm:$0xff] %v5757_v50  ;;  %3916 = vmatpush.msk.msrb.mxu2 %vm470_vm0, %v7472_v47  ;;  %3933 = vmatpush.msk.msrb.mxu3 %vm500_vm6, %v7472_v47  ;;  %vm462_vm0 = vcmp.eq.s32.totalorder %v7628_v49, %v5386_v0 }
  0xd0   :  { %1991 = vmatmul.f32.gmra.mxu0 %v5743_v45  ;;  %v5779_v45 = vld [vmem:[#allocation7 + $0x1e0] sm:$0xff]  ;;  %3934 = vmatpush.msk.msrb.mxu3 %vm498_vm10, %v7472_v47 }
  0xd1   :  { %2073 = vmatmul.f32.gmra.mxu2 %v5745_v43  ;;  %v7607_v43 = vld [vmem:[#allocation68_spill] sm:$0xff]  ;;  %7611 = vst [vmem:[#allocation158_spill] sm:$0xff] %v5779_v45 }
  0xd2   :  { %2032 = vmatmul.f32.gmra.mxu1 %v5749_v41  ;;  %vm406_vm1 = vcmp.eq.s32.totalorder %v7607_v43, %v5386_v0  ;;  %v7610_v41 = vld [vmem:[#allocation73_spill] sm:$0xff]  ;;  %3935 = vmatpush.msk.msrb.mxu3 %vm496_vm14, %v7472_v47  ;;  %vm488_vm14 = vcmp.eq.s32.totalorder %v5242_v55, %v5386_v0  ;;  %v7652_v55 = vld [vmem:[#allocation88_spill] sm:$0xff] }
  0xd3   :  { %2114 = vmatmul.f32.gmra.mxu3 %v5757_v50  ;;  %3884 = vmatpush.msk.msrb.mxu0 %vm406_vm1, %v7472_v47  ;;  %vm468_vm4 = vcmp.eq.s32.totalorder %v7610_v41, %v5386_v0  ;;  %v5781_v50 = vld [vmem:[#allocation7 + $0x1f0] sm:$0xff]  ;;  %v5785_v43 = vld [vmem:[#allocation7 + $0x1e8] sm:$0xff]  ;;  %v5793_v41 = vld [vmem:[#allocation7 + $0x1f8] sm:$0xff] }
  0xd4   :  { %7612 = vst [vmem:[#allocation159_spill] sm:$0xff] %v5781_v50  ;;  %3917 = vmatpush.msk.msrb.mxu2 %vm468_vm4, %v7472_v47 }
  0xd5   :  { %7613 = vst [vmem:[#allocation160_spill] sm:$0xff] %v5785_v43  ;;  %3885 = vmatpush.msk.msrb.mxu0 %vm404_vm5, %v7472_v47 }
  0xd6   :  { %7616 = vst [vmem:[#allocation161_spill] sm:$0xff] %v5793_v41  ;;  %3918 = vmatpush.msk.msrb.mxu2 %vm466_vm8, %v7472_v47  ;;  %vm458_vm8 = vcmp.eq.s32.totalorder %v7640_v35, %v5386_v0 }
  0xd8   :  { %1994 = vmatmul.f32.gmra.mxu0 %v5779_v45  ;;  %v1810_v45 = vpop.f32.mrf.mxu0 }
  0xd9   :  { %2076 = vmatmul.f32.gmra.mxu2 %v5781_v50  ;;  %v7619_v50 = vld [vmem:[#allocation78_spill] sm:$0xff] }
  0xda   :  { %2035 = vmatmul.f32.gmra.mxu1 %v5785_v43  ;;  %vm402_vm9 = vcmp.eq.s32.totalorder %v7619_v50, %v5386_v0  ;;  %v7622_v43 = vld [vmem:[#allocation83_spill] sm:$0xff]  ;;  %v7623_v50 = vld [vmem:[#allocation84_spill] sm:$0xff] }
  0xdb   :  { %2117 = vmatmul.f32.gmra.mxu3 %v5793_v41  ;;  %3886 = vmatpush.msk.msrb.mxu0 %vm402_vm9, %v7472_v47  ;;  %vm464_vm12 = vcmp.eq.s32.totalorder %v7622_v43, %v5386_v0  ;;  %v1851_v41 = vpop.f32.mrf.mxu1  ;;  %vm400_vm13 = vcmp.eq.s32.totalorder %v7623_v50, %v5386_v0  ;;  %v7627_v43 = vld [vmem:[#allocation87_spill] sm:$0xff] }
  0xdc   :  { %3919 = vmatpush.msk.msrb.mxu2 %vm464_vm12, %v7472_v47  ;;  %vm432_vm15 = vcmp.eq.s32.totalorder %v7627_v43, %v5386_v0  ;;  %v1852_v50 = vadd.f32 %v1851_v41, %v1810_v45  ;;  %v7632_v43 = vld [vmem:[#allocation91_spill] sm:$0xff]  ;;  %v7634_v41 = vld [vmem:[#allocation93_spill] sm:$0xff] }
  0xdd   :  { %3887 = vmatpush.msk.msrb.mxu0 %vm400_vm13, %v7472_v47  ;;  %3903 = vmatpush.msk.msrb.mxu1 %vm432_vm15, %v7472_v47  ;;  %vm494_vm2 = vcmp.eq.s32.totalorder %v7632_v43, %v5386_v0  ;;  %vm460_vm4 = vcmp.eq.s32.totalorder %v7634_v41, %v5386_v0  ;;  %v7639_v41 = vld [vmem:[#allocation98_spill] sm:$0xff]  ;;  %vm424_vm15 = vcmp.eq.s32.totalorder %v5245_v63, %v5386_v0  ;;  %v5921_v63 = vld [vmem:[#allocation5] sm:$0x3] }
  0xde   :  { %3920 = vmatpush.msk.msrb.mxu2 %vm462_vm0, %v7472_v47  ;;  %v1893_v49 = vadd.f32 %v1892_v44, %v1852_v50  ;;  %3936 = vmatpush.msk.msrb.mxu3 %vm494_vm2, %v7472_v47  ;;  %v7635_v44 = vld [vmem:[#allocation94_spill] sm:$0xff]  ;;  %v7636_v50 = vld [vmem:[#allocation97_spill] sm:$0xff]  ;;  %vm428_vm7 = vcmp.eq.s32.totalorder %v7639_v41, %v5386_v0  ;;  %vm486_vm2 = vcmp.eq.s32.totalorder %v5278_v53, %v5386_v0 }
  0xdf   :  { %vm396_vm5 = vcmp.eq.s32.totalorder %v7635_v44, %v5386_v0  ;;  %vm492_vm6 = vcmp.eq.s32.totalorder %v7636_v50, %v5386_v0  ;;  %v7642_v50 = vld [vmem:[#allocation72_spill] sm:$0xff]  ;;  %v7644_v41 = vld [vmem:[#allocation102_spill] sm:$0xff] }
  0xe0   :  { %2137 = vmatmul.f32.vlgmr.msra.gmra.mxu0 %v5821_v48  ;;  %v7630_v48 = vld [vmem:[#allocation56_spill] sm:$0xff]  ;;  %v1813_v45 = vpop.f32.mrf.mxu0  ;;  %3921 = vmatpush.msk.msrb.mxu2 %vm460_vm4, %v7472_v47  ;;  %vm490_vm10 = vcmp.eq.s32.totalorder %v7644_v41, %v5386_v0  ;;  %vm452_vm4 = vcmp.eq.s32.totalorder %v5290_v22, %v5386_v0  ;;  %v7658_v22 = vld [vmem:[#allocation119_spill] sm:$0xff] }
  0xe1   :  { %2219 = vmatmul.f32.vlgmr.msra.gmra.mxu2 %v5824_v1  ;;  %v7631_v1 = vld [vmem:[#allocation90_spill] sm:$0xff]  ;;  %3937 = vmatpush.msk.msrb.mxu3 %vm492_vm6, %v7472_v47 }
  0xe2   :  { %2178 = vmatmul.f32.vlgmr.msra.gmra.mxu1 %v7629_v39  ;;  %vm398_vm1 = vcmp.eq.s32.totalorder %v7631_v1, %v5386_v0  ;;  %v7633_v39 = vld [vmem:[#allocation92_spill] sm:$0xff]  ;;  %3922 = vmatpush.msk.msrb.mxu2 %vm458_vm8, %v7472_v47 }
  0xe3   :  { %2260 = vmatmul.f32.vlgmr.msra.gmra.mxu3 %v7630_v48  ;;  %3888 = vmatpush.msk.msrb.mxu0 %vm398_vm1, %v7472_v47  ;;  %vm430_vm3 = vcmp.eq.s32.totalorder %v7633_v39, %v5386_v0  ;;  %v1933_v48 = vpop.f32.mrf.mxu3  ;;  %v1854_v43 = vpop.f32.mrf.mxu1  ;;  %v7638_v39 = vld [vmem:[#allocation64_spill] sm:$0xff]  ;;  %vm390_vm1 = vcmp.eq.s32.totalorder %v5263_v51, %v5386_v0  ;;  %v7656_v51 = vld [vmem:[#allocation95_spill] sm:$0xff] }
  0xe4   :  { %3904 = vmatpush.msk.msrb.mxu1 %vm430_vm3, %v7472_v47  ;;  %v5849_v1 = vadd.f32 %v1933_v48, %v1893_v49  ;;  %v1855_v49 = vadd.f32 %v1854_v43, %v1813_v45  ;;  %v7641_v48 = vld [vmem:[#allocation69_spill] sm:$0xff]  ;;  %3938 = vmatpush.msk.msrb.mxu3 %vm490_vm10, %v7472_v47  ;;  %v7645_v43 = vld [vmem:[#allocation103_spill] sm:$0xff]  ;;  %vm482_vm10 = vcmp.eq.s32.totalorder %v5344_v57, %v5386_v0 }
  0xe5   :  { %3889 = vmatpush.msk.msrb.mxu0 %vm396_vm5, %v7472_v47  ;;  %vm426_vm11 = vcmp.eq.s32.totalorder %v7645_v43, %v5386_v0  ;;  %v7646_v45 = vld [vmem:[#allocation105_spill] sm:$0xff]  ;;  %v7649_v43 = vld [vmem:[#allocation80_spill] sm:$0xff] }
  0xe6   :  { %3905 = vmatpush.msk.msrb.mxu1 %vm428_vm7, %v7472_v47  ;;  %vm456_vm12 = vcmp.eq.s32.totalorder %v7646_v45, %v5386_v0  ;;  %v7650_v45 = vld [vmem:[#allocation109_spill] sm:$0xff]  ;;  %3939 = vmatpush.msk.msrb.mxu3 %vm488_vm14, %v7472_v47  ;;  %vm420_vm7 = vcmp.eq.s32.totalorder %v7658_v22, %v5386_v0  ;;  %v7662_v22 = vld [vmem:[#allocation122_spill] sm:$0xff]  ;;  %vm480_vm14 = vcmp.eq.s32.totalorder %v5380_v54, %v5386_v0  ;;  %v7666_v54 = vld [vmem:[#allocation120_spill] sm:$0xff] }
  0xe7   :  { %3923 = vmatpush.msk.msrb.mxu2 %vm456_vm12, %v7472_v47  ;;  %vm454_vm0 = vcmp.eq.s32.totalorder %v7650_v45, %v5386_v0  ;;  %v7659_v45 = vld [vmem:[#allocation121_spill] sm:$0xff]  ;;  %vm448_vm12 = vcmp.eq.s32.totalorder %v5356_v59, %v5386_v0 }
  0xe8   :  { %2140 = vmatmul.f32.gmra.mxu0 %v7637_v31  ;;  %v1895_v31 = vpop.f32.mrf.mxu2  ;;  %3906 = vmatpush.msk.msrb.mxu1 %vm426_vm11, %v7472_v47  ;;  %vm450_vm8 = vcmp.eq.s32.totalorder %v7659_v45, %v5386_v0  ;;  %v5934_v45 = vperm.slane %v5921_v63, 0  ;;  %vm418_vm11 = vcmp.eq.s32.totalorder %v5347_v52, %v5386_v0 }
  0xe9   :  { %2222 = vmatmul.f32.gmra.mxu2 %v7638_v39  ;;  %v7643_v39 = vld [vmem:[#allocation100_spill] sm:$0xff]  ;;  %v1896_v35 = vadd.f32 %v1895_v31, %v1855_v49  ;;  %v7647_v49 = vld [vmem:[#allocation106_spill] sm:$0xff]  ;;  %v7648_v31 = vld [vmem:[#allocation79_spill] sm:$0xff]  ;;  %3940 = vmatpush.msk.msrb.mxu3 %vm486_vm2, %v7472_v47 }
  0xea   :  { %2181 = vmatmul.f32.gmra.mxu1 %v7641_v48  ;;  %vm394_vm9 = vcmp.eq.s32.totalorder %v7643_v39, %v5386_v0  ;;  %vm392_vm13 = vcmp.eq.s32.totalorder %v7647_v49, %v5386_v0  ;;  %3924 = vmatpush.msk.msrb.mxu2 %vm454_vm0, %v7472_v47  ;;  %vm1119_vm0 = vcmp.eq.s32.totalorder %v4418_v3, %v5934_v45 }
  0xeb   :  { %2263 = vmatmul.f32.gmra.mxu3 %v7642_v50  ;;  %3890 = vmatpush.msk.msrb.mxu0 %vm394_vm9, %v7472_v47  ;;  %v1816_v50 = vpop.f32.mrf.mxu0  ;;  %v1936_v48 = vpop.f32.mrf.mxu3  ;;  %vm386_vm9 = vcmp.eq.s32.totalorder %v7662_v22, %v5386_v0  ;;  %vm1151_vm2 = vcmp.eq.s32.totalorder %v4430_v7, %v5934_v45 }
  0xec   :  { %v5879_v39 = vadd.f32 %v1936_v48, %v1896_v35  ;;  %v1857_v41 = vpop.f32.mrf.mxu1  ;;  %v7651_v48 = vld [vmem:[#allocation85_spill] sm:$0xff]  ;;  %3907 = vmatpush.msk.msrb.mxu1 %vm424_vm15, %v7472_v47  ;;  %3925 = vmatpush.msk.msrb.mxu2 %vm452_vm4, %v7472_v47  ;;  %vm416_vm15 = vcmp.eq.s32.totalorder %v5383_v58, %v5386_v0  ;;  %vm1117_vm4 = vcmp.eq.s32.totalorder %v4427_v6, %v5934_v45 }
  0xed   :  { %3891 = vmatpush.msk.msrb.mxu0 %vm392_vm13, %v7472_v47  ;;  %v1858_v35 = vadd.f32 %v1857_v41, %v1816_v50  ;;  %v7653_v41 = vld [vmem:[#allocation114_spill] sm:$0xff]  ;;  %vm384_vm13 = vcmp.eq.s32.totalorder %v5365_v60, %v5386_v0 }
  0xee   :  { %vm422_vm3 = vcmp.eq.s32.totalorder %v7653_v41, %v5386_v0  ;;  %v7657_v41 = vld [vmem:[#allocation96_spill] sm:$0xff]  ;;  %3926 = vmatpush.msk.msrb.mxu2 %vm450_vm8, %v7472_v47  ;;  %vm1115_vm8 = vcmp.eq.s32.totalorder %v4441_v11, %v5934_v45 }
  0xef   :  { %3892 = vmatpush.msk.msrb.mxu0 %vm390_vm1, %v7472_v47  ;;  %3908 = vmatpush.msk.msrb.mxu1 %vm422_vm3, %v7472_v47  ;;  %vm1055_vm1 = vcmp.eq.s32.totalorder %v4415_v2, %v5934_v45  ;;  %vm1087_vm3 = vcmp.eq.s32.totalorder %v4424_v5, %v5934_v45 }
  0xf0   :  { %2143 = vmatmul.f32.gmra.mxu0 %v7648_v31  ;;  %v1898_v31 = vpop.f32.mrf.mxu2  ;;  %3927 = vmatpush.msk.msrb.mxu2 %vm448_vm12, %v7472_v47  ;;  %vm1113_vm12 = vcmp.eq.s32.totalorder %v4456_v16, %v5934_v45 }
  0xf1   :  { %2225 = vmatmul.f32.gmra.mxu2 %v7649_v43  ;;  %v1899_v43 = vadd.f32 %v1898_v31, %v1858_v35  ;;  %v7654_v35 = vld [vmem:[#allocation116_spill] sm:$0xff]  ;;  %v7655_v31 = vld [vmem:[#allocation118_spill] sm:$0xff]  ;;  %3909 = vmatpush.msk.msrb.mxu1 %vm420_vm7, %v7472_v47  ;;  %vm1085_vm7 = vcmp.eq.s32.totalorder %v4438_v10, %v5934_v45 }
  0xf2   :  { %2184 = vmatmul.f32.gmra.mxu1 %v7651_v48  ;;  %vm388_vm5 = vcmp.eq.s32.totalorder %v7654_v35, %v5386_v0  ;;  %vm484_vm6 = vcmp.eq.s32.totalorder %v7655_v31, %v5386_v0  ;;  %3976 = vmatpush.msk.msra.mxu2 %vm1119_vm0, %v7472_v47 }
  0xf3   :  { %2266 = vmatmul.f32.gmra.mxu3 %v7652_v55  ;;  %v1819_v55 = vpop.f32.mrf.mxu0  ;;  %v1939_v50 = vpop.f32.mrf.mxu3  ;;  %3893 = vmatpush.msk.msrb.mxu0 %vm388_vm5, %v7472_v47  ;;  %vm1053_vm5 = vcmp.eq.s32.totalorder %v4421_v4, %v5934_v45 }
  0xf4   :  { %v5909_v48 = vadd.f32 %v1939_v50, %v1899_v43  ;;  %v1860_v53 = vpop.f32.mrf.mxu1  ;;  %3941 = vmatpush.msk.msrb.mxu3 %vm484_vm6, %v7472_v47  ;;  %v7660_v50 = vld [vmem:[#allocation101_spill] sm:$0xff]  ;;  %3910 = vmatpush.msk.msrb.mxu1 %vm418_vm11, %v7472_v47  ;;  %vm1149_vm6 = vcmp.eq.s32.totalorder %v4444_v12, %v5934_v45  ;;  %vm1083_vm11 = vcmp.eq.s32.totalorder %v4453_v15, %v5934_v45 }
  0xf5   :  { %v1861_v43 = vadd.f32 %v1860_v53, %v1819_v55  ;;  %3894 = vmatpush.msk.msrb.mxu0 %vm386_vm9, %v7472_v47  ;;  %3977 = vmatpush.msk.msra.mxu2 %vm1117_vm4, %v7472_v47  ;;  %vm1051_vm9 = vcmp.eq.s32.totalorder %v4433_v8, %v5934_v45  ;;  %vm1109_vm4 = vcmp.eq.s32.totalorder %v4516_v25, %v5934_v45 }
  0xf6   :  { %3942 = vmatpush.msk.msrb.mxu3 %vm482_vm10, %v7472_v47  ;;  %3911 = vmatpush.msk.msrb.mxu1 %vm416_vm15, %v7472_v47  ;;  %vm1147_vm10 = vcmp.eq.s32.totalorder %v4459_v17, %v5934_v45  ;;  %vm1081_vm15 = vcmp.eq.s32.totalorder %v4465_v19, %v5934_v45 }
  0xf7   :  { %3895 = vmatpush.msk.msrb.mxu0 %vm384_vm13, %v7472_v47  ;;  %3978 = vmatpush.msk.msra.mxu2 %vm1115_vm8, %v7472_v47  ;;  %vm1049_vm13 = vcmp.eq.s32.totalorder %v4447_v13, %v5934_v45  ;;  %vm1107_vm8 = vcmp.eq.s32.totalorder %v4557_v29, %v5934_v45 }
  0xf8   :  { %2146 = vmatmul.f32.gmra.mxu0 %v7656_v51  ;;  %v7661_v51 = vld [vmem:[#allocation104_spill] sm:$0xff]  ;;  %3943 = vmatpush.msk.msrb.mxu3 %vm480_vm14, %v7472_v47  ;;  %vm1145_vm14 = vcmp.eq.s32.totalorder %v4471_v21, %v5934_v45 }
  0xf9   :  { %2228 = vmatmul.f32.gmra.mxu2 %v7657_v41  ;;  %v1901_v41 = vpop.f32.mrf.mxu2  ;;  %3944 = vmatpush.msk.msra.mxu0 %vm1055_vm1, %v7472_v47 }
  0xfa   :  { %2187 = vmatmul.f32.gmra.mxu1 %v7660_v50  ;;  %v1902_v31 = vadd.f32 %v1901_v41, %v1861_v43  ;;  %v7663_v43 = vld [vmem:[#allocation111_spill] sm:$0xff]  ;;  %v7664_v41 = vld [vmem:[#allocation112_spill] sm:$0xff]  ;;  %3992 = vmatpush.msk.msra.mxu3 %vm1151_vm2, %v7472_v47  ;;  %vm1143_vm2 = vcmp.eq.s32.totalorder %v4519_v26, %v5934_v45 }
  0xfb   :  { %2269 = vmatmul.f32.gmra.mxu3 %v7661_v51  ;;  %v1822_v53 = vpop.f32.mrf.mxu0  ;;  %v1942_v55 = vpop.f32.mrf.mxu3  ;;  %3960 = vmatpush.msk.msra.mxu1 %vm1087_vm3, %v7472_v47  ;;  %vm1079_vm3 = vcmp.eq.s32.totalorder %v4501_v24, %v5934_v45 }
  0xfc   :  { %v5944_v50 = vadd.f32 %v1942_v55, %v1902_v31  ;;  %v1863_v51 = vpop.f32.mrf.mxu1  ;;  %v7665_v55 = vld [vmem:[#allocation117_spill] sm:$0xff]  ;;  %3945 = vmatpush.msk.msra.mxu0 %vm1053_vm5, %v7472_v47  ;;  %3993 = vmatpush.msk.msra.mxu3 %vm1149_vm6, %v7472_v47  ;;  %vm1045_vm5 = vcmp.eq.s32.totalorder %v4490_v23, %v5934_v45  ;;  %vm1141_vm6 = vcmp.eq.s32.totalorder %v4560_v30, %v5934_v45 }
  0xfd   :  { %v1864_v31 = vadd.f32 %v1863_v51, %v1822_v53  ;;  %3961 = vmatpush.msk.msra.mxu1 %vm1085_vm7, %v7472_v47  ;;  %3979 = vmatpush.msk.msra.mxu2 %vm1113_vm12, %v7472_v47  ;;  %vm1077_vm7 = vcmp.eq.s32.totalorder %v4544_v28, %v5934_v45  ;;  %vm1105_vm12 = vcmp.eq.s32.totalorder %v4573_v33, %v5934_v45 }
  0xfe   :  { %3946 = vmatpush.msk.msra.mxu0 %vm1051_vm9, %v7472_v47  ;;  %3994 = vmatpush.msk.msra.mxu3 %vm1147_vm10, %v7472_v47  ;;  %vm1043_vm9 = vcmp.eq.s32.totalorder %v4533_v27, %v5934_v45  ;;  %vm1139_vm10 = vcmp.eq.s32.totalorder %v4576_v34, %v5934_v45 }
  0xff   :  { %3962 = vmatpush.msk.msra.mxu1 %vm1083_vm11, %v7472_v47 }
 0x100   :  { %2149 = vmatmul.f32.gmra.mxu0 %v7663_v43  ;;  %3995 = vmatpush.msk.msra.mxu3 %vm1145_vm14, %v7472_v47  ;;  %vm1137_vm14 = vcmp.eq.s32.totalorder %v4626_v38, %v5934_v45 }
 0x101   :  { %2231 = vmatmul.f32.gmra.mxu2 %v7664_v41  ;;  %v1904_v43 = vpop.f32.mrf.mxu2  ;;  %3947 = vmatpush.msk.msra.mxu0 %vm1049_vm13, %v7472_v47 }
 0x102   :  { %2190 = vmatmul.f32.gmra.mxu1 %v7665_v55  ;;  %v1905_v0 = vadd.f32 %v1904_v43, %v1864_v31  ;;  %v7667_v31 = vld [vmem:[#allocation125_spill] sm:$0xff]  ;;  %v7668_v43 = vld [vmem:[#allocation127_spill] sm:$0xff]  ;;  %3996 = vmatpush.msk.msra.mxu3 %vm1143_vm2, %v7472_v47  ;;  %vm1135_vm2 = vcmp.eq.s32.totalorder %v4642_v42, %v5934_v45 }
 0x103   :  { %2272 = vmatmul.f32.gmra.mxu3 %v7666_v54  ;;  %v1945_v53 = vpop.f32.mrf.mxu3  ;;  %3963 = vmatpush.msk.msra.mxu1 %vm1081_vm15, %v7472_v47  ;;  %vm1073_vm15 = vcmp.eq.s32.totalorder %v4610_v36, %v5934_v45  ;;  %v7685_v42 = vld [vmem:[#allocation23_spill] sm:$0xff] }
 0x104   :  { %v1825_v54 = vpop.f32.mrf.mxu0  ;;  %v5974_v51 = vadd.f32 %v1945_v53, %v1905_v0  ;;  %v1866_v41 = vpop.f32.mrf.mxu1  ;;  %v7669_v0 = vld [vmem:[#allocation128_spill] sm:$0xff]  ;;  %3997 = vmatpush.msk.msra.mxu3 %vm1141_vm6, %v7472_v47  ;;  %vm1133_vm6 = vcmp.eq.s32.totalorder %v4692_v46, %v5934_v45 }
 0x105   :  { %v1867_v55 = vadd.f32 %v1866_v41, %v1825_v54  ;;  %3964 = vmatpush.msk.msra.mxu1 %vm1079_vm3, %v7472_v47  ;;  %vm1071_vm3 = vcmp.eq.s32.totalorder %v4636_v40, %v5934_v45  ;;  %v7683_v40 = vld [vmem:[#allocation134_spill] sm:$0xff]  ;;  %v7699_v46 = vld [vmem:[#allocation32_spill] sm:$0xff] }
 0x106   :  { %3998 = vmatpush.msk.msra.mxu3 %vm1139_vm10, %v7472_v47 }
 0x107   :  { %3965 = vmatpush.msk.msra.mxu1 %vm1077_vm7, %v7472_v47  ;;  %vm1069_vm7 = vcmp.eq.s32.totalorder %v7685_v42, %v5934_v45  ;;  %v7698_v42 = vld [vmem:[#allocation31_spill] sm:$0xff] }
 0x108   :  { %2152 = vmatmul.f32.gmra.mxu0 %v5367_v61  ;;  %3999 = vmatpush.msk.msra.mxu3 %vm1137_vm14, %v7472_v47 }
 0x109   :  { %2234 = vmatmul.f32.gmra.mxu2 %v7667_v31  ;;  %v1907_v61 = vpop.f32.mrf.mxu2 }
 0x10a   :  { %2193 = vmatmul.f32.gmra.mxu1 %v7668_v43  ;;  %v1908_v53 = vadd.f32 %v1907_v61, %v1867_v55  ;;  %v7670_v55 = vld [vmem:[#allocation14_spill] sm:$0xff]  ;;  %v7671_v61 = vld [vmem:[#allocation129_spill] sm:$0xff]  ;;  %4000 = vmatpush.msk.msra.mxu3 %vm1135_vm2, %v7472_v47 }
 0x10b   :  { %2275 = vmatmul.f32.gmra.mxu3 %v7669_v0  ;;  %v1948_v41 = vpop.f32.mrf.mxu3  ;;  %vm1111_vm0 = vcmp.eq.s32.totalorder %v7670_v55, %v5934_v45 }
 0x10c   :  { %v6004_v31 = vadd.f32 %v1948_v41, %v1908_v53  ;;  %3980 = vmatpush.msk.msra.mxu2 %vm1111_vm0, %v7472_v47  ;;  %v7672_v53 = vld [vmem:[#allocation130_spill] sm:$0xff]  ;;  %vm1103_vm0 = vcmp.eq.s32.totalorder %v4623_v37, %v5934_v45  ;;  %4001 = vmatpush.msk.msra.mxu3 %vm1133_vm6, %v7472_v47 }
 0x10d   :  { %v1828_v54 = vpop.f32.mrf.mxu0 }
 0x10e   :  { %3981 = vmatpush.msk.msra.mxu2 %vm1109_vm4, %v7472_v47 }
 0x10f   :  { %v1869_v43 = vpop.f32.mrf.mxu1 }
 0x110   :  { %2155 = vmatmul.f32.gmra.mxu0 %v5430_v14  ;;  %v1870_v0 = vadd.f32 %v1869_v43, %v1828_v54  ;;  %3982 = vmatpush.msk.msra.mxu2 %vm1107_vm8, %v7472_v47 }
 0x111   :  { %2237 = vmatmul.f32.gmra.mxu2 %v5432_v9  ;;  %v7673_v9 = vld [vmem:[#allocation13_spill] sm:$0xff] }
 0x112   :  { %2196 = vmatmul.f32.gmra.mxu1 %v7671_v61  ;;  %vm1047_vm1 = vcmp.eq.s32.totalorder %v7673_v9, %v5934_v45  ;;  %3983 = vmatpush.msk.msra.mxu2 %vm1105_vm12, %v7472_v47 }
 0x113   :  { %2278 = vmatmul.f32.gmra.mxu3 %v7672_v53  ;;  %3948 = vmatpush.msk.msra.mxu0 %vm1047_vm1, %v7472_v47 }
 0x114   :  { %v1910_v14 = vpop.f32.mrf.mxu2  ;;  %3984 = vmatpush.msk.msra.mxu2 %vm1103_vm0, %v7472_v47  ;;  %vm1095_vm0 = vcmp.eq.s32.totalorder %v7699_v46, %v5934_v45  ;;  %v7708_v46 = vld [vmem:[#allocation41_spill] sm:$0xff] }
 0x115   :  { %v1911_v41 = vadd.f32 %v1910_v14, %v1870_v0  ;;  %v1831_v54 = vpop.f32.mrf.mxu0  ;;  %v1951_v43 = vpop.f32.mrf.mxu3  ;;  %3949 = vmatpush.msk.msra.mxu0 %vm1045_vm5, %v7472_v47  ;;  %v7674_v14 = vld [vmem:[#allocation131_spill] sm:$0xff]  ;;  %vm1125_vm6 = vcmp.eq.s32.totalorder %v7708_v46, %v5934_v45  ;;  %v7725_v46 = vld [vmem:[#allocation45_spill] sm:$0xff] }
 0x117   :  { %v6034_v61 = vadd.f32 %v1951_v43, %v1911_v41  ;;  %v1872_v53 = vpop.f32.mrf.mxu1  ;;  %v7675_v41 = vld [vmem:[#allocation132_spill] sm:$0xff]  ;;  %3950 = vmatpush.msk.msra.mxu0 %vm1043_vm9, %v7472_v47 }
 0x118   :  { %2158 = vmatmul.f32.gmra.mxu0 %v5478_v62  ;;  %v1873_v0 = vadd.f32 %v1872_v53, %v1831_v54  ;;  %v7676_v54 = vld [vmem:[#allocation16_spill] sm:$0xff] }
 0x119   :  { %2240 = vmatmul.f32.gmra.mxu2 %v5480_v56  ;;  %vm1075_vm11 = vcmp.eq.s32.totalorder %v7676_v54, %v5934_v45 }
 0x11a   :  { %2199 = vmatmul.f32.gmra.mxu1 %v7674_v14 }
 0x11b   :  { %2281 = vmatmul.f32.gmra.mxu3 %v7675_v41  ;;  %3966 = vmatpush.msk.msra.mxu1 %vm1075_vm11, %v7472_v47 }
 0x11c   :  { %v1913_v62 = vpop.f32.mrf.mxu2 }
 0x11d   :  { %v1914_v56 = vadd.f32 %v1913_v62, %v1873_v0  ;;  %v1974_v43 = vpop.f32.mrf.mxu0  ;;  %v7677_v62 = vld [vmem:[#allocation15_spill] sm:$0xff]  ;;  %3967 = vmatpush.msk.msra.mxu1 %vm1073_vm15, %v7472_v47  ;;  %vm1065_vm15 = vcmp.eq.s32.totalorder %v7698_v42, %v5934_v45 }
 0x11e   :  { %v1954_v53 = vpop.f32.mrf.mxu3  ;;  %v1975_v14 = vadd.f32 %v1974_v43, %v5849_v1  ;;  %vm1041_vm13 = vcmp.eq.s32.totalorder %v7677_v62, %v5934_v45  ;;  %v7711_v42 = vld [vmem:[#allocation39_spill] sm:$0xff] }
 0x11f   :  { %v6065_v41 = vadd.f32 %v1954_v53, %v1914_v56  ;;  %v2015_v0 = vpop.f32.mrf.mxu1  ;;  %3951 = vmatpush.msk.msra.mxu0 %vm1041_vm13, %v7472_v47  ;;  %v7678_v56 = vld [vmem:[#allocation133_spill] sm:$0xff]  ;;  %3968 = vmatpush.msk.msra.mxu1 %vm1071_vm3, %v7472_v47 }
 0x120   :  { %2301 = vmatmul.f32.vlgmr.msrb.gmra.mxu0 %v5526_v18  ;;  %v2016_v1 = vadd.f32 %v2015_v0, %v1975_v14 }
 0x121   :  { %2383 = vmatmul.f32.vlgmr.msrb.gmra.mxu2 %v5528_v20  ;;  %v7679_v20 = vld [vmem:[#allocation17_spill] sm:$0xff]  ;;  %3969 = vmatpush.msk.msra.mxu1 %vm1069_vm7, %v7472_v47  ;;  %vm1061_vm7 = vcmp.eq.s32.totalorder %v7711_v42, %v5934_v45  ;;  %v7724_v42 = vld [vmem:[#allocation46_spill] sm:$0xff] }
 0x122   :  { %2342 = vmatmul.f32.vlgmr.msrb.gmra.mxu1 %v5536_v32  ;;  %vm1039_vm1 = vcmp.eq.s32.totalorder %v7679_v20, %v5934_v45  ;;  %v7680_v32 = vld [vmem:[#allocation20_spill] sm:$0xff] }
 0x123   :  { %2424 = vmatmul.f32.vlgmr.msrb.gmra.mxu3 %v7678_v56  ;;  %3952 = vmatpush.msk.msra.mxu0 %vm1039_vm1, %v7472_v47  ;;  %vm1101_vm4 = vcmp.eq.s32.totalorder %v7680_v32, %v5934_v45  ;;  %v7684_v32 = vld [vmem:[#allocation135_spill] sm:$0xff]  ;;  %v7686_v20 = vld [vmem:[#allocation24_spill] sm:$0xff] }
 0x124   :  { %v2056_v18 = vpop.f32.mrf.mxu2  ;;  %3985 = vmatpush.msk.msra.mxu2 %vm1101_vm4, %v7472_v47  ;;  %vm1099_vm8 = vcmp.eq.s32.totalorder %v7686_v20, %v5934_v45  ;;  %v7695_v20 = vld [vmem:[#allocation33_spill] sm:$0xff] }
 0x125   :  { %v2057_v43 = vadd.f32 %v2056_v18, %v2016_v1  ;;  %v1977_v53 = vpop.f32.mrf.mxu0  ;;  %v7682_v18 = vld [vmem:[#allocation18_spill] sm:$0xff]  ;;  %vm1129_vm14 = vcmp.eq.s32.totalorder %v7695_v20, %v5934_v45  ;;  %v7712_v20 = vld [vmem:[#allocation40_spill] sm:$0xff] }
 0x126   :  { %v1978_v14 = vadd.f32 %v1977_v53, %v5879_v39  ;;  %v2097_v0 = vpop.f32.mrf.mxu3  ;;  %vm1037_vm5 = vcmp.eq.s32.totalorder %v7682_v18, %v5934_v45  ;;  %3986 = vmatpush.msk.msra.mxu2 %vm1099_vm8, %v7472_v47  ;;  %v7688_v53 = vld [vmem:[#allocation137_spill] sm:$0xff]  ;;  %vm1091_vm8 = vcmp.eq.s32.totalorder %v7712_v20, %v5934_v45  ;;  %v7721_v20 = vld [vmem:[#allocation47_spill] sm:$0xff] }
 0x127   :  { %v6096_v56 = vadd.f32 %v2097_v0, %v2057_v43  ;;  %v2018_v1 = vpop.f32.mrf.mxu1  ;;  %3953 = vmatpush.msk.msra.mxu0 %vm1037_vm5, %v7472_v47  ;;  %v7687_v43 = vld [vmem:[#allocation136_spill] sm:$0xff]  ;;  %v7690_v0 = vld [vmem:[#allocation29_spill] sm:$0xff] }
 0x128   :  { %2304 = vmatmul.f32.gmra.mxu0 %v7683_v40  ;;  %v2019_v39 = vadd.f32 %v2018_v1, %v1978_v14  ;;  %vm1131_vm10 = vcmp.eq.s32.totalorder %v7690_v0, %v5934_v45  ;;  %v7691_v14 = vld [vmem:[#allocation27_spill] sm:$0xff]  ;;  %v7692_v1 = vld [vmem:[#allocation28_spill] sm:$0xff] }
 0x129   :  { %7681 = vst [vmem:[#allocation53_spill] sm:$0xff] %v6096_v56  ;;  %2386 = vmatmul.f32.gmra.mxu2 %v7684_v32  ;;  %v7689_v32 = vld [vmem:[#allocation22_spill] sm:$0xff]  ;;  %4002 = vmatpush.msk.msra.mxu3 %vm1131_vm10, %v7472_v47  ;;  %vm1067_vm11 = vcmp.eq.s32.totalorder %v7691_v14, %v5934_v45  ;;  %vm1097_vm12 = vcmp.eq.s32.totalorder %v7692_v1, %v5934_v45  ;;  %v7697_v1 = vld [vmem:[#allocation139_spill] sm:$0xff] }
 0x12a   :  { %2345 = vmatmul.f32.gmra.mxu1 %v7687_v43  ;;  %vm1035_vm9 = vcmp.eq.s32.totalorder %v7689_v32, %v5934_v45  ;;  %3987 = vmatpush.msk.msra.mxu2 %vm1097_vm12, %v7472_v47  ;;  %v7696_v14 = vld [vmem:[#allocation138_spill] sm:$0xff] }
 0x12b   :  { %2427 = vmatmul.f32.gmra.mxu3 %v7688_v53  ;;  %3954 = vmatpush.msk.msra.mxu0 %vm1035_vm9, %v7472_v47 }
 0x12c   :  { %v2059_v40 = vpop.f32.mrf.mxu2  ;;  %3970 = vmatpush.msk.msra.mxu1 %vm1067_vm11, %v7472_v47  ;;  %4003 = vmatpush.msk.msra.mxu3 %vm1129_vm14, %v7472_v47  ;;  %vm1121_vm14 = vcmp.eq.s32.totalorder %v7721_v20, %v5934_v45  ;;  %v7738_v20 = vld [vmem:[#allocation57_spill] sm:$0xff] }
 0x12d   :  { %v2060_v56 = vadd.f32 %v2059_v40, %v2019_v39  ;;  %v1980_v43 = vpop.f32.mrf.mxu0  ;;  %v7694_v40 = vld [vmem:[#allocation26_spill] sm:$0xff]  ;;  %3988 = vmatpush.msk.msra.mxu2 %vm1095_vm0, %v7472_v47  ;;  %vm1247_vm0 = vcmp.eq.s32.totalorder %v7725_v46, %v5934_v45 }
 0x12e   :  { %v1981_v53 = vadd.f32 %v1980_v43, %v5909_v48  ;;  %v2100_v32 = vpop.f32.mrf.mxu3  ;;  %vm1033_vm13 = vcmp.eq.s32.totalorder %v7694_v40, %v5934_v45  ;;  %3971 = vmatpush.msk.msra.mxu1 %vm1065_vm15, %v7472_v47  ;;  %v7703_v43 = vld [vmem:[#allocation37_spill] sm:$0xff]  ;;  %vm1057_vm15 = vcmp.eq.s32.totalorder %v7724_v42, %v5934_v45  ;;  %v7734_v46 = vld [vmem:[#allocation54_spill] sm:$0xff]  ;;  %v7737_v42 = vld [vmem:[#allocation55_spill] sm:$0xff] }
 0x12f   :  { %v6127_v0 = vadd.f32 %v2100_v32, %v2060_v56  ;;  %v2021_v39 = vpop.f32.mrf.mxu1  ;;  %3955 = vmatpush.msk.msra.mxu0 %vm1033_vm13, %v7472_v47  ;;  %v7700_v56 = vld [vmem:[#allocation140_spill] sm:$0xff]  ;;  %v7701_v32 = vld [vmem:[#allocation141_spill] sm:$0xff]  ;;  %vm1127_vm2 = vcmp.eq.s32.totalorder %v7703_v43, %v5934_v45 }
 0x130   :  { %2307 = vmatmul.f32.gmra.mxu0 %v7696_v14  ;;  %v2022_v48 = vadd.f32 %v2021_v39, %v1981_v53  ;;  %4004 = vmatpush.msk.msra.mxu3 %vm1127_vm2, %v7472_v47  ;;  %v7704_v53 = vld [vmem:[#allocation35_spill] sm:$0xff]  ;;  %v7705_v39 = vld [vmem:[#allocation36_spill] sm:$0xff] }
 0x131   :  { %7693 = vst [vmem:[#allocation56_spill] sm:$0xff] %v6127_v0  ;;  %2389 = vmatmul.f32.gmra.mxu2 %v7697_v1  ;;  %v7702_v1 = vld [vmem:[#allocation30_spill] sm:$0xff]  ;;  %vm1063_vm3 = vcmp.eq.s32.totalorder %v7704_v53, %v5934_v45  ;;  %vm1093_vm4 = vcmp.eq.s32.totalorder %v7705_v39, %v5934_v45  ;;  %v7710_v39 = vld [vmem:[#allocation143_spill] sm:$0xff] }
 0x132   :  { %2348 = vmatmul.f32.gmra.mxu1 %v7700_v56  ;;  %vm1031_vm1 = vcmp.eq.s32.totalorder %v7702_v1, %v5934_v45  ;;  %3989 = vmatpush.msk.msra.mxu2 %vm1093_vm4, %v7472_v47  ;;  %v7709_v53 = vld [vmem:[#allocation142_spill] sm:$0xff] }
 0x133   :  { %2430 = vmatmul.f32.gmra.mxu3 %v7701_v32  ;;  %3956 = vmatpush.msk.msra.mxu0 %vm1031_vm1, %v7472_v47 }
 0x134   :  { %v2062_v14 = vpop.f32.mrf.mxu2  ;;  %3972 = vmatpush.msk.msra.mxu1 %vm1063_vm3, %v7472_v47  ;;  %4005 = vmatpush.msk.msra.mxu3 %vm1125_vm6, %v7472_v47  ;;  %vm1277_vm6 = vcmp.eq.s32.totalorder %v7734_v46, %v5934_v45  ;;  %v7751_v46 = vld [vmem:[#allocation67_spill] sm:$0xff] }
 0x135   :  { %v2063_v0 = vadd.f32 %v2062_v14, %v2022_v48  ;;  %v1983_v56 = vpop.f32.mrf.mxu0  ;;  %v7707_v14 = vld [vmem:[#allocation34_spill] sm:$0xff]  ;;  %3990 = vmatpush.msk.msra.mxu2 %vm1091_vm8, %v7472_v47  ;;  %vm1243_vm8 = vcmp.eq.s32.totalorder %v7738_v20, %v5934_v45  ;;  %v7747_v20 = vld [vmem:[#allocation65_spill] sm:$0xff] }
 0x136   :  { %v1984_v32 = vadd.f32 %v1983_v56, %v5944_v50  ;;  %v2103_v1 = vpop.f32.mrf.mxu3  ;;  %vm1029_vm5 = vcmp.eq.s32.totalorder %v7707_v14, %v5934_v45  ;;  %3973 = vmatpush.msk.msra.mxu1 %vm1061_vm7, %v7472_v47  ;;  %v7716_v56 = vld [vmem:[#allocation44_spill] sm:$0xff]  ;;  %vm1213_vm7 = vcmp.eq.s32.totalorder %v7737_v42, %v5934_v45  ;;  %v7750_v42 = vld [vmem:[#allocation66_spill] sm:$0xff] }
 0x137   :  { %v6158_v43 = vadd.f32 %v2103_v1, %v2063_v0  ;;  %v2024_v48 = vpop.f32.mrf.mxu1  ;;  %3957 = vmatpush.msk.msra.mxu0 %vm1029_vm5, %v7472_v47  ;;  %v7713_v0 = vld [vmem:[#allocation144_spill] sm:$0xff]  ;;  %v7714_v1 = vld [vmem:[#allocation145_spill] sm:$0xff]  ;;  %vm1123_vm10 = vcmp.eq.s32.totalorder %v7716_v56, %v5934_v45 }
 0x138   :  { %2310 = vmatmul.f32.gmra.mxu0 %v7709_v53  ;;  %v2025_v50 = vadd.f32 %v2024_v48, %v1984_v32  ;;  %4006 = vmatpush.msk.msra.mxu3 %vm1123_vm10, %v7472_v47  ;;  %v7717_v32 = vld [vmem:[#allocation42_spill] sm:$0xff]  ;;  %v7718_v48 = vld [vmem:[#allocation43_spill] sm:$0xff] }
 0x139   :  { %7706 = vst [vmem:[#allocation63_spill] sm:$0xff] %v6158_v43  ;;  %2392 = vmatmul.f32.gmra.mxu2 %v7710_v39  ;;  %v7715_v39 = vld [vmem:[#allocation38_spill] sm:$0xff]  ;;  %vm1059_vm11 = vcmp.eq.s32.totalorder %v7717_v32, %v5934_v45  ;;  %vm1089_vm12 = vcmp.eq.s32.totalorder %v7718_v48, %v5934_v45  ;;  %v7723_v48 = vld [vmem:[#allocation147_spill] sm:$0xff] }
 0x13a   :  { %2351 = vmatmul.f32.gmra.mxu1 %v7713_v0  ;;  %vm1027_vm9 = vcmp.eq.s32.totalorder %v7715_v39, %v5934_v45  ;;  %3991 = vmatpush.msk.msra.mxu2 %vm1089_vm12, %v7472_v47  ;;  %v7722_v32 = vld [vmem:[#allocation146_spill] sm:$0xff] }
 0x13b   :  { %2433 = vmatmul.f32.gmra.mxu3 %v7714_v1  ;;  %3958 = vmatpush.msk.msra.mxu0 %vm1027_vm9, %v7472_v47 }
 0x13c   :  { %v2065_v53 = vpop.f32.mrf.mxu2  ;;  %3974 = vmatpush.msk.msra.mxu1 %vm1059_vm11, %v7472_v47  ;;  %4007 = vmatpush.msk.msra.mxu3 %vm1121_vm14, %v7472_v47  ;;  %vm1273_vm14 = vcmp.eq.s32.totalorder %v7747_v20, %v5934_v45  ;;  %v7764_v20 = vld [vmem:[#allocation77_spill] sm:$0xff] }
 0x13d   :  { %v2066_v43 = vadd.f32 %v2065_v53, %v2025_v50  ;;  %v1986_v0 = vpop.f32.mrf.mxu0  ;;  %v7720_v53 = vld [vmem:[#allocation12_spill] sm:$0xff]  ;;  %4040 = vmatpush.msk.msrb.mxu2 %vm1247_vm0, %v7472_v47  ;;  %vm1239_vm0 = vcmp.eq.s32.totalorder %v7751_v46, %v5934_v45  ;;  %v7760_v46 = vld [vmem:[#allocation75_spill] sm:$0xff] }
 0x13e   :  { %v1987_v1 = vadd.f32 %v1986_v0, %v5974_v51  ;;  %v2106_v39 = vpop.f32.mrf.mxu3  ;;  %vm1025_vm13 = vcmp.eq.s32.totalorder %v7720_v53, %v5934_v45  ;;  %3975 = vmatpush.msk.msra.mxu1 %vm1057_vm15, %v7472_v47  ;;  %v7729_v0 = vld [vmem:[#allocation49_spill] sm:$0xff]  ;;  %vm1209_vm15 = vcmp.eq.s32.totalorder %v7750_v42, %v5934_v45  ;;  %v7763_v42 = vld [vmem:[#allocation76_spill] sm:$0xff] }
 0x13f   :  { %v6189_v56 = vadd.f32 %v2106_v39, %v2066_v43  ;;  %v2027_v50 = vpop.f32.mrf.mxu1  ;;  %3959 = vmatpush.msk.msra.mxu0 %vm1025_vm13, %v7472_v47  ;;  %v7726_v43 = vld [vmem:[#allocation148_spill] sm:$0xff]  ;;  %v7727_v39 = vld [vmem:[#allocation149_spill] sm:$0xff]  ;;  %vm1279_vm2 = vcmp.eq.s32.totalorder %v7729_v0, %v5934_v45 }
 0x140   :  { %2313 = vmatmul.f32.gmra.mxu0 %v7722_v32  ;;  %v2028_v51 = vadd.f32 %v2027_v50, %v1987_v1  ;;  %4056 = vmatpush.msk.msrb.mxu3 %vm1279_vm2, %v7472_v47  ;;  %v7730_v1 = vld [vmem:[#allocation50_spill] sm:$0xff]  ;;  %v7731_v50 = vld [vmem:[#allocation51_spill] sm:$0xff] }
 0x141   :  { %7719 = vst [vmem:[#allocation64_spill] sm:$0xff] %v6189_v56  ;;  %2395 = vmatmul.f32.gmra.mxu2 %v7723_v48  ;;  %v7728_v48 = vld [vmem:[#allocation48_spill] sm:$0xff]  ;;  %vm1215_vm3 = vcmp.eq.s32.totalorder %v7730_v1, %v5934_v45  ;;  %vm1245_vm4 = vcmp.eq.s32.totalorder %v7731_v50, %v5934_v45  ;;  %v7735_v1 = vld [vmem:[#allocation150_spill] sm:$0xff]  ;;  %v7736_v50 = vld [vmem:[#allocation151_spill] sm:$0xff] }
 0x142   :  { %2354 = vmatmul.f32.gmra.mxu1 %v7726_v43  ;;  %vm1183_vm1 = vcmp.eq.s32.totalorder %v7728_v48, %v5934_v45  ;;  %4041 = vmatpush.msk.msrb.mxu2 %vm1245_vm4, %v7472_v47 }
 0x143   :  { %2436 = vmatmul.f32.gmra.mxu3 %v7727_v39  ;;  %4008 = vmatpush.msk.msrb.mxu0 %vm1183_vm1, %v7472_v47 }
 0x144   :  { %v2068_v32 = vpop.f32.mrf.mxu2  ;;  %4024 = vmatpush.msk.msrb.mxu1 %vm1215_vm3, %v7472_v47  ;;  %4057 = vmatpush.msk.msrb.mxu3 %vm1277_vm6, %v7472_v47  ;;  %vm1269_vm6 = vcmp.eq.s32.totalorder %v7760_v46, %v5934_v45 }
 0x145   :  { %v2069_v56 = vadd.f32 %v2068_v32, %v2028_v51  ;;  %v1989_v43 = vpop.f32.mrf.mxu0  ;;  %v7733_v32 = vld [vmem:[#allocation52_spill] sm:$0xff]  ;;  %4042 = vmatpush.msk.msrb.mxu2 %vm1243_vm8, %v7472_v47  ;;  %vm1235_vm8 = vcmp.eq.s32.totalorder %v7764_v20, %v5934_v45  ;;  %v7774_v20 = vld [vmem:[#allocation162_spill] sm:$0xff] }
 0x146   :  { %v1990_v39 = vadd.f32 %v1989_v43, %v6004_v31  ;;  %v2109_v48 = vpop.f32.mrf.mxu3  ;;  %vm1181_vm5 = vcmp.eq.s32.totalorder %v7733_v32, %v5934_v45  ;;  %4025 = vmatpush.msk.msrb.mxu1 %vm1213_vm7, %v7472_v47  ;;  %v7742_v43 = vld [vmem:[#allocation59_spill] sm:$0xff]  ;;  %vm1205_vm7 = vcmp.eq.s32.totalorder %v7763_v42, %v5934_v45  ;;  %v7777_v42 = vld [vmem:[#allocation89_spill] sm:$0xff] }
 0x147   :  { %v6220_v0 = vadd.f32 %v2109_v48, %v2069_v56  ;;  %v2030_v51 = vpop.f32.mrf.mxu1  ;;  %4009 = vmatpush.msk.msrb.mxu0 %vm1181_vm5, %v7472_v47  ;;  %v7739_v56 = vld [vmem:[#allocation152_spill] sm:$0xff]  ;;  %v7740_v48 = vld [vmem:[#allocation153_spill] sm:$0xff]  ;;  %vm1275_vm10 = vcmp.eq.s32.totalorder %v7742_v43, %v5934_v45 }
 0x148   :  { %2316 = vmatmul.f32.gmra.mxu0 %v7735_v1  ;;  %v2031_v31 = vadd.f32 %v2030_v51, %v1990_v39  ;;  %4058 = vmatpush.msk.msrb.mxu3 %vm1275_vm10, %v7472_v47  ;;  %v7743_v39 = vld [vmem:[#allocation60_spill] sm:$0xff]  ;;  %v7744_v51 = vld [vmem:[#allocation61_spill] sm:$0xff] }
 0x149   :  { %7732 = vst [vmem:[#allocation69_spill] sm:$0xff] %v6220_v0  ;;  %2398 = vmatmul.f32.gmra.mxu2 %v7736_v50  ;;  %v7741_v50 = vld [vmem:[#allocation58_spill] sm:$0xff]  ;;  %vm1211_vm11 = vcmp.eq.s32.totalorder %v7743_v39, %v5934_v45  ;;  %vm1241_vm12 = vcmp.eq.s32.totalorder %v7744_v51, %v5934_v45  ;;  %v7749_v51 = vld [vmem:[#allocation155_spill] sm:$0xff] }
 0x14a   :  { %2357 = vmatmul.f32.gmra.mxu1 %v7739_v56  ;;  %vm1179_vm9 = vcmp.eq.s32.totalorder %v7741_v50, %v5934_v45  ;;  %4043 = vmatpush.msk.msrb.mxu2 %vm1241_vm12, %v7472_v47  ;;  %v7748_v39 = vld [vmem:[#allocation154_spill] sm:$0xff] }
 0x14b   :  { %2439 = vmatmul.f32.gmra.mxu3 %v7740_v48  ;;  %4010 = vmatpush.msk.msrb.mxu0 %vm1179_vm9, %v7472_v47 }
 0x14c   :  { %v2071_v1 = vpop.f32.mrf.mxu2  ;;  %4026 = vmatpush.msk.msrb.mxu1 %vm1211_vm11, %v7472_v47  ;;  %4059 = vmatpush.msk.msrb.mxu3 %vm1273_vm14, %v7472_v47 }
 0x14d   :  { %v2072_v0 = vadd.f32 %v2071_v1, %v2031_v31  ;;  %v1992_v56 = vpop.f32.mrf.mxu0  ;;  %v7746_v1 = vld [vmem:[#allocation62_spill] sm:$0xff]  ;;  %4044 = vmatpush.msk.msrb.mxu2 %vm1239_vm0, %v7472_v47  ;;  %vm1231_vm0 = vcmp.eq.s32.totalorder %v7777_v42, %v5934_v45  ;;  %v7781_v42 = vld [vmem:[#allocation91_spill] sm:$0xff] }
 0x14e   :  { %v1993_v48 = vadd.f32 %v1992_v56, %v6034_v61  ;;  %v2112_v50 = vpop.f32.mrf.mxu3  ;;  %vm1177_vm13 = vcmp.eq.s32.totalorder %v7746_v1, %v5934_v45  ;;  %4027 = vmatpush.msk.msrb.mxu1 %vm1209_vm15, %v7472_v47  ;;  %v7755_v56 = vld [vmem:[#allocation70_spill] sm:$0xff] }
 0x14f   :  { %v6251_v43 = vadd.f32 %v2112_v50, %v2072_v0  ;;  %v2033_v31 = vpop.f32.mrf.mxu1  ;;  %4011 = vmatpush.msk.msrb.mxu0 %vm1177_vm13, %v7472_v47  ;;  %v7752_v0 = vld [vmem:[#allocation156_spill] sm:$0xff]  ;;  %v7753_v50 = vld [vmem:[#allocation157_spill] sm:$0xff]  ;;  %vm1271_vm2 = vcmp.eq.s32.totalorder %v7755_v56, %v5934_v45 }
 0x150   :  { %2319 = vmatmul.f32.gmra.mxu0 %v7748_v39  ;;  %v2034_v61 = vadd.f32 %v2033_v31, %v1993_v48  ;;  %4060 = vmatpush.msk.msrb.mxu3 %vm1271_vm2, %v7472_v47  ;;  %v7756_v48 = vld [vmem:[#allocation71_spill] sm:$0xff]  ;;  %v7757_v31 = vld [vmem:[#allocation73_spill] sm:$0xff]  ;;  %vm1263_vm2 = vcmp.eq.s32.totalorder %v7781_v42, %v5934_v45 }
 0x151   :  { %7745 = vst [vmem:[#allocation72_spill] sm:$0xff] %v6251_v43  ;;  %2401 = vmatmul.f32.gmra.mxu2 %v7749_v51  ;;  %v7754_v51 = vld [vmem:[#allocation68_spill] sm:$0xff]  ;;  %vm1207_vm3 = vcmp.eq.s32.totalorder %v7756_v48, %v5934_v45  ;;  %vm1237_vm4 = vcmp.eq.s32.totalorder %v7757_v31, %v5934_v45  ;;  %v7761_v48 = vld [vmem:[#allocation158_spill] sm:$0xff]  ;;  %v7762_v31 = vld [vmem:[#allocation159_spill] sm:$0xff] }
 0x152   :  { %2360 = vmatmul.f32.gmra.mxu1 %v7752_v0  ;;  %vm1175_vm1 = vcmp.eq.s32.totalorder %v7754_v51, %v5934_v45  ;;  %4045 = vmatpush.msk.msrb.mxu2 %vm1237_vm4, %v7472_v47 }
 0x153   :  { %2442 = vmatmul.f32.gmra.mxu3 %v7753_v50  ;;  %4012 = vmatpush.msk.msrb.mxu0 %vm1175_vm1, %v7472_v47 }
 0x154   :  { %v2074_v39 = vpop.f32.mrf.mxu2  ;;  %4028 = vmatpush.msk.msrb.mxu1 %vm1207_vm3, %v7472_v47  ;;  %4061 = vmatpush.msk.msrb.mxu3 %vm1269_vm6, %v7472_v47 }
 0x155   :  { %v2075_v43 = vadd.f32 %v2074_v39, %v2034_v61  ;;  %v1995_v0 = vpop.f32.mrf.mxu0  ;;  %v7759_v39 = vld [vmem:[#allocation74_spill] sm:$0xff]  ;;  %4046 = vmatpush.msk.msrb.mxu2 %vm1235_vm8, %v7472_v47 }
 0x156   :  { %v1996_v50 = vadd.f32 %v1995_v0, %v6065_v41  ;;  %v2115_v51 = vpop.f32.mrf.mxu3  ;;  %vm1173_vm5 = vcmp.eq.s32.totalorder %v7759_v39, %v5934_v45  ;;  %4029 = vmatpush.msk.msrb.mxu1 %vm1205_vm7, %v7472_v47  ;;  %v7768_v0 = vld [vmem:[#allocation81_spill] sm:$0xff] }
 0x157   :  { %v6282_v56 = vadd.f32 %v2115_v51, %v2075_v43  ;;  %v2036_v61 = vpop.f32.mrf.mxu1  ;;  %4013 = vmatpush.msk.msrb.mxu0 %vm1173_vm5, %v7472_v47  ;;  %v7765_v43 = vld [vmem:[#allocation160_spill] sm:$0xff]  ;;  %v7766_v51 = vld [vmem:[#allocation161_spill] sm:$0xff]  ;;  %vm1267_vm10 = vcmp.eq.s32.totalorder %v7768_v0, %v5934_v45  ;;  %vm1165_vm5 = vcmp.eq.s32.totalorder %v7635_v44, %v5934_v45 }
 0x158   :  { %2322 = vmatmul.f32.gmra.mxu0 %v7761_v48  ;;  %v2037_v41 = vadd.f32 %v2036_v61, %v1996_v50  ;;  %4062 = vmatpush.msk.msrb.mxu3 %vm1267_vm10, %v7472_v47  ;;  %v7769_v50 = vld [vmem:[#allocation82_spill] sm:$0xff]  ;;  %v7770_v61 = vld [vmem:[#allocation83_spill] sm:$0xff] }
 0x159   :  { %7758 = vst [vmem:[#allocation79_spill] sm:$0xff] %v6282_v56  ;;  %2404 = vmatmul.f32.gmra.mxu2 %v7762_v31  ;;  %v7767_v31 = vld [vmem:[#allocation78_spill] sm:$0xff]  ;;  %vm1203_vm11 = vcmp.eq.s32.totalorder %v7769_v50, %v5934_v45  ;;  %vm1233_vm12 = vcmp.eq.s32.totalorder %v7770_v61, %v5934_v45  ;;  %v7775_v50 = vld [vmem:[#allocation163_spill] sm:$0xff] }
 0x15a   :  { %2363 = vmatmul.f32.gmra.mxu1 %v7765_v43  ;;  %vm1171_vm9 = vcmp.eq.s32.totalorder %v7767_v31, %v5934_v45  ;;  %4047 = vmatpush.msk.msrb.mxu2 %vm1233_vm12, %v7472_v47  ;;  %v7776_v61 = vld [vmem:[#allocation87_spill] sm:$0xff] }
 0x15b   :  { %2445 = vmatmul.f32.gmra.mxu3 %v7766_v51  ;;  %4014 = vmatpush.msk.msrb.mxu0 %vm1171_vm9, %v7472_v47  ;;  %vm1201_vm15 = vcmp.eq.s32.totalorder %v7776_v61, %v5934_v45 }
 0x15c   :  { %v2077_v48 = vpop.f32.mrf.mxu2  ;;  %4030 = vmatpush.msk.msrb.mxu1 %vm1203_vm11, %v7472_v47  ;;  %4048 = vmatpush.msk.msrb.mxu2 %vm1231_vm0, %v7472_v47 }
 0x15d   :  { %v2078_v56 = vadd.f32 %v2077_v48, %v2037_v41  ;;  %v2138_v43 = vpop.f32.mrf.mxu0  ;;  %v7772_v41 = vld [vmem:[#allocation84_spill] sm:$0xff]  ;;  %v7773_v48 = vld [vmem:[#allocation86_spill] sm:$0xff] }
 0x15e   :  { %v2118_v51 = vpop.f32.mrf.mxu3  ;;  %vm1169_vm13 = vcmp.eq.s32.totalorder %v7772_v41, %v5934_v45  ;;  %vm1265_vm14 = vcmp.eq.s32.totalorder %v7773_v48, %v5934_v45  ;;  %4031 = vmatpush.msk.msrb.mxu1 %vm1201_vm15, %v7472_v47 }
 0x15f   :  { %v6312_v31 = vadd.f32 %v2118_v51, %v2078_v56  ;;  %v2179_v0 = vpop.f32.mrf.mxu1  ;;  %4015 = vmatpush.msk.msrb.mxu0 %vm1169_vm13, %v7472_v47  ;;  %4063 = vmatpush.msk.msrb.mxu3 %vm1265_vm14, %v7472_v47  ;;  %v6326_v51 = vld [vmem:[#allocation7 + $0x8] sm:$0xff]  ;;  %vm1161_vm13 = vcmp.eq.s32.totalorder %v7647_v49, %v5934_v45 }
 0x160   :  { %2465 = vmatmul.f32.vlgmr.msra.gmra.mxu0 %v7774_v20  ;;  %v2180_v56 = vadd.f32 %v2179_v0, %v2138_v43  ;;  %7778 = vst [vmem:[#allocation85_spill] sm:$0xff] %v6326_v51  ;;  %v6330_v20 = vld [vmem:[#allocation7 + $0x18] sm:$0xff]  ;;  %v7782_v43 = vld [vmem:[#allocation92_spill] sm:$0xff] }
 0x161   :  { %7771 = vst [vmem:[#allocation80_spill] sm:$0xff] %v6312_v31  ;;  %2547 = vmatmul.f32.vlgmr.msra.gmra.mxu2 %v7775_v50  ;;  %v7780_v31 = vld [vmem:[#allocation90_spill] sm:$0xff]  ;;  %4064 = vmatpush.msk.msrb.mxu3 %vm1263_vm2, %v7472_v47  ;;  %vm1199_vm3 = vcmp.eq.s32.totalorder %v7782_v43, %v5934_v45 }
 0x162   :  { %2506 = vmatmul.f32.vlgmr.msra.gmra.mxu1 %v6326_v51  ;;  %7779 = vst [vmem:[#allocation88_spill] sm:$0xff] %v6330_v20  ;;  %vm1167_vm1 = vcmp.eq.s32.totalorder %v7780_v31, %v5934_v45  ;;  %v7783_v51 = vld [vmem:[#allocation93_spill] sm:$0xff]  ;;  %v7787_v43 = vld [vmem:[#allocation98_spill] sm:$0xff] }
 0x163   :  { %2588 = vmatmul.f32.vlgmr.msra.gmra.mxu3 %v6330_v20  ;;  %4016 = vmatpush.msk.msrb.mxu0 %vm1167_vm1, %v7472_v47  ;;  %vm1229_vm4 = vcmp.eq.s32.totalorder %v7783_v51, %v5934_v45  ;;  %v6355_v51 = vld [vmem:[#allocation7 + $0x50] sm:$0xff]  ;;  %vm1197_vm7 = vcmp.eq.s32.totalorder %v7787_v43, %v5934_v45 }
 0x164   :  { %v2220_v50 = vpop.f32.mrf.mxu2  ;;  %4032 = vmatpush.msk.msrb.mxu1 %vm1199_vm3, %v7472_v47  ;;  %4049 = vmatpush.msk.msrb.mxu2 %vm1229_vm4, %v7472_v47  ;;  %7786 = vst [vmem:[#allocation95_spill] sm:$0xff] %v6355_v51  ;;  %v7792_v43 = vld [vmem:[#allocation102_spill] sm:$0xff] }
 0x165   :  { %v2221_v0 = vadd.f32 %v2220_v50, %v2180_v56  ;;  %v2141_v20 = vpop.f32.mrf.mxu0  ;;  %v7784_v56 = vld [vmem:[#allocation97_spill] sm:$0xff]  ;;  %v6352_v50 = vld [vmem:[#allocation7 + $0x40] sm:$0xff]  ;;  %4017 = vmatpush.msk.msrb.mxu0 %vm1165_vm5, %v7472_v47  ;;  %vm1259_vm10 = vcmp.eq.s32.totalorder %v7792_v43, %v5934_v45  ;;  %vm1157_vm5 = vcmp.eq.s32.totalorder %v7654_v35, %v5934_v45 }
 0x166   :  { %v2261_v31 = vpop.f32.mrf.mxu3  ;;  %vm1261_vm6 = vcmp.eq.s32.totalorder %v7784_v56, %v5934_v45  ;;  %7785 = vst [vmem:[#allocation116_spill] sm:$0xff] %v6352_v50  ;;  %v6364_v56 = vld [vmem:[#allocation7 + $0x48] sm:$0xff]  ;;  %4033 = vmatpush.msk.msrb.mxu1 %vm1197_vm7, %v7472_v47 }
 0x167   :  { %v6346_v61 = vadd.f32 %v2261_v31, %v2221_v0  ;;  %v2182_v42 = vpop.f32.mrf.mxu1  ;;  %v7788_v31 = vld [vmem:[#allocation99_spill] sm:$0xff]  ;;  %4065 = vmatpush.msk.msrb.mxu3 %vm1261_vm6, %v7472_v47  ;;  %7789 = vst [vmem:[#allocation96_spill] sm:$0xff] %v6364_v56 }
 0x168   :  { %2468 = vmatmul.f32.gmra.mxu0 %v6352_v50  ;;  %vm1227_vm8 = vcmp.eq.s32.totalorder %v7788_v31, %v5934_v45  ;;  %v2183_v0 = vadd.f32 %v2182_v42, %v2141_v20  ;;  %v6368_v50 = vld [vmem:[#allocation7 + $0x58] sm:$0xff]  ;;  %v7791_v31 = vld [vmem:[#allocation100_spill] sm:$0xff] }
 0x169   :  { %2550 = vmatmul.f32.gmra.mxu2 %v6355_v51  ;;  %7790 = vst [vmem:[#allocation101_spill] sm:$0xff] %v6368_v50  ;;  %vm1163_vm9 = vcmp.eq.s32.totalorder %v7791_v31, %v5934_v45  ;;  %4066 = vmatpush.msk.msrb.mxu3 %vm1259_vm10, %v7472_v47  ;;  %v7793_v20 = vld [vmem:[#allocation103_spill] sm:$0xff]  ;;  %vm1251_vm10 = vcmp.eq.s32.totalorder %v5344_v57, %v5934_v45 }
 0x16a   :  { %2509 = vmatmul.f32.gmra.mxu1 %v6364_v56  ;;  %4050 = vmatpush.msk.msrb.mxu2 %vm1227_vm8, %v7472_v47  ;;  %vm1195_vm11 = vcmp.eq.s32.totalorder %v7793_v20, %v5934_v45  ;;  %v7794_v56 = vld [vmem:[#allocation105_spill] sm:$0xff]  ;;  %v7798_v20 = vld [vmem:[#allocation108_spill] sm:$0xff] }
 0x16b   :  { %2591 = vmatmul.f32.gmra.mxu3 %v6368_v50  ;;  %4018 = vmatpush.msk.msrb.mxu0 %vm1163_vm9, %v7472_v47  ;;  %vm1225_vm12 = vcmp.eq.s32.totalorder %v7794_v56, %v5934_v45  ;;  %v6393_v56 = vld [vmem:[#allocation7 + $0x90] sm:$0xff]  ;;  %vm1193_vm15 = vcmp.eq.s32.totalorder %v7798_v20, %v5934_v45  ;;  %vm1155_vm9 = vcmp.eq.s32.totalorder %v7662_v22, %v5934_v45 }
 0x16c   :  { %v2223_v51 = vpop.f32.mrf.mxu2  ;;  %4034 = vmatpush.msk.msrb.mxu1 %vm1195_vm11, %v7472_v47  ;;  %4051 = vmatpush.msk.msrb.mxu2 %vm1225_vm12, %v7472_v47  ;;  %7797 = vst [vmem:[#allocation111_spill] sm:$0xff] %v6393_v56  ;;  %v7803_v20 = vld [vmem:[#allocation113_spill] sm:$0xff]  ;;  %vm1187_vm11 = vcmp.eq.s32.totalorder %v5347_v52, %v5934_v45  ;;  %vm1217_vm12 = vcmp.eq.s32.totalorder %v5356_v59, %v5934_v45 }
 0x16d   :  { %v2224_v42 = vadd.f32 %v2223_v51, %v2183_v0  ;;  %v2144_v50 = vpop.f32.mrf.mxu0  ;;  %v7795_v51 = vld [vmem:[#allocation107_spill] sm:$0xff]  ;;  %4019 = vmatpush.msk.msrb.mxu0 %vm1161_vm13, %v7472_v47  ;;  %vm1255_vm2 = vcmp.eq.s32.totalorder %v7803_v20, %v5934_v45  ;;  %vm1153_vm13 = vcmp.eq.s32.totalorder %v5365_v60, %v5934_v45  ;;  %v6472_v59 = vld [vmem:[#allocation7 + $0x110] sm:$0xff] }
 0x16e   :  { %v2264_v31 = vpop.f32.mrf.mxu3  ;;  %vm1257_vm14 = vcmp.eq.s32.totalorder %v7795_v51, %v5934_v45  ;;  %v6390_v0 = vld [vmem:[#allocation7 + $0x80] sm:$0xff]  ;;  %v6402_v51 = vld [vmem:[#allocation7 + $0x88] sm:$0xff]  ;;  %4035 = vmatpush.msk.msrb.mxu1 %vm1193_vm15, %v7472_v47  ;;  %7814 = vst [vmem:[#allocation14_spill] sm:$0xff] %v6472_v59  ;;  %vm1185_vm15 = vcmp.eq.s32.totalorder %v5383_v58, %v5934_v45 }
 0x16f   :  { %v6384_v44 = vadd.f32 %v2264_v31, %v2224_v42  ;;  %v2185_v43 = vpop.f32.mrf.mxu1  ;;  %7796 = vst [vmem:[#allocation104_spill] sm:$0xff] %v6390_v0  ;;  %v7799_v31 = vld [vmem:[#allocation109_spill] sm:$0xff]  ;;  %4067 = vmatpush.msk.msrb.mxu3 %vm1257_vm14, %v7472_v47 }
 0x170   :  { %2471 = vmatmul.f32.gmra.mxu0 %v6390_v0  ;;  %vm1223_vm0 = vcmp.eq.s32.totalorder %v7799_v31, %v5934_v45  ;;  %v2186_v42 = vadd.f32 %v2185_v43, %v2144_v50  ;;  %7800 = vst [vmem:[#allocation112_spill] sm:$0xff] %v6402_v51  ;;  %v6406_v0 = vld [vmem:[#allocation7 + $0x98] sm:$0xff] }
 0x171   :  { %2553 = vmatmul.f32.gmra.mxu2 %v6393_v56  ;;  %7801 = vst [vmem:[#allocation117_spill] sm:$0xff] %v6406_v0  ;;  %v7802_v31 = vld [vmem:[#allocation110_spill] sm:$0xff]  ;;  %4068 = vmatpush.msk.msrb.mxu3 %vm1255_vm2, %v7472_v47 }
 0x172   :  { %2512 = vmatmul.f32.gmra.mxu1 %v6402_v51  ;;  %4052 = vmatpush.msk.msrb.mxu2 %vm1223_vm0, %v7472_v47  ;;  %vm1159_vm1 = vcmp.eq.s32.totalorder %v7802_v31, %v5934_v45  ;;  %v7804_v50 = vld [vmem:[#allocation114_spill] sm:$0xff]  ;;  %v7805_v51 = vld [vmem:[#allocation115_spill] sm:$0xff] }
 0x173   :  { %2594 = vmatmul.f32.gmra.mxu3 %v6406_v0  ;;  %4020 = vmatpush.msk.msrb.mxu0 %vm1159_vm1, %v7472_v47  ;;  %vm1191_vm3 = vcmp.eq.s32.totalorder %v7804_v50, %v5934_v45  ;;  %vm1221_vm4 = vcmp.eq.s32.totalorder %v7805_v51, %v5934_v45  ;;  %v6431_v51 = vld [vmem:[#allocation7 + $0xd0] sm:$0xff]  ;;  %v7809_v50 = vld [vmem:[#allocation119_spill] sm:$0xff] }
 0x174   :  { %v2226_v56 = vpop.f32.mrf.mxu2  ;;  %4036 = vmatpush.msk.msrb.mxu1 %vm1191_vm3, %v7472_v47  ;;  %4053 = vmatpush.msk.msrb.mxu2 %vm1221_vm4, %v7472_v47  ;;  %7808 = vst [vmem:[#allocation125_spill] sm:$0xff] %v6431_v51  ;;  %vm1189_vm7 = vcmp.eq.s32.totalorder %v7809_v50, %v5934_v45 }
 0x175   :  { %v2227_v43 = vadd.f32 %v2226_v56, %v2186_v42  ;;  %v2147_v0 = vpop.f32.mrf.mxu0  ;;  %v7806_v56 = vld [vmem:[#allocation118_spill] sm:$0xff]  ;;  %v6428_v42 = vld [vmem:[#allocation7 + $0xc0] sm:$0xff]  ;;  %4021 = vmatpush.msk.msrb.mxu0 %vm1157_vm5, %v7472_v47 }
 0x176   :  { %v2267_v31 = vpop.f32.mrf.mxu3  ;;  %vm1253_vm6 = vcmp.eq.s32.totalorder %v7806_v56, %v5934_v45  ;;  %7807 = vst [vmem:[#allocation120_spill] sm:$0xff] %v6428_v42  ;;  %v6440_v56 = vld [vmem:[#allocation7 + $0xc8] sm:$0xff]  ;;  %4037 = vmatpush.msk.msrb.mxu1 %vm1189_vm7, %v7472_v47 }
 0x177   :  { %v6422_v49 = vadd.f32 %v2267_v31, %v2227_v43  ;;  %v2188_v20 = vpop.f32.mrf.mxu1  ;;  %v7810_v31 = vld [vmem:[#allocation121_spill] sm:$0xff]  ;;  %4069 = vmatpush.msk.msrb.mxu3 %vm1253_vm6, %v7472_v47  ;;  %4022 = vmatpush.msk.msrb.mxu0 %vm1155_vm9, %v7472_v47 }
 0x178   :  { %2474 = vmatmul.f32.gmra.mxu0 %v6428_v42  ;;  %vm1219_vm8 = vcmp.eq.s32.totalorder %v7810_v31, %v5934_v45  ;;  %v2189_v43 = vadd.f32 %v2188_v20, %v2147_v0  ;;  %v6444_v42 = vld [vmem:[#allocation7 + $0xd8] sm:$0xff]  ;;  %v6453_v20 = vperm.slane %v5921_v63, 1  ;;  %4038 = vmatpush.msk.msrb.mxu1 %vm1187_vm11, %v7472_v47 }
 0x179   :  { %2556 = vmatmul.f32.gmra.mxu2 %v6431_v51  ;;  %7811 = vst [vmem:[#allocation127_spill] sm:$0xff] %v6444_v42  ;;  %4070 = vmatpush.msk.msrb.mxu3 %vm1251_vm10, %v7472_v47 }
 0x17a   :  { %2515 = vmatmul.f32.gmra.mxu1 %v6440_v56  ;;  %4054 = vmatpush.msk.msrb.mxu2 %vm1219_vm8, %v7472_v47  ;;  %vm1120_vm0 = vcmp.eq.s32.totalorder %v4418_v3, %v6453_v20  ;;  %vm1056_vm1 = vcmp.eq.s32.totalorder %v4415_v2, %v6453_v20  ;;  %vm1152_vm2 = vcmp.eq.s32.totalorder %v4430_v7, %v6453_v20 }
 0x17b   :  { %2597 = vmatmul.f32.gmra.mxu3 %v6444_v42  ;;  %4023 = vmatpush.msk.msrb.mxu0 %vm1153_vm13, %v7472_v47  ;;  %vm1088_vm3 = vcmp.eq.s32.totalorder %v4424_v5, %v6453_v20  ;;  %vm1118_vm4 = vcmp.eq.s32.totalorder %v4427_v6, %v6453_v20  ;;  %vm1054_vm5 = vcmp.eq.s32.totalorder %v4421_v4, %v6453_v20  ;;  %v6510_v5 = vld [vmem:[#allocation7 + $0x150] sm:$0xff]  ;;  %v6519_v6 = vld [vmem:[#allocation7 + $0x148] sm:$0xff] }
 0x17c   :  { %v2229_v51 = vpop.f32.mrf.mxu2  ;;  %4055 = vmatpush.msk.msrb.mxu2 %vm1217_vm12, %v7472_v47  ;;  %4039 = vmatpush.msk.msrb.mxu1 %vm1185_vm15, %v7472_v47  ;;  %vm1150_vm6 = vcmp.eq.s32.totalorder %v4444_v12, %v6453_v20  ;;  %vm1086_vm7 = vcmp.eq.s32.totalorder %v4438_v10, %v6453_v20  ;;  %vm1116_vm8 = vcmp.eq.s32.totalorder %v4441_v11, %v6453_v20  ;;  %v6523_v12 = vld [vmem:[#allocation7 + $0x158] sm:$0xff] }
 0x17d   :  { %v2230_v0 = vadd.f32 %v2229_v51, %v2189_v43  ;;  %v2150_v42 = vpop.f32.mrf.mxu0  ;;  %v7812_v51 = vld [vmem:[#allocation126_spill] sm:$0xff]  ;;  %v6469_v43 = vld [vmem:[#allocation7 + $0x100] sm:$0xff]  ;;  %4072 = vmatpush.msk.msra.mxu0 %vm1056_vm1, %v7472_v47  ;;  %vm1052_vm9 = vcmp.eq.s32.totalorder %v4433_v8, %v6453_v20  ;;  %vm1148_vm10 = vcmp.eq.s32.totalorder %v4459_v17, %v6453_v20  ;;  %vm1084_vm11 = vcmp.eq.s32.totalorder %v4453_v15, %v6453_v20 }
 0x17e   :  { %v2270_v57 = vpop.f32.mrf.mxu3  ;;  %vm1249_vm14 = vcmp.eq.s32.totalorder %v7812_v51, %v5934_v45  ;;  %7813 = vst [vmem:[#allocation128_spill] sm:$0xff] %v6469_v43  ;;  %4104 = vmatpush.msk.msra.mxu2 %vm1120_vm0, %v7472_v47  ;;  %4088 = vmatpush.msk.msra.mxu1 %vm1088_vm3, %v7472_v47  ;;  %vm1114_vm12 = vcmp.eq.s32.totalorder %v4456_v16, %v6453_v20  ;;  %v6548_v15 = vld [vmem:[#allocation7 + $0x190] sm:$0xff]  ;;  %v6557_v16 = vld [vmem:[#allocation7 + $0x188] sm:$0xff] }
 0x17f   :  { %v6463_v22 = vadd.f32 %v2270_v57, %v2230_v0  ;;  %v2191_v63 = vpop.f32.mrf.mxu1  ;;  %4071 = vmatpush.msk.msrb.mxu3 %vm1249_vm14, %v7472_v47  ;;  %v6481_v0 = vld [vmem:[#allocation7 + $0x108] sm:$0xff]  ;;  %4073 = vmatpush.msk.msra.mxu0 %vm1054_vm5, %v7472_v47  ;;  %vm1050_vm13 = vcmp.eq.s32.totalorder %v4447_v13, %v6453_v20  ;;  %vm1146_vm14 = vcmp.eq.s32.totalorder %v4471_v21, %v6453_v20  ;;  %v6561_v21 = vld [vmem:[#allocation7 + $0x198] sm:$0xff] }
 0x180   :  { %2477 = vmatmul.f32.gmra.mxu0 %v6469_v43  ;;  %v2192_v57 = vadd.f32 %v2191_v63, %v2150_v42  ;;  %v6485_v43 = vld [vmem:[#allocation7 + $0x118] sm:$0xff]  ;;  %4105 = vmatpush.msk.msra.mxu2 %vm1118_vm4, %v7472_v47  ;;  %vm1082_vm15 = vcmp.eq.s32.totalorder %v4465_v19, %v6453_v20  ;;  %vm1112_vm0 = vcmp.eq.s32.totalorder %v7670_v55, %v6453_v20 }
 0x181   :  { %2559 = vmatmul.f32.gmra.mxu2 %v6472_v59  ;;  %4120 = vmatpush.msk.msra.mxu3 %vm1152_vm2, %v7472_v47  ;;  %vm1048_vm1 = vcmp.eq.s32.totalorder %v7673_v9, %v6453_v20  ;;  %vm1144_vm2 = vcmp.eq.s32.totalorder %v4519_v26, %v6453_v20  ;;  %vm1080_vm3 = vcmp.eq.s32.totalorder %v4501_v24, %v6453_v20  ;;  %v6586_v24 = vld [vmem:[#allocation7 + $0x1d0] sm:$0xff] }
 0x182   :  { %2518 = vmatmul.f32.gmra.mxu1 %v6481_v0  ;;  %4106 = vmatpush.msk.msra.mxu2 %vm1116_vm8, %v7472_v47  ;;  %vm1110_vm4 = vcmp.eq.s32.totalorder %v4516_v25, %v6453_v20  ;;  %vm1046_vm5 = vcmp.eq.s32.totalorder %v4490_v23, %v6453_v20  ;;  %vm1108_vm8 = vcmp.eq.s32.totalorder %v4557_v29, %v6453_v20  ;;  %v6595_v25 = vld [vmem:[#allocation7 + $0x1c8] sm:$0xff] }
 0x183   :  { %2600 = vmatmul.f32.gmra.mxu3 %v6485_v43  ;;  %4089 = vmatpush.msk.msra.mxu1 %vm1086_vm7, %v7472_v47  ;;  %vm1078_vm7 = vcmp.eq.s32.totalorder %v4544_v28, %v6453_v20 }
 0x184   :  { %v2232_v59 = vpop.f32.mrf.mxu2  ;;  %4121 = vmatpush.msk.msra.mxu3 %vm1150_vm6, %v7472_v47  ;;  %4074 = vmatpush.msk.msra.mxu0 %vm1052_vm9, %v7472_v47  ;;  %vm1142_vm6 = vcmp.eq.s32.totalorder %v4560_v30, %v6453_v20  ;;  %v6599_v30 = vld [vmem:[#allocation7 + $0x1d8] sm:$0xff]  ;;  %vm1044_vm9 = vcmp.eq.s32.totalorder %v4533_v27, %v6453_v20 }
 0x185   :  { %v2233_v3 = vadd.f32 %v2232_v59, %v2192_v57  ;;  %v2153_v45 = vpop.f32.mrf.mxu0  ;;  %v6507_v59 = vld [vmem:[#allocation7 + $0x140] sm:$0xff]  ;;  %4090 = vmatpush.msk.msra.mxu1 %vm1084_vm11, %v7472_v47  ;;  %4107 = vmatpush.msk.msra.mxu2 %vm1114_vm12, %v7472_v47  ;;  %vm1076_vm11 = vcmp.eq.s32.totalorder %v7676_v54, %v6453_v20  ;;  %vm1106_vm12 = vcmp.eq.s32.totalorder %v4573_v33, %v6453_v20  ;;  %v6625_v33 = vld [vmem:[#allocation7 + $0x30] sm:$0xff] }
 0x186   :  { %v2273_v2 = vpop.f32.mrf.mxu3  ;;  %4122 = vmatpush.msk.msra.mxu3 %vm1148_vm10, %v7472_v47  ;;  %4075 = vmatpush.msk.msra.mxu0 %vm1050_vm13, %v7472_v47  ;;  %vm1140_vm10 = vcmp.eq.s32.totalorder %v4576_v34, %v6453_v20  ;;  %vm1042_vm13 = vcmp.eq.s32.totalorder %v7677_v62, %v6453_v20  ;;  %v6622_v54 = vld [vmem:[#allocation7 + $0x20] sm:$0xff] }
 0x187   :  { %v6501_v42 = vadd.f32 %v2273_v2, %v2233_v3  ;;  %v2194_v7 = vpop.f32.mrf.mxu1  ;;  %v6545_v3 = vld [vmem:[#allocation7 + $0x180] sm:$0xff]  ;;  %4108 = vmatpush.msk.msra.mxu2 %vm1112_vm0, %v7472_v47  ;;  %4091 = vmatpush.msk.msra.mxu1 %vm1082_vm15, %v7472_v47  ;;  %vm1074_vm15 = vcmp.eq.s32.totalorder %v4610_v36, %v6453_v20  ;;  %vm1104_vm0 = vcmp.eq.s32.totalorder %v4623_v37, %v6453_v20  ;;  %v7815_v36 = vld [vmem:[#allocation17_spill] sm:$0xff] }
 0x188   :  { %2480 = vmatmul.f32.gmra.mxu0 %v6507_v59  ;;  %v2195_v4 = vadd.f32 %v2194_v7, %v2153_v45  ;;  %4123 = vmatpush.msk.msra.mxu3 %vm1146_vm14, %v7472_v47  ;;  %v6583_v7 = vld [vmem:[#allocation7 + $0x1c0] sm:$0xff]  ;;  %vm1138_vm14 = vcmp.eq.s32.totalorder %v4626_v38, %v6453_v20  ;;  %v6634_v38 = vld [vmem:[#allocation7 + $0x28] sm:$0xff] }
 0x189   :  { %2562 = vmatmul.f32.gmra.mxu2 %v6510_v5  ;;  %4076 = vmatpush.msk.msra.mxu0 %vm1048_vm1, %v7472_v47  ;;  %vm1040_vm1 = vcmp.eq.s32.totalorder %v7815_v36, %v6453_v20  ;;  %v7816_v37 = vld [vmem:[#allocation21_spill] sm:$0xff] }
 0x18a   :  { %2521 = vmatmul.f32.gmra.mxu1 %v6519_v6  ;;  %4124 = vmatpush.msk.msra.mxu3 %vm1144_vm2, %v7472_v47  ;;  %vm1136_vm2 = vcmp.eq.s32.totalorder %v7816_v37, %v6453_v20  ;;  %v7825_v37 = vld [vmem:[#allocation27_spill] sm:$0xff] }
 0x18b   :  { %2603 = vmatmul.f32.gmra.mxu3 %v6523_v12  ;;  %4092 = vmatpush.msk.msra.mxu1 %vm1080_vm3, %v7472_v47 }
 0x18c   :  { %v2235_v63 = vpop.f32.mrf.mxu2  ;;  %4109 = vmatpush.msk.msra.mxu2 %vm1110_vm4, %v7472_v47  ;;  %4077 = vmatpush.msk.msra.mxu0 %vm1046_vm5, %v7472_v47  ;;  %vm1038_vm5 = vcmp.eq.s32.totalorder %v7682_v18, %v6453_v20 }
 0x18d   :  { %v2236_v10 = vadd.f32 %v2235_v63, %v2195_v4  ;;  %v2156_v11 = vpop.f32.mrf.mxu0  ;;  %4125 = vmatpush.msk.msra.mxu3 %vm1142_vm6, %v7472_v47  ;;  %4093 = vmatpush.msk.msra.mxu1 %vm1078_vm7, %v7472_v47 }
 0x18e   :  { %v2276_v8 = vpop.f32.mrf.mxu3  ;;  %4110 = vmatpush.msk.msra.mxu2 %vm1108_vm8, %v7472_v47  ;;  %4078 = vmatpush.msk.msra.mxu0 %vm1044_vm9, %v7472_v47 }
 0x18f   :  { %v6539_v57 = vadd.f32 %v2276_v8, %v2236_v10  ;;  %v2197_v17 = vpop.f32.mrf.mxu1  ;;  %4126 = vmatpush.msk.msra.mxu3 %vm1140_vm10, %v7472_v47  ;;  %4094 = vmatpush.msk.msra.mxu1 %vm1076_vm11, %v7472_v47  ;;  %vm1068_vm11 = vcmp.eq.s32.totalorder %v7825_v37, %v6453_v20 }
 0x190   :  { %2483 = vmatmul.f32.gmra.mxu0 %v6545_v3  ;;  %v2198_v13 = vadd.f32 %v2197_v17, %v2156_v11  ;;  %4111 = vmatpush.msk.msra.mxu2 %vm1106_vm12, %v7472_v47  ;;  %v7817_v17 = vld [vmem:[#allocation19_spill] sm:$0xff] }
 0x191   :  { %2565 = vmatmul.f32.gmra.mxu2 %v6548_v15  ;;  %4079 = vmatpush.msk.msra.mxu0 %vm1042_vm13, %v7472_v47  ;;  %vm1072_vm3 = vcmp.eq.s32.totalorder %v7817_v17, %v6453_v20  ;;  %vm1034_vm13 = vcmp.eq.s32.totalorder %v7694_v40, %v6453_v20 }
 0x192   :  { %2524 = vmatmul.f32.gmra.mxu1 %v6557_v16  ;;  %4127 = vmatpush.msk.msra.mxu3 %vm1138_vm14, %v7472_v47 }
 0x193   :  { %2606 = vmatmul.f32.gmra.mxu3 %v6561_v21  ;;  %4112 = vmatpush.msk.msra.mxu2 %vm1104_vm0, %v7472_v47 }
 0x194   :  { %v2238_v45 = vpop.f32.mrf.mxu2  ;;  %4095 = vmatpush.msk.msra.mxu1 %vm1074_vm15, %v7472_v47  ;;  %4080 = vmatpush.msk.msra.mxu0 %vm1040_vm1, %v7472_v47 }
 0x195   :  { %v2239_v19 = vadd.f32 %v2238_v45, %v2198_v13  ;;  %v2159_v55 = vpop.f32.mrf.mxu0  ;;  %4128 = vmatpush.msk.msra.mxu3 %vm1136_vm2, %v7472_v47  ;;  %v7818_v13 = vld [vmem:[#allocation20_spill] sm:$0xff] }
 0x196   :  { %v2279_v9 = vpop.f32.mrf.mxu3  ;;  %vm1102_vm4 = vcmp.eq.s32.totalorder %v7818_v13, %v6453_v20  ;;  %4096 = vmatpush.msk.msra.mxu1 %vm1072_vm3, %v7472_v47  ;;  %4081 = vmatpush.msk.msra.mxu0 %vm1038_vm5, %v7472_v47  ;;  %vm1030_vm5 = vcmp.eq.s32.totalorder %v7707_v14, %v6453_v20 }
 0x197   :  { %v6577_v2 = vadd.f32 %v2279_v9, %v2239_v19  ;;  %v2200_v26 = vpop.f32.mrf.mxu1  ;;  %4113 = vmatpush.msk.msra.mxu2 %vm1102_vm4, %v7472_v47 }
 0x198   :  { %2486 = vmatmul.f32.gmra.mxu0 %v6583_v7  ;;  %v2201_v23 = vadd.f32 %v2200_v26, %v2159_v55 }
 0x199   :  { %2568 = vmatmul.f32.gmra.mxu2 %v6586_v24 }
 0x19a   :  { %2527 = vmatmul.f32.gmra.mxu1 %v6595_v25 }
 0x19b   :  { %2609 = vmatmul.f32.gmra.mxu3 %v6599_v30 }
 0x19c   :  { %v2241_v4 = vpop.f32.mrf.mxu2 }
 0x19d   :  { %v2242_v28 = vadd.f32 %v2241_v4, %v2201_v23  ;;  %v2302_v29 = vpop.f32.mrf.mxu0  ;;  %v7820_v23 = vld [vmem:[#allocation25_spill] sm:$0xff]  ;;  %v6661_v4 = vld [vmem:[#allocation7 + $0x60] sm:$0xff] }
 0x19e   :  { %v2282_v27 = vpop.f32.mrf.mxu3  ;;  %v2303_v63 = vadd.f32 %v2302_v29, %v6346_v61  ;;  %v6638_v61 = vld [vmem:[#allocation7 + $0x38] sm:$0xff]  ;;  %vm1134_vm6 = vcmp.eq.s32.totalorder %v7820_v23, %v6453_v20  ;;  %v7822_v29 = vld [vmem:[#allocation24_spill] sm:$0xff] }
 0x19f   :  { %v6616_v34 = vadd.f32 %v2282_v27, %v2242_v28  ;;  %v2343_v10 = vpop.f32.mrf.mxu1  ;;  %v6664_v28 = vld [vmem:[#allocation7 + $0x70] sm:$0xff]  ;;  %vm1100_vm8 = vcmp.eq.s32.totalorder %v7822_v29, %v6453_v20  ;;  %4129 = vmatpush.msk.msra.mxu3 %vm1134_vm6, %v7472_v47  ;;  %v6673_v27 = vld [vmem:[#allocation7 + $0x68] sm:$0xff]  ;;  %v6700_v23 = vld [vmem:[#allocation7 + $0xa0] sm:$0xff] }
 0x1a0   :  { %2629 = vmatmul.f32.vlgmr.msrb.gmra.mxu0 %v6622_v54  ;;  %v2344_v62 = vadd.f32 %v2343_v10, %v2303_v63  ;;  %4114 = vmatpush.msk.msra.mxu2 %vm1100_vm8, %v7472_v47  ;;  %v6677_v63 = vld [vmem:[#allocation7 + $0x78] sm:$0xff]  ;;  %v7830_v29 = vld [vmem:[#allocation32_spill] sm:$0xff] }
 0x1a1   :  { %2711 = vmatmul.f32.vlgmr.msrb.gmra.mxu2 %v6625_v33  ;;  %vm1096_vm0 = vcmp.eq.s32.totalorder %v7830_v29, %v6453_v20  ;;  %v7836_v29 = vld [vmem:[#allocation41_spill] sm:$0xff] }
 0x1a2   :  { %2670 = vmatmul.f32.vlgmr.msrb.gmra.mxu1 %v6634_v38  ;;  %vm1126_vm6 = vcmp.eq.s32.totalorder %v7836_v29, %v6453_v20 }
 0x1a3   :  { %2752 = vmatmul.f32.vlgmr.msrb.gmra.mxu3 %v6638_v61 }
 0x1a4   :  { %v2384_v11 = vpop.f32.mrf.mxu2 }
 0x1a5   :  { %v2385_v8 = vadd.f32 %v2384_v11, %v2344_v62  ;;  %v2305_v45 = vpop.f32.mrf.mxu0  ;;  %v7823_v62 = vld [vmem:[#allocation22_spill] sm:$0xff]  ;;  %v7824_v11 = vld [vmem:[#allocation29_spill] sm:$0xff] }
 0x1a6   :  { %v2306_v19 = vadd.f32 %v2305_v45, %v6384_v44  ;;  %v2425_v55 = vpop.f32.mrf.mxu3  ;;  %v7821_v44 = vld [vmem:[#allocation23_spill] sm:$0xff]  ;;  %vm1036_vm9 = vcmp.eq.s32.totalorder %v7823_v62, %v6453_v20  ;;  %vm1132_vm10 = vcmp.eq.s32.totalorder %v7824_v11, %v6453_v20  ;;  %v7831_v11 = vld [vmem:[#allocation30_spill] sm:$0xff] }
 0x1a7   :  { %v6655_v9 = vadd.f32 %v2425_v55, %v2385_v8  ;;  %v2346_v26 = vpop.f32.mrf.mxu1  ;;  %vm1070_vm7 = vcmp.eq.s32.totalorder %v7821_v44, %v6453_v20  ;;  %4082 = vmatpush.msk.msra.mxu0 %vm1036_vm9, %v7472_v47  ;;  %4130 = vmatpush.msk.msra.mxu3 %vm1132_vm10, %v7472_v47  ;;  %v7826_v8 = vld [vmem:[#allocation28_spill] sm:$0xff]  ;;  %v6703_v44 = vld [vmem:[#allocation7 + $0xb0] sm:$0xff]  ;;  %vm1032_vm1 = vcmp.eq.s32.totalorder %v7831_v11, %v6453_v20 }
 0x1a8   :  { %2632 = vmatmul.f32.gmra.mxu0 %v6661_v4  ;;  %v2347_v18 = vadd.f32 %v2346_v26, %v2306_v19  ;;  %4097 = vmatpush.msk.msra.mxu1 %vm1070_vm7, %v7472_v47  ;;  %vm1098_vm12 = vcmp.eq.s32.totalorder %v7826_v8, %v6453_v20  ;;  %v7828_v26 = vld [vmem:[#allocation33_spill] sm:$0xff]  ;;  %v7833_v8 = vld [vmem:[#allocation35_spill] sm:$0xff]  ;;  %v7838_v11 = vld [vmem:[#allocation40_spill] sm:$0xff] }
 0x1a9   :  { %7819 = vst [vmem:[#allocation129_spill] sm:$0xff] %v6655_v9  ;;  %2714 = vmatmul.f32.gmra.mxu2 %v6664_v28  ;;  %vm1130_vm14 = vcmp.eq.s32.totalorder %v7828_v26, %v6453_v20  ;;  %4083 = vmatpush.msk.msra.mxu0 %vm1034_vm13, %v7472_v47  ;;  %vm1064_vm3 = vcmp.eq.s32.totalorder %v7833_v8, %v6453_v20 }
 0x1aa   :  { %2673 = vmatmul.f32.gmra.mxu1 %v6673_v27  ;;  %4115 = vmatpush.msk.msra.mxu2 %vm1098_vm12, %v7472_v47  ;;  %vm1092_vm8 = vcmp.eq.s32.totalorder %v7838_v11, %v6453_v20  ;;  %vm1026_vm13 = vcmp.eq.s32.totalorder %v7720_v53, %v6453_v20 }
 0x1ab   :  { %2755 = vmatmul.f32.gmra.mxu3 %v6677_v63  ;;  %4098 = vmatpush.msk.msra.mxu1 %vm1068_vm11, %v7472_v47 }
 0x1ac   :  { %v2387_v10 = vpop.f32.mrf.mxu2  ;;  %4131 = vmatpush.msk.msra.mxu3 %vm1130_vm14, %v7472_v47  ;;  %4116 = vmatpush.msk.msra.mxu2 %vm1096_vm0, %v7472_v47 }
 0x1ad   :  { %v2388_v36 = vadd.f32 %v2387_v10, %v2347_v18  ;;  %v2308_v17 = vpop.f32.mrf.mxu0  ;;  %v6712_v18 = vld [vmem:[#allocation7 + $0xa8] sm:$0xff]  ;;  %v6716_v10 = vld [vmem:[#allocation7 + $0xb8] sm:$0xff]  ;;  %4084 = vmatpush.msk.msra.mxu0 %vm1032_vm1, %v7472_v47 }
 0x1ae   :  { %v2309_v13 = vadd.f32 %v2308_v17, %v6422_v49  ;;  %v2428_v45 = vpop.f32.mrf.mxu3  ;;  %v7829_v49 = vld [vmem:[#allocation31_spill] sm:$0xff]  ;;  %v7834_v17 = vld [vmem:[#allocation36_spill] sm:$0xff] }
 0x1af   :  { %v6694_v19 = vadd.f32 %v2428_v45, %v2388_v36  ;;  %v2349_v55 = vpop.f32.mrf.mxu1  ;;  %vm1066_vm15 = vcmp.eq.s32.totalorder %v7829_v49, %v6453_v20  ;;  %v7832_v36 = vld [vmem:[#allocation37_spill] sm:$0xff]  ;;  %vm1094_vm4 = vcmp.eq.s32.totalorder %v7834_v17, %v6453_v20  ;;  %4085 = vmatpush.msk.msra.mxu0 %vm1030_vm5, %v7472_v47  ;;  %v7839_v17 = vld [vmem:[#allocation38_spill] sm:$0xff]  ;;  %vm1182_vm5 = vcmp.eq.s32.totalorder %v7733_v32, %v6453_v20 }
 0x1b0   :  { %2635 = vmatmul.f32.gmra.mxu0 %v6700_v23  ;;  %v2350_v40 = vadd.f32 %v2349_v55, %v2309_v13  ;;  %4099 = vmatpush.msk.msra.mxu1 %vm1066_vm15, %v7472_v47  ;;  %vm1128_vm2 = vcmp.eq.s32.totalorder %v7832_v36, %v6453_v20  ;;  %v6751_v36 = vld [vmem:[#allocation7 + $0xe8] sm:$0xff]  ;;  %vm1028_vm9 = vcmp.eq.s32.totalorder %v7839_v17, %v6453_v20 }
 0x1b1   :  { %7827 = vst [vmem:[#allocation130_spill] sm:$0xff] %v6694_v19  ;;  %2717 = vmatmul.f32.gmra.mxu2 %v6703_v44  ;;  %4132 = vmatpush.msk.msra.mxu3 %vm1128_vm2, %v7472_v47 }
 0x1b2   :  { %2676 = vmatmul.f32.gmra.mxu1 %v6712_v18  ;;  %4117 = vmatpush.msk.msra.mxu2 %vm1094_vm4, %v7472_v47 }
 0x1b3   :  { %2758 = vmatmul.f32.gmra.mxu3 %v6716_v10  ;;  %4100 = vmatpush.msk.msra.mxu1 %vm1064_vm3, %v7472_v47 }
 0x1b4   :  { %v2390_v62 = vpop.f32.mrf.mxu2  ;;  %4133 = vmatpush.msk.msra.mxu3 %vm1126_vm6, %v7472_v47  ;;  %4118 = vmatpush.msk.msra.mxu2 %vm1092_vm8, %v7472_v47 }
 0x1b5   :  { %v2391_v37 = vadd.f32 %v2390_v62, %v2350_v40  ;;  %v2311_v13 = vpop.f32.mrf.mxu0  ;;  %v6739_v40 = vld [vmem:[#allocation7 + $0xe0] sm:$0xff]  ;;  %v6742_v62 = vld [vmem:[#allocation7 + $0xf0] sm:$0xff]  ;;  %4086 = vmatpush.msk.msra.mxu0 %vm1028_vm9, %v7472_v47 }
 0x1b6   :  { %v2312_v45 = vadd.f32 %v2311_v13, %v6463_v22  ;;  %v2431_v55 = vpop.f32.mrf.mxu3  ;;  %v7837_v22 = vld [vmem:[#allocation39_spill] sm:$0xff]  ;;  %v7840_v13 = vld [vmem:[#allocation44_spill] sm:$0xff] }
 0x1b7   :  { %v6733_v26 = vadd.f32 %v2431_v55, %v2391_v37  ;;  %v2352_v49 = vpop.f32.mrf.mxu1  ;;  %vm1062_vm7 = vcmp.eq.s32.totalorder %v7837_v22, %v6453_v20  ;;  %v6755_v37 = vld [vmem:[#allocation7 + $0xf8] sm:$0xff]  ;;  %vm1124_vm10 = vcmp.eq.s32.totalorder %v7840_v13, %v6453_v20  ;;  %v6778_v13 = vld [vmem:[#allocation7 + $0x120] sm:$0xff]  ;;  %4087 = vmatpush.msk.msra.mxu0 %vm1026_vm13, %v7472_v47  ;;  %vm1178_vm13 = vcmp.eq.s32.totalorder %v7746_v1, %v6453_v20 }
 0x1b8   :  { %2638 = vmatmul.f32.gmra.mxu0 %v6739_v40  ;;  %v2353_v14 = vadd.f32 %v2352_v49, %v2312_v45  ;;  %4101 = vmatpush.msk.msra.mxu1 %vm1062_vm7, %v7472_v47  ;;  %v7841_v55 = vld [vmem:[#allocation42_spill] sm:$0xff]  ;;  %v7842_v49 = vld [vmem:[#allocation43_spill] sm:$0xff] }
 0x1b9   :  { %7835 = vst [vmem:[#allocation13_spill] sm:$0xff] %v6733_v26  ;;  %2720 = vmatmul.f32.gmra.mxu2 %v6742_v62  ;;  %4134 = vmatpush.msk.msra.mxu3 %vm1124_vm10, %v7472_v47  ;;  %vm1060_vm11 = vcmp.eq.s32.totalorder %v7841_v55, %v6453_v20  ;;  %vm1090_vm12 = vcmp.eq.s32.totalorder %v7842_v49, %v6453_v20  ;;  %v6781_v55 = vld [vmem:[#allocation7 + $0x130] sm:$0xff]  ;;  %v6790_v49 = vld [vmem:[#allocation7 + $0x128] sm:$0xff] }
 0x1ba   :  { %2679 = vmatmul.f32.gmra.mxu1 %v6751_v36  ;;  %4119 = vmatpush.msk.msra.mxu2 %vm1090_vm12, %v7472_v47 }
 0x1bb   :  { %2761 = vmatmul.f32.gmra.mxu3 %v6755_v37  ;;  %4102 = vmatpush.msk.msra.mxu1 %vm1060_vm11, %v7472_v47 }
 0x1bc   :  { %v2393_v8 = vpop.f32.mrf.mxu2 }
 0x1bd   :  { %v2394_v45 = vadd.f32 %v2393_v8, %v2353_v14  ;;  %v2314_v29 = vpop.f32.mrf.mxu0  ;;  %v7844_v8 = vld [vmem:[#allocation47_spill] sm:$0xff] }
 0x1be   :  { %v2315_v22 = vadd.f32 %v2314_v29, %v6501_v42  ;;  %v2434_v11 = vpop.f32.mrf.mxu3  ;;  %vm1122_vm14 = vcmp.eq.s32.totalorder %v7844_v8, %v6453_v20  ;;  %v7845_v42 = vld [vmem:[#allocation46_spill] sm:$0xff]  ;;  %v7847_v8 = vld [vmem:[#allocation48_spill] sm:$0xff] }
 0x1bf   :  { %v6772_v17 = vadd.f32 %v2434_v11, %v2394_v45  ;;  %v2355_v14 = vpop.f32.mrf.mxu1  ;;  %vm1058_vm15 = vcmp.eq.s32.totalorder %v7845_v42, %v6453_v20  ;;  %v7846_v45 = vld [vmem:[#allocation45_spill] sm:$0xff]  ;;  %4135 = vmatpush.msk.msra.mxu3 %vm1122_vm14, %v7472_v47  ;;  %v6794_v29 = vld [vmem:[#allocation7 + $0x138] sm:$0xff]  ;;  %vm1184_vm1 = vcmp.eq.s32.totalorder %v7847_v8, %v6453_v20 }
 0x1c0   :  { %2641 = vmatmul.f32.gmra.mxu0 %v6778_v13  ;;  %vm1248_vm0 = vcmp.eq.s32.totalorder %v7846_v45, %v6453_v20  ;;  %v2356_v53 = vadd.f32 %v2355_v14, %v2315_v22  ;;  %4103 = vmatpush.msk.msra.mxu1 %vm1058_vm15, %v7472_v47  ;;  %v7848_v42 = vld [vmem:[#allocation49_spill] sm:$0xff]  ;;  %v7849_v14 = vld [vmem:[#allocation50_spill] sm:$0xff]  ;;  %v7850_v45 = vld [vmem:[#allocation51_spill] sm:$0xff] }
 0x1c1   :  { %7843 = vst [vmem:[#allocation131_spill] sm:$0xff] %v6772_v17  ;;  %2723 = vmatmul.f32.gmra.mxu2 %v6781_v55  ;;  %vm1280_vm2 = vcmp.eq.s32.totalorder %v7848_v42, %v6453_v20  ;;  %4136 = vmatpush.msk.msrb.mxu0 %vm1184_vm1, %v7472_v47  ;;  %vm1216_vm3 = vcmp.eq.s32.totalorder %v7849_v14, %v6453_v20  ;;  %v6817_v14 = vld [vmem:[#allocation7 + $0x160] sm:$0xff] }
 0x1c2   :  { %2682 = vmatmul.f32.gmra.mxu1 %v6790_v49  ;;  %4168 = vmatpush.msk.msrb.mxu2 %vm1248_vm0, %v7472_v47  ;;  %vm1246_vm4 = vcmp.eq.s32.totalorder %v7850_v45, %v6453_v20  ;;  %v6820_v45 = vld [vmem:[#allocation7 + $0x170] sm:$0xff] }
 0x1c3   :  { %2764 = vmatmul.f32.gmra.mxu3 %v6794_v29  ;;  %4152 = vmatpush.msk.msrb.mxu1 %vm1216_vm3, %v7472_v47 }
 0x1c4   :  { %v2396_v11 = vpop.f32.mrf.mxu2  ;;  %4184 = vmatpush.msk.msrb.mxu3 %vm1280_vm2, %v7472_v47  ;;  %4169 = vmatpush.msk.msrb.mxu2 %vm1246_vm4, %v7472_v47 }
 0x1c5   :  { %v2397_v22 = vadd.f32 %v2396_v11, %v2356_v53  ;;  %v2317_v17 = vpop.f32.mrf.mxu0  ;;  %v7852_v11 = vld [vmem:[#allocation54_spill] sm:$0xff]  ;;  %4137 = vmatpush.msk.msrb.mxu0 %vm1182_vm5, %v7472_v47  ;;  %vm1174_vm5 = vcmp.eq.s32.totalorder %v7759_v39, %v6453_v20 }
 0x1c6   :  { %v2318_v8 = vadd.f32 %v2317_v17, %v6539_v57  ;;  %v2437_v26 = vpop.f32.mrf.mxu3  ;;  %vm1278_vm6 = vcmp.eq.s32.totalorder %v7852_v11, %v6453_v20  ;;  %v7853_v57 = vld [vmem:[#allocation55_spill] sm:$0xff]  ;;  %v6829_v17 = vld [vmem:[#allocation7 + $0x168] sm:$0xff] }
 0x1c7   :  { %v6811_v42 = vadd.f32 %v2437_v26, %v2397_v22  ;;  %v2358_v53 = vpop.f32.mrf.mxu1  ;;  %vm1214_vm7 = vcmp.eq.s32.totalorder %v7853_v57, %v6453_v20  ;;  %v7854_v26 = vld [vmem:[#allocation57_spill] sm:$0xff]  ;;  %4185 = vmatpush.msk.msrb.mxu3 %vm1278_vm6, %v7472_v47  ;;  %v6833_v22 = vld [vmem:[#allocation7 + $0x178] sm:$0xff]  ;;  %vm1270_vm6 = vcmp.eq.s32.totalorder %v7760_v46, %v6453_v20 }
 0x1c8   :  { %2644 = vmatmul.f32.gmra.mxu0 %v6817_v14  ;;  %vm1244_vm8 = vcmp.eq.s32.totalorder %v7854_v26, %v6453_v20  ;;  %v2359_v32 = vadd.f32 %v2358_v53, %v2318_v8  ;;  %4153 = vmatpush.msk.msrb.mxu1 %vm1214_vm7, %v7472_v47  ;;  %v7855_v57 = vld [vmem:[#allocation58_spill] sm:$0xff]  ;;  %v7856_v26 = vld [vmem:[#allocation59_spill] sm:$0xff]  ;;  %v7857_v53 = vld [vmem:[#allocation60_spill] sm:$0xff] }
 0x1c9   :  { %7851 = vst [vmem:[#allocation132_spill] sm:$0xff] %v6811_v42  ;;  %2726 = vmatmul.f32.gmra.mxu2 %v6820_v45  ;;  %vm1180_vm9 = vcmp.eq.s32.totalorder %v7855_v57, %v6453_v20  ;;  %vm1276_vm10 = vcmp.eq.s32.totalorder %v7856_v26, %v6453_v20  ;;  %vm1212_vm11 = vcmp.eq.s32.totalorder %v7857_v53, %v6453_v20  ;;  %v7858_v42 = vld [vmem:[#allocation61_spill] sm:$0xff]  ;;  %v6856_v53 = vld [vmem:[#allocation7 + $0x1a0] sm:$0xff] }
 0x1ca   :  { %2685 = vmatmul.f32.gmra.mxu1 %v6829_v17  ;;  %4170 = vmatpush.msk.msrb.mxu2 %vm1244_vm8, %v7472_v47  ;;  %vm1242_vm12 = vcmp.eq.s32.totalorder %v7858_v42, %v6453_v20  ;;  %v6859_v42 = vld [vmem:[#allocation7 + $0x1b0] sm:$0xff]  ;;  %v6907_v46 = vld [vmem:[#allocation7 + $0x1e8] sm:$0xff] }
 0x1cb   :  { %2767 = vmatmul.f32.gmra.mxu3 %v6833_v22  ;;  %4138 = vmatpush.msk.msrb.mxu0 %vm1180_vm9, %v7472_v47  ;;  %7872 = vst [vmem:[#allocation134_spill] sm:$0xff] %v6907_v46 }
 0x1cc   :  { %v2399_v11 = vpop.f32.mrf.mxu2  ;;  %4186 = vmatpush.msk.msrb.mxu3 %vm1276_vm10, %v7472_v47  ;;  %4154 = vmatpush.msk.msrb.mxu1 %vm1212_vm11, %v7472_v47 }
 0x1cd   :  { %v2400_v8 = vadd.f32 %v2399_v11, %v2359_v32  ;;  %v2320_v19 = vpop.f32.mrf.mxu0  ;;  %4171 = vmatpush.msk.msrb.mxu2 %vm1242_vm12, %v7472_v47  ;;  %v7860_v11 = vld [vmem:[#allocation65_spill] sm:$0xff]  ;;  %4139 = vmatpush.msk.msrb.mxu0 %vm1178_vm13, %v7472_v47  ;;  %vm1170_vm13 = vcmp.eq.s32.totalorder %v7772_v41, %v6453_v20  ;;  %v7882_v41 = vld [vmem:[#allocation88_spill] sm:$0xff] }
 0x1ce   :  { %v2321_v57 = vadd.f32 %v2320_v19, %v6577_v2  ;;  %v2440_v9 = vpop.f32.mrf.mxu3  ;;  %vm1274_vm14 = vcmp.eq.s32.totalorder %v7860_v11, %v6453_v20  ;;  %v7861_v2 = vld [vmem:[#allocation66_spill] sm:$0xff]  ;;  %v6868_v19 = vld [vmem:[#allocation7 + $0x1a8] sm:$0xff] }
 0x1cf   :  { %v6850_v26 = vadd.f32 %v2440_v9, %v2400_v8  ;;  %v2361_v32 = vpop.f32.mrf.mxu1  ;;  %vm1210_vm15 = vcmp.eq.s32.totalorder %v7861_v2, %v6453_v20  ;;  %v7862_v9 = vld [vmem:[#allocation67_spill] sm:$0xff]  ;;  %4187 = vmatpush.msk.msrb.mxu3 %vm1274_vm14, %v7472_v47  ;;  %7863 = vst [vmem:[#allocation15_spill] sm:$0xff] %v6868_v19  ;;  %v7865_v2 = vld [vmem:[#allocation68_spill] sm:$0xff]  ;;  %vm1266_vm14 = vcmp.eq.s32.totalorder %v7773_v48, %v6453_v20 }
 0x1d0   :  { %2647 = vmatmul.f32.gmra.mxu0 %v6856_v53  ;;  %vm1240_vm0 = vcmp.eq.s32.totalorder %v7862_v9, %v6453_v20  ;;  %v2362_v1 = vadd.f32 %v2361_v32, %v2321_v57  ;;  %v6872_v8 = vld [vmem:[#allocation7 + $0x1b8] sm:$0xff]  ;;  %4155 = vmatpush.msk.msrb.mxu1 %vm1210_vm15, %v7472_v47  ;;  %vm1176_vm1 = vcmp.eq.s32.totalorder %v7865_v2, %v6453_v20 }
 0x1d1   :  { %7859 = vst [vmem:[#allocation16_spill] sm:$0xff] %v6850_v26  ;;  %2729 = vmatmul.f32.gmra.mxu2 %v6859_v42  ;;  %v7866_v9 = vld [vmem:[#allocation70_spill] sm:$0xff]  ;;  %4140 = vmatpush.msk.msrb.mxu0 %vm1176_vm1, %v7472_v47  ;;  %v7867_v32 = vld [vmem:[#allocation71_spill] sm:$0xff]  ;;  %v7868_v26 = vld [vmem:[#allocation73_spill] sm:$0xff] }
 0x1d2   :  { %2688 = vmatmul.f32.gmra.mxu1 %v6868_v19  ;;  %4172 = vmatpush.msk.msrb.mxu2 %vm1240_vm0, %v7472_v47  ;;  %7864 = vst [vmem:[#allocation133_spill] sm:$0xff] %v6872_v8  ;;  %vm1272_vm2 = vcmp.eq.s32.totalorder %v7866_v9, %v6453_v20  ;;  %vm1208_vm3 = vcmp.eq.s32.totalorder %v7867_v32, %v6453_v20  ;;  %v7874_v32 = vld [vmem:[#allocation78_spill] sm:$0xff] }
 0x1d3   :  { %2770 = vmatmul.f32.gmra.mxu3 %v6872_v8  ;;  %vm1238_vm4 = vcmp.eq.s32.totalorder %v7868_v26, %v6453_v20  ;;  %4156 = vmatpush.msk.msrb.mxu1 %vm1208_vm3, %v7472_v47  ;;  %v6898_v26 = vld [vmem:[#allocation7 + $0x1f0] sm:$0xff]  ;;  %vm1172_vm9 = vcmp.eq.s32.totalorder %v7874_v32, %v6453_v20 }
 0x1d4   :  { %v2402_v11 = vpop.f32.mrf.mxu2  ;;  %4188 = vmatpush.msk.msrb.mxu3 %vm1272_vm2, %v7472_v47  ;;  %4173 = vmatpush.msk.msrb.mxu2 %vm1238_vm4, %v7472_v47 }
 0x1d5   :  { %v2403_v57 = vadd.f32 %v2402_v11, %v2362_v1  ;;  %v2323_v8 = vpop.f32.mrf.mxu0  ;;  %v6895_v11 = vld [vmem:[#allocation7 + $0x1e0] sm:$0xff]  ;;  %4141 = vmatpush.msk.msrb.mxu0 %vm1174_vm5, %v7472_v47 }
 0x1d6   :  { %v2324_v2 = vadd.f32 %v2323_v8, %v6616_v34  ;;  %v2443_v19 = vpop.f32.mrf.mxu3  ;;  %v7870_v34 = vld [vmem:[#allocation76_spill] sm:$0xff]  ;;  %4189 = vmatpush.msk.msrb.mxu3 %vm1270_vm6, %v7472_v47  ;;  %v6911_v8 = vld [vmem:[#allocation7 + $0x1f8] sm:$0xff] }
 0x1d7   :  { %v6889_v9 = vadd.f32 %v2443_v19, %v2403_v57  ;;  %v2364_v1 = vpop.f32.mrf.mxu1  ;;  %vm1206_vm7 = vcmp.eq.s32.totalorder %v7870_v34, %v6453_v20  ;;  %v7871_v19 = vld [vmem:[#allocation77_spill] sm:$0xff]  ;;  %7873 = vst [vmem:[#allocation135_spill] sm:$0xff] %v6911_v8  ;;  %4142 = vmatpush.msk.msrb.mxu0 %vm1172_vm9, %v7472_v47 }
 0x1d8   :  { %2650 = vmatmul.f32.gmra.mxu0 %v6895_v11  ;;  %vm1236_vm8 = vcmp.eq.s32.totalorder %v7871_v19, %v6453_v20  ;;  %v2365_v39 = vadd.f32 %v2364_v1, %v2324_v2  ;;  %4157 = vmatpush.msk.msrb.mxu1 %vm1206_vm7, %v7472_v47  ;;  %v7875_v34 = vld [vmem:[#allocation81_spill] sm:$0xff]  ;;  %v7876_v1 = vld [vmem:[#allocation82_spill] sm:$0xff]  ;;  %v7877_v19 = vld [vmem:[#allocation83_spill] sm:$0xff] }
 0x1d9   :  { %7869 = vst [vmem:[#allocation18_spill] sm:$0xff] %v6889_v9  ;;  %2732 = vmatmul.f32.gmra.mxu2 %v6898_v26  ;;  %vm1268_vm10 = vcmp.eq.s32.totalorder %v7875_v34, %v6453_v20  ;;  %vm1204_vm11 = vcmp.eq.s32.totalorder %v7876_v1, %v6453_v20  ;;  %vm1234_vm12 = vcmp.eq.s32.totalorder %v7877_v19, %v6453_v20  ;;  %v7879_v1 = vld [vmem:[#allocation87_spill] sm:$0xff]  ;;  %v7880_v19 = vld [vmem:[#allocation89_spill] sm:$0xff] }
 0x1da   :  { %2691 = vmatmul.f32.gmra.mxu1 %v6907_v46  ;;  %4174 = vmatpush.msk.msrb.mxu2 %vm1236_vm8, %v7472_v47  ;;  %vm1202_vm15 = vcmp.eq.s32.totalorder %v7879_v1, %v6453_v20  ;;  %vm1232_vm0 = vcmp.eq.s32.totalorder %v7880_v19, %v6453_v20  ;;  %v7904_v46 = vld [vmem:[#allocation109_spill] sm:$0xff] }
 0x1db   :  { %2773 = vmatmul.f32.gmra.mxu3 %v6911_v8  ;;  %4158 = vmatpush.msk.msrb.mxu1 %vm1204_vm11, %v7472_v47 }
 0x1dc   :  { %v2405_v57 = vpop.f32.mrf.mxu2  ;;  %4190 = vmatpush.msk.msrb.mxu3 %vm1268_vm10, %v7472_v47  ;;  %4175 = vmatpush.msk.msrb.mxu2 %vm1234_vm12, %v7472_v47 }
 0x1dd   :  { %v2406_v2 = vadd.f32 %v2405_v57, %v2365_v39  ;;  %v2466_v9 = vpop.f32.mrf.mxu0  ;;  %v4271_v39 = vld [vmem:[#allocation7] sm:$0xff]  ;;  %v4272_v57 = vld [vmem:[#allocation7 + $0x10] sm:$0xff]  ;;  %4143 = vmatpush.msk.msrb.mxu0 %vm1170_vm13, %v7472_v47  ;;  %4159 = vmatpush.msk.msrb.mxu1 %vm1202_vm15, %v7472_v47 }
 0x1de   :  { %v2446_v32 = vpop.f32.mrf.mxu3  ;;  %4191 = vmatpush.msk.msrb.mxu3 %vm1266_vm14, %v7472_v47  ;;  %4176 = vmatpush.msk.msrb.mxu2 %vm1232_vm0, %v7472_v47  ;;  %vm1224_vm0 = vcmp.eq.s32.totalorder %v7904_v46, %v6453_v20 }
 0x1df   :  { %v6927_v8 = vadd.f32 %v2446_v32, %v2406_v2  ;;  %v2507_v34 = vpop.f32.mrf.mxu1  ;;  %v7881_v32 = vld [vmem:[#allocation85_spill] sm:$0xff] }
 0x1e0   :  { %2793 = vmatmul.f32.vlgmr.msra.gmra.mxu0 %v4271_v39  ;;  %v2508_v2 = vadd.f32 %v2507_v34, %v2466_v9  ;;  %v7883_v39 = vld [vmem:[#allocation90_spill] sm:$0xff]  ;;  %v7885_v9 = vld [vmem:[#allocation92_spill] sm:$0xff]  ;;  %v7886_v34 = vld [vmem:[#allocation93_spill] sm:$0xff] }
 0x1e1   :  { %7878 = vst [vmem:[#allocation136_spill] sm:$0xff] %v6927_v8  ;;  %2875 = vmatmul.f32.vlgmr.msra.gmra.mxu2 %v4272_v57  ;;  %vm1168_vm1 = vcmp.eq.s32.totalorder %v7883_v39, %v6453_v20  ;;  %v7884_v57 = vld [vmem:[#allocation91_spill] sm:$0xff]  ;;  %vm1200_vm3 = vcmp.eq.s32.totalorder %v7885_v9, %v6453_v20  ;;  %vm1230_vm4 = vcmp.eq.s32.totalorder %v7886_v34, %v6453_v20  ;;  %v7891_v34 = vld [vmem:[#allocation98_spill] sm:$0xff] }
 0x1e2   :  { %2834 = vmatmul.f32.vlgmr.msra.gmra.mxu1 %v7881_v32  ;;  %vm1264_vm2 = vcmp.eq.s32.totalorder %v7884_v57, %v6453_v20  ;;  %4144 = vmatpush.msk.msrb.mxu0 %vm1168_vm1, %v7472_v47  ;;  %v7889_v57 = vld [vmem:[#allocation116_spill] sm:$0xff]  ;;  %v7890_v9 = vld [vmem:[#allocation95_spill] sm:$0xff]  ;;  %vm1198_vm7 = vcmp.eq.s32.totalorder %v7891_v34, %v6453_v20 }
 0x1e3   :  { %2916 = vmatmul.f32.vlgmr.msra.gmra.mxu3 %v7882_v41  ;;  %4160 = vmatpush.msk.msrb.mxu1 %vm1200_vm3, %v7472_v47  ;;  %v7892_v8 = vld [vmem:[#allocation99_spill] sm:$0xff] }
 0x1e4   :  { %v2548_v48 = vpop.f32.mrf.mxu2  ;;  %4192 = vmatpush.msk.msrb.mxu3 %vm1264_vm2, %v7472_v47  ;;  %4177 = vmatpush.msk.msrb.mxu2 %vm1230_vm4, %v7472_v47  ;;  %vm1228_vm8 = vcmp.eq.s32.totalorder %v7892_v8, %v6453_v20 }
 0x1e5   :  { %v2549_v1 = vadd.f32 %v2548_v48, %v2508_v2  ;;  %v2469_v19 = vpop.f32.mrf.mxu0  ;;  %v7887_v2 = vld [vmem:[#allocation94_spill] sm:$0xff]  ;;  %v7888_v48 = vld [vmem:[#allocation97_spill] sm:$0xff]  ;;  %4161 = vmatpush.msk.msrb.mxu1 %vm1198_vm7, %v7472_v47  ;;  %vm1190_vm7 = vcmp.eq.s32.totalorder %v7809_v50, %v6453_v20  ;;  %v7916_v50 = vld [vmem:[#allocation123_spill] sm:$0xff] }
 0x1e6   :  { %v2589_v32 = vpop.f32.mrf.mxu3  ;;  %vm1166_vm5 = vcmp.eq.s32.totalorder %v7887_v2, %v6453_v20  ;;  %vm1262_vm6 = vcmp.eq.s32.totalorder %v7888_v48, %v6453_v20  ;;  %4178 = vmatpush.msk.msrb.mxu2 %vm1228_vm8, %v7472_v47  ;;  %v7894_v2 = vld [vmem:[#allocation101_spill] sm:$0xff]  ;;  %vm1220_vm8 = vcmp.eq.s32.totalorder %v7810_v31, %v6453_v20 }
 0x1e7   :  { %v6955_v41 = vadd.f32 %v2589_v32, %v2549_v1  ;;  %v2510_v39 = vpop.f32.mrf.mxu1  ;;  %4145 = vmatpush.msk.msrb.mxu0 %vm1166_vm5, %v7472_v47  ;;  %4193 = vmatpush.msk.msrb.mxu3 %vm1262_vm6, %v7472_v47  ;;  %v7893_v32 = vld [vmem:[#allocation96_spill] sm:$0xff]  ;;  %vm1158_vm5 = vcmp.eq.s32.totalorder %v7654_v35, %v6453_v20  ;;  %v7914_v35 = vld [vmem:[#allocation127_spill] sm:$0xff] }
 0x1e8   :  { %2796 = vmatmul.f32.gmra.mxu0 %v7889_v57  ;;  %v2511_v1 = vadd.f32 %v2510_v39, %v2469_v19  ;;  %v7895_v57 = vld [vmem:[#allocation100_spill] sm:$0xff]  ;;  %v7897_v19 = vld [vmem:[#allocation103_spill] sm:$0xff]  ;;  %v7898_v39 = vld [vmem:[#allocation105_spill] sm:$0xff] }
 0x1e9   :  { %2878 = vmatmul.f32.gmra.mxu2 %v7890_v9  ;;  %vm1164_vm9 = vcmp.eq.s32.totalorder %v7895_v57, %v6453_v20  ;;  %v7896_v9 = vld [vmem:[#allocation102_spill] sm:$0xff]  ;;  %vm1196_vm11 = vcmp.eq.s32.totalorder %v7897_v19, %v6453_v20  ;;  %vm1226_vm12 = vcmp.eq.s32.totalorder %v7898_v39, %v6453_v20  ;;  %v7902_v19 = vld [vmem:[#allocation111_spill] sm:$0xff]  ;;  %v7903_v39 = vld [vmem:[#allocation108_spill] sm:$0xff] }
 0x1ea   :  { %2837 = vmatmul.f32.gmra.mxu1 %v7893_v32  ;;  %vm1260_vm10 = vcmp.eq.s32.totalorder %v7896_v9, %v6453_v20  ;;  %4146 = vmatpush.msk.msrb.mxu0 %vm1164_vm9, %v7472_v47  ;;  %v7901_v9 = vld [vmem:[#allocation104_spill] sm:$0xff]  ;;  %vm1194_vm15 = vcmp.eq.s32.totalorder %v7903_v39, %v6453_v20 }
 0x1eb   :  { %2919 = vmatmul.f32.gmra.mxu3 %v7894_v2  ;;  %4162 = vmatpush.msk.msrb.mxu1 %vm1196_vm11, %v7472_v47  ;;  %vm1188_vm11 = vcmp.eq.s32.totalorder %v5347_v52, %v6453_v20  ;;  %v7919_v52 = vld [vmem:[#allocation14_spill] sm:$0xff] }
 0x1ec   :  { %v2551_v48 = vpop.f32.mrf.mxu2  ;;  %4194 = vmatpush.msk.msrb.mxu3 %vm1260_vm10, %v7472_v47  ;;  %4179 = vmatpush.msk.msrb.mxu2 %vm1226_vm12, %v7472_v47  ;;  %vm1252_vm10 = vcmp.eq.s32.totalorder %v7916_v50, %v6453_v20 }
 0x1ed   :  { %v2552_v8 = vadd.f32 %v2551_v48, %v2511_v1  ;;  %v2472_v34 = vpop.f32.mrf.mxu0  ;;  %v7899_v1 = vld [vmem:[#allocation106_spill] sm:$0xff]  ;;  %v7900_v48 = vld [vmem:[#allocation107_spill] sm:$0xff]  ;;  %4163 = vmatpush.msk.msrb.mxu1 %vm1194_vm15, %v7472_v47  ;;  %vm1186_vm15 = vcmp.eq.s32.totalorder %v5383_v58, %v6453_v20 }
 0x1ee   :  { %v2592_v32 = vpop.f32.mrf.mxu3  ;;  %vm1162_vm13 = vcmp.eq.s32.totalorder %v7899_v1, %v6453_v20  ;;  %vm1258_vm14 = vcmp.eq.s32.totalorder %v7900_v48, %v6453_v20  ;;  %4180 = vmatpush.msk.msrb.mxu2 %vm1224_vm0, %v7472_v47  ;;  %v7906_v1 = vld [vmem:[#allocation117_spill] sm:$0xff]  ;;  %vm3150_vm0 = vcmask 1040384  }
 0x1ef   :  { %v6985_v2 = vadd.f32 %v2592_v32, %v2552_v8  ;;  %v2513_v57 = vpop.f32.mrf.mxu1  ;;  %4147 = vmatpush.msk.msrb.mxu0 %vm1162_vm13, %v7472_v47  ;;  %4195 = vmatpush.msk.msrb.mxu3 %vm1258_vm14, %v7472_v47  ;;  %v7905_v32 = vld [vmem:[#allocation112_spill] sm:$0xff]  ;;  %vm1154_vm13 = vcmp.eq.s32.totalorder %v5365_v60, %v6453_v20  ;;  %vm1250_vm14 = vcmp.eq.s32.totalorder %v7812_v51, %v6453_v20 }
 0x1f0   :  { %2799 = vmatmul.f32.gmra.mxu0 %v7901_v9  ;;  %v2514_v8 = vadd.f32 %v2513_v57, %v2472_v34  ;;  %v7907_v9 = vld [vmem:[#allocation110_spill] sm:$0xff]  ;;  %v7910_v57 = vld [vmem:[#allocation115_spill] sm:$0xff] }
 0x1f1   :  { %2881 = vmatmul.f32.gmra.mxu2 %v7902_v19  ;;  %vm1160_vm1 = vcmp.eq.s32.totalorder %v7907_v9, %v6453_v20  ;;  %v7908_v19 = vld [vmem:[#allocation113_spill] sm:$0xff]  ;;  %v7909_v34 = vld [vmem:[#allocation114_spill] sm:$0xff]  ;;  %vm1222_vm4 = vcmp.eq.s32.totalorder %v7910_v57, %v6453_v20 }
 0x1f2   :  { %2840 = vmatmul.f32.gmra.mxu1 %v7905_v32  ;;  %vm1256_vm2 = vcmp.eq.s32.totalorder %v7908_v19, %v6453_v20  ;;  %4148 = vmatpush.msk.msrb.mxu0 %vm1160_vm1, %v7472_v47  ;;  %vm1192_vm3 = vcmp.eq.s32.totalorder %v7909_v34, %v6453_v20  ;;  %v7913_v19 = vld [vmem:[#allocation125_spill] sm:$0xff]  ;;  %v7915_v57 = vld [vmem:[#allocation122_spill] sm:$0xff] }
 0x1f3   :  { %2922 = vmatmul.f32.gmra.mxu3 %v7906_v1  ;;  %4164 = vmatpush.msk.msrb.mxu1 %vm1192_vm3, %v7472_v47  ;;  %vm1156_vm9 = vcmp.eq.s32.totalorder %v7915_v57, %v6453_v20 }
 0x1f4   :  { %v2554_v48 = vpop.f32.mrf.mxu2  ;;  %4196 = vmatpush.msk.msrb.mxu3 %vm1256_vm2, %v7472_v47  ;;  %4181 = vmatpush.msk.msrb.mxu2 %vm1222_vm4, %v7472_v47 }
 0x1f5   :  { %v2555_v46 = vadd.f32 %v2554_v48, %v2514_v8  ;;  %v2475_v39 = vpop.f32.mrf.mxu0  ;;  %v7911_v8 = vld [vmem:[#allocation118_spill] sm:$0xff]  ;;  %v7912_v48 = vld [vmem:[#allocation120_spill] sm:$0xff]  ;;  %4149 = vmatpush.msk.msrb.mxu0 %vm1158_vm5, %v7472_v47  ;;  %4165 = vmatpush.msk.msrb.mxu1 %vm1190_vm7, %v7472_v47 }
 0x1f6   :  { %v2595_v32 = vpop.f32.mrf.mxu3  ;;  %vm1254_vm6 = vcmp.eq.s32.totalorder %v7911_v8, %v6453_v20  ;;  %4182 = vmatpush.msk.msrb.mxu2 %vm1220_vm8, %v7472_v47 }
 0x1f7   :  { %v7015_v1 = vadd.f32 %v2595_v32, %v2555_v46  ;;  %v2516_v9 = vpop.f32.mrf.mxu1  ;;  %4197 = vmatpush.msk.msrb.mxu3 %vm1254_vm6, %v7472_v47  ;;  %4150 = vmatpush.msk.msrb.mxu0 %vm1156_vm9, %v7472_v47 }
 0x1f8   :  { %2802 = vmatmul.f32.gmra.mxu0 %v7912_v48  ;;  %v2517_v46 = vadd.f32 %v2516_v9, %v2475_v39  ;;  %4166 = vmatpush.msk.msrb.mxu1 %vm1188_vm11, %v7472_v47  ;;  %v7918_v48 = vld [vmem:[#allocation128_spill] sm:$0xff] }
 0x1f9   :  { %2884 = vmatmul.f32.gmra.mxu2 %v7913_v19  ;;  %4198 = vmatpush.msk.msrb.mxu3 %vm1252_vm10, %v7472_v47 }
 0x1fa   :  { %2843 = vmatmul.f32.gmra.mxu1 %v6440_v56  ;;  %v7917_v56 = vld [vmem:[#allocation124_spill] sm:$0xff]  ;;  %4151 = vmatpush.msk.msrb.mxu0 %vm1154_vm13, %v7472_v47 }
 0x1fb   :  { %2925 = vmatmul.f32.gmra.mxu3 %v7914_v35  ;;  %vm1218_vm12 = vcmp.eq.s32.totalorder %v7917_v56, %v6453_v20  ;;  %4167 = vmatpush.msk.msrb.mxu1 %vm1186_vm15, %v7472_v47 }
 0x1fc   :  { %v2557_v34 = vpop.f32.mrf.mxu2  ;;  %4183 = vmatpush.msk.msrb.mxu2 %vm1218_vm12, %v7472_v47  ;;  %4199 = vmatpush.msk.msrb.mxu3 %vm1250_vm14, %v7472_v47 }
 0x1fd   :  { %v2558_v31 = vadd.f32 %v2557_v34, %v2517_v46  ;;  %v2478_v39 = vpop.f32.mrf.mxu0 }
 0x1fe   :  { %v2598_v32 = vpop.f32.mrf.mxu3 }
 0x1ff   :  { %v7045_v9 = vadd.f32 %v2598_v32, %v2558_v31  ;;  %v2519_v8 = vpop.f32.mrf.mxu1 }
 0x200   :  { %2805 = vmatmul.f32.gmra.mxu0 %v7918_v48  ;;  %v2520_v19 = vadd.f32 %v2519_v8, %v2478_v39 }
 0x201   :  { %2887 = vmatmul.f32.gmra.mxu2 %v7919_v52 }
 0x202   :  { %2846 = vmatmul.f32.gmra.mxu1 %v6481_v0 }
 0x203   :  { %2928 = vmatmul.f32.gmra.mxu3 %v6485_v43 }
 0x204   :  { %v2560_v60 = vpop.f32.mrf.mxu2 }
 0x205   :  { %v2561_v51 = vadd.f32 %v2560_v60, %v2520_v19  ;;  %v2481_v46 = vpop.f32.mrf.mxu0 }
 0x206   :  { %v2601_v35 = vpop.f32.mrf.mxu3 }
 0x207   :  { %v7060_v34 = vadd.f32 %v2601_v35, %v2561_v51  ;;  %v2522_v57 = vpop.f32.mrf.mxu1 }
 0x208   :  { %2808 = vmatmul.f32.gmra.mxu0 %v6507_v59  ;;  %v2523_v58 = vadd.f32 %v2522_v57, %v2481_v46 }
 0x209   :  { %2890 = vmatmul.f32.gmra.mxu2 %v6510_v5 }
 0x20a   :  { %2849 = vmatmul.f32.gmra.mxu1 %v6519_v6 }
 0x20b   :  { %2931 = vmatmul.f32.gmra.mxu3 %v6523_v12 }
 0x20c   :  { %v2563_v20 = vpop.f32.mrf.mxu2 }
 0x20d   :  { %v2564_v43 = vadd.f32 %v2563_v20, %v2523_v58  ;;  %v2484_v0 = vpop.f32.mrf.mxu0 }
 0x20e   :  { %v2604_v50 = vpop.f32.mrf.mxu3 }
 0x20f   :  { %v7066_v47 = vadd.f32 %v2604_v50, %v2564_v43  ;;  %v2525_v31 = vpop.f32.mrf.mxu1 }
 0x210   :  { %2811 = vmatmul.f32.gmra.mxu0 %v6545_v3  ;;  %v2526_v56 = vadd.f32 %v2525_v31, %v2484_v0 }
 0x211   :  { %2893 = vmatmul.f32.gmra.mxu2 %v6548_v15 }
 0x212   :  { %2852 = vmatmul.f32.gmra.mxu1 %v6557_v16 }
 0x213   :  { %2934 = vmatmul.f32.gmra.mxu3 %v6561_v21 }
 0x214   :  { %v2566_v59 = vpop.f32.mrf.mxu2 }
 0x215   :  { %v2567_v5 = vadd.f32 %v2566_v59, %v2526_v56  ;;  %v2487_v6 = vpop.f32.mrf.mxu0 }
 0x216   :  { %v2607_v12 = vpop.f32.mrf.mxu3 }
 0x217   :  { %v7072_v39 = vadd.f32 %v2607_v12, %v2567_v5  ;;  %v2528_v32 = vpop.f32.mrf.mxu1 }
 0x218   :  { %2814 = vmatmul.f32.gmra.mxu0 %v6583_v7  ;;  %v2529_v8 = vadd.f32 %v2528_v32, %v2487_v6 }
 0x219   :  { %2896 = vmatmul.f32.gmra.mxu2 %v6586_v24 }
 0x21a   :  { %2855 = vmatmul.f32.gmra.mxu1 %v6595_v25 }
 0x21b   :  { %2937 = vmatmul.f32.gmra.mxu3 %v6599_v30 }
 0x21c   :  { %v2569_v3 = vpop.f32.mrf.mxu2 }
 0x21d   :  { %v2570_v15 = vadd.f32 %v2569_v3, %v2529_v8  ;;  %v2630_v16 = vpop.f32.mrf.mxu0 }
 0x21e   :  { %v2610_v21 = vpop.f32.mrf.mxu3  ;;  %v2631_v48 = vadd.f32 %v2630_v16, %v6955_v41 }
 0x21f   :  { %v7079_v52 = vadd.f32 %v2610_v21, %v2570_v15  ;;  %v2671_v19 = vpop.f32.mrf.mxu1 }
 0x220   :  { %v2672_v60 = vadd.f32 %v2671_v19, %v2631_v48  ;;  %2957 = vmatmul.f32.vlgmr.msrb.gmra.mxu0 %v6622_v54  ;;  %v7920_v54 = vld [vmem:[#allocation53_spill] sm:$0xff] }
 0x221   :  { %3039 = vmatmul.f32.vlgmr.msrb.gmra.mxu2 %v6625_v33 }
 0x222   :  { %2998 = vmatmul.f32.vlgmr.msrb.gmra.mxu1 %v6634_v38 }
 0x223   :  { %3080 = vmatmul.f32.vlgmr.msrb.gmra.mxu3 %v6638_v61 }
 0x224   :  { %v2712_v7 = vpop.f32.mrf.mxu2 }
 0x225   :  { %v2713_v24 = vadd.f32 %v2712_v7, %v2672_v60  ;;  %v2633_v25 = vpop.f32.mrf.mxu0 }
 0x226   :  { %v2634_v30 = vadd.f32 %v2633_v25, %v6985_v2  ;;  %v2753_v51 = vpop.f32.mrf.mxu3 }
 0x227   :  { %v2754_v46 = vadd.f32 %v2753_v51, %v2713_v24  ;;  %v2674_v41 = vpop.f32.mrf.mxu1 }
 0x228   :  { %v2675_v35 = vadd.f32 %v2674_v41, %v2634_v30  ;;  %2960 = vmatmul.f32.gmra.mxu0 %v6661_v4  ;;  %v7921_v4 = vld [vmem:[#allocation56_spill] sm:$0xff] }
 0x229   :  { %3042 = vmatmul.f32.gmra.mxu2 %v6664_v28  ;;  %v3105_v57 = vmul.f32 %v2754_v46, %v7920_v54  ;;  %v7926_v54 = vld [vmem:[#allocation15_spill] sm:$0xff] }
 0x22a   :  { %3001 = vmatmul.f32.gmra.mxu1 %v6673_v27 }
 0x22b   :  { %3083 = vmatmul.f32.gmra.mxu3 %v6677_v63 }
 0x22c   :  { %v2715_v33 = vpop.f32.mrf.mxu2 }
 0x22d   :  { %v2716_v38 = vadd.f32 %v2715_v33, %v2675_v35  ;;  %v2636_v61 = vpop.f32.mrf.mxu0 }
 0x22e   :  { %v2637_v58 = vadd.f32 %v2636_v61, %v7015_v1  ;;  %v2756_v2 = vpop.f32.mrf.mxu3 }
 0x22f   :  { %v2757_v20 = vadd.f32 %v2756_v2, %v2716_v38  ;;  %v2677_v43 = vpop.f32.mrf.mxu1 }
 0x230   :  { %v2678_v0 = vadd.f32 %v2677_v43, %v2637_v58  ;;  %2963 = vmatmul.f32.gmra.mxu0 %v6700_v23  ;;  %v7922_v23 = vld [vmem:[#allocation63_spill] sm:$0xff]  ;;  %v7929_v43 = vld [vmem:[#allocation134_spill] sm:$0xff] }
 0x231   :  { %3045 = vmatmul.f32.gmra.mxu2 %v6703_v44  ;;  %v3107_v28 = vmul.f32 %v2757_v20, %v7921_v4  ;;  %v7930_v4 = vld [vmem:[#allocation135_spill] sm:$0xff] }
 0x232   :  { %3004 = vmatmul.f32.gmra.mxu1 %v6712_v18 }
 0x233   :  { %v3121_v27 = vadd.f32 %v3107_v28, %v3105_v57  ;;  %3086 = vmatmul.f32.gmra.mxu3 %v6716_v10  ;;  %v7927_v57 = vld [vmem:[#allocation133_spill] sm:$0xff] }
 0x234   :  { %v2718_v63 = vpop.f32.mrf.mxu2 }
 0x235   :  { %v2719_v50 = vadd.f32 %v2718_v63, %v2678_v0  ;;  %v2639_v31 = vpop.f32.mrf.mxu0 }
 0x236   :  { %v2640_v1 = vadd.f32 %v2639_v31, %v7045_v9  ;;  %v2759_v56 = vpop.f32.mrf.mxu3 }
 0x237   :  { %v2760_v59 = vadd.f32 %v2759_v56, %v2719_v50  ;;  %v2680_v5 = vpop.f32.mrf.mxu1  ;;  %v7931_v56 = vld [vmem:[#allocation80_spill] sm:$0xff] }
 0x238   :  { %v2681_v6 = vadd.f32 %v2680_v5, %v2640_v1  ;;  %2966 = vmatmul.f32.gmra.mxu0 %v6739_v40  ;;  %v7923_v40 = vld [vmem:[#allocation64_spill] sm:$0xff] }
 0x239   :  { %3048 = vmatmul.f32.gmra.mxu2 %v6742_v62  ;;  %v3109_v44 = vmul.f32 %v2760_v59, %v7922_v23 }
 0x23a   :  { %3007 = vmatmul.f32.gmra.mxu1 %v6751_v36 }
 0x23b   :  { %v3122_v18 = vadd.f32 %v3121_v27, %v3109_v44  ;;  %3089 = vmatmul.f32.gmra.mxu3 %v6755_v37 }
 0x23c   :  { %v2721_v10 = vpop.f32.mrf.mxu2 }
 0x23d   :  { %v2722_v12 = vadd.f32 %v2721_v10, %v2681_v6  ;;  %v2642_v32 = vpop.f32.mrf.mxu0 }
 0x23e   :  { %v2643_v9 = vadd.f32 %v2642_v32, %v7060_v34  ;;  %v2762_v8 = vpop.f32.mrf.mxu3 }
 0x23f   :  { %v2763_v3 = vadd.f32 %v2762_v8, %v2722_v12  ;;  %v2683_v15 = vpop.f32.mrf.mxu1 }
 0x240   :  { %v2684_v16 = vadd.f32 %v2683_v15, %v2643_v9  ;;  %2969 = vmatmul.f32.gmra.mxu0 %v6778_v13  ;;  %v7924_v13 = vld [vmem:[#allocation69_spill] sm:$0xff] }
 0x241   :  { %3051 = vmatmul.f32.gmra.mxu2 %v6781_v55  ;;  %v3111_v62 = vmul.f32 %v2763_v3, %v7923_v40 }
 0x242   :  { %3010 = vmatmul.f32.gmra.mxu1 %v6790_v49 }
 0x243   :  { %v3123_v36 = vadd.f32 %v3122_v18, %v3111_v62  ;;  %3092 = vmatmul.f32.gmra.mxu3 %v6794_v29 }
 0x244   :  { %v2724_v37 = vpop.f32.mrf.mxu2 }
 0x245   :  { %v2725_v21 = vadd.f32 %v2724_v37, %v2684_v16  ;;  %v2645_v48 = vpop.f32.mrf.mxu0 }
 0x246   :  { %v2646_v34 = vadd.f32 %v2645_v48, %v7066_v47  ;;  %v2765_v19 = vpop.f32.mrf.mxu3 }
 0x247   :  { %v2766_v60 = vadd.f32 %v2765_v19, %v2725_v21  ;;  %v2686_v7 = vpop.f32.mrf.mxu1 }
 0x248   :  { %v2687_v24 = vadd.f32 %v2686_v7, %v2646_v34  ;;  %2972 = vmatmul.f32.gmra.mxu0 %v6817_v14  ;;  %v7925_v14 = vld [vmem:[#allocation72_spill] sm:$0xff] }
 0x249   :  { %3054 = vmatmul.f32.gmra.mxu2 %v6820_v45  ;;  %v3113_v55 = vmul.f32 %v2766_v60, %v7924_v13 }
 0x24a   :  { %3013 = vmatmul.f32.gmra.mxu1 %v6829_v17 }
 0x24b   :  { %v3124_v49 = vadd.f32 %v3123_v36, %v3113_v55  ;;  %3095 = vmatmul.f32.gmra.mxu3 %v6833_v22 }
 0x24c   :  { %v2727_v29 = vpop.f32.mrf.mxu2 }
 0x24d   :  { %v2728_v25 = vadd.f32 %v2727_v29, %v2687_v24  ;;  %v2648_v30 = vpop.f32.mrf.mxu0 }
 0x24e   :  { %v2649_v47 = vadd.f32 %v2648_v30, %v7072_v39  ;;  %v2768_v51 = vpop.f32.mrf.mxu3 }
 0x24f   :  { %v2769_v46 = vadd.f32 %v2768_v51, %v2728_v25  ;;  %v2689_v41 = vpop.f32.mrf.mxu1 }
 0x250   :  { %v2690_v35 = vadd.f32 %v2689_v41, %v2649_v47  ;;  %2975 = vmatmul.f32.gmra.mxu0 %v6856_v53  ;;  %v7928_v53 = vld [vmem:[#allocation79_spill] sm:$0xff] }
 0x251   :  { %3057 = vmatmul.f32.gmra.mxu2 %v6859_v42  ;;  %v3115_v45 = vmul.f32 %v2769_v46, %v7925_v14 }
 0x252   :  { %3016 = vmatmul.f32.gmra.mxu1 %v7926_v54 }
 0x253   :  { %v3125_v17 = vadd.f32 %v3124_v49, %v3115_v45  ;;  %3098 = vmatmul.f32.gmra.mxu3 %v7927_v57 }
 0x254   :  { %v2730_v22 = vpop.f32.mrf.mxu2 }
 0x255   :  { %v2731_v33 = vadd.f32 %v2730_v22, %v2690_v35  ;;  %v2651_v38 = vpop.f32.mrf.mxu0 }
 0x256   :  { %v2652_v39 = vadd.f32 %v2651_v38, %v7079_v52  ;;  %v2771_v61 = vpop.f32.mrf.mxu3 }
 0x257   :  { %v2772_v58 = vadd.f32 %v2771_v61, %v2731_v33  ;;  %v2692_v2 = vpop.f32.mrf.mxu1 }
 0x258   :  { %v2693_v20 = vadd.f32 %v2692_v2, %v2652_v39  ;;  %2978 = vmatmul.f32.gmra.mxu0 %v6895_v11 }
 0x259   :  { %3060 = vmatmul.f32.gmra.mxu2 %v6898_v26  ;;  %v3117_v42 = vmul.f32 %v2772_v58, %v7928_v53 }
 0x25a   :  { %3019 = vmatmul.f32.gmra.mxu1 %v7929_v43 }
 0x25b   :  { %v3126_v0 = vadd.f32 %v3125_v17, %v3117_v42  ;;  %3101 = vmatmul.f32.gmra.mxu3 %v7930_v4 }
 0x25c   :  { %v2733_v28 = vpop.f32.mrf.mxu2 }
 0x25d   :  { %v2734_v27 = vadd.f32 %v2733_v28, %v2693_v20  ;;  %v2794_v63 = vpop.f32.mrf.mxu0 }
 0x25e   :  { %v2774_v50 = vpop.f32.mrf.mxu3 }
 0x25f   :  { %v2775_v52 = vadd.f32 %v2774_v50, %v2734_v27  ;;  %v2835_v31 = vpop.f32.mrf.mxu1 }
 0x260   :  { %v2836_v1 = vadd.f32 %v2835_v31, %v2794_v63 }
 0x261   :  { %v3119_v59 = vmul.f32 %v2775_v52, %v7931_v56  ;;  %v7932_v52 = vld [vmem:[#allocation129_spill] sm:$0xff] }
 0x263   :  { %v7128_v5 = vadd.f32 %v3126_v0, %v3119_v59 }
 0x264   :  { %v2876_v11 = vpop.f32.mrf.mxu2 }
 0x265   :  { %v2877_v26 = vadd.f32 %v2876_v11, %v2836_v1  ;;  %v2797_v6 = vpop.f32.mrf.mxu0 }
 0x266   :  { %v2917_v23 = vpop.f32.mrf.mxu3 }
 0x267   :  { %v2918_v44 = vadd.f32 %v2917_v23, %v2877_v26  ;;  %v2838_v18 = vpop.f32.mrf.mxu1 }
 0x268   :  { %v2839_v10 = vadd.f32 %v2838_v18, %v2797_v6 }
 0x26c   :  { %v2879_v12 = vpop.f32.mrf.mxu2 }
 0x26d   :  { %v2880_v32 = vadd.f32 %v2879_v12, %v2839_v10  ;;  %v2800_v9 = vpop.f32.mrf.mxu0 }
 0x26e   :  { %v2920_v8 = vpop.f32.mrf.mxu3 }
 0x26f   :  { %v2921_v3 = vadd.f32 %v2920_v8, %v2880_v32  ;;  %v2841_v15 = vpop.f32.mrf.mxu1 }
 0x270   :  { %v2842_v16 = vadd.f32 %v2841_v15, %v2800_v9 }
 0x274   :  { %v2882_v40 = vpop.f32.mrf.mxu2 }
 0x275   :  { %v2883_v62 = vadd.f32 %v2882_v40, %v2842_v16  ;;  %v2803_v36 = vpop.f32.mrf.mxu0 }
 0x276   :  { %v2923_v37 = vpop.f32.mrf.mxu3 }
 0x277   :  { %v2924_v21 = vadd.f32 %v2923_v37, %v2883_v62  ;;  %v2844_v48 = vpop.f32.mrf.mxu1 }
 0x278   :  { %v2845_v34 = vadd.f32 %v2844_v48, %v2803_v36  ;;  %v7934_v36 = vld [vmem:[#allocation13_spill] sm:$0xff] }
 0x27c   :  { %v2885_v19 = vpop.f32.mrf.mxu2 }
 0x27d   :  { %v2886_v60 = vadd.f32 %v2885_v19, %v2845_v34  ;;  %v2806_v7 = vpop.f32.mrf.mxu0 }
 0x27e   :  { %v2926_v24 = vpop.f32.mrf.mxu3 }
 0x27f   :  { %v2927_v13 = vadd.f32 %v2926_v24, %v2886_v60  ;;  %v2847_v55 = vpop.f32.mrf.mxu1 }
 0x280   :  { %v2848_v49 = vadd.f32 %v2847_v55, %v2806_v7 }
 0x284   :  { %v2888_v29 = vpop.f32.mrf.mxu2 }
 0x285   :  { %v2889_v25 = vadd.f32 %v2888_v29, %v2848_v49  ;;  %v2809_v30 = vpop.f32.mrf.mxu0  ;;  %v7935_v29 = vld [vmem:[#allocation131_spill] sm:$0xff] }
 0x286   :  { %v2929_v47 = vpop.f32.mrf.mxu3 }
 0x287   :  { %v2930_v51 = vadd.f32 %v2929_v47, %v2889_v25  ;;  %v2850_v46 = vpop.f32.mrf.mxu1 }
 0x288   :  { %v2851_v41 = vadd.f32 %v2850_v46, %v2809_v30 }
 0x28c   :  { %v2891_v35 = vpop.f32.mrf.mxu2 }
 0x28d   :  { %v2892_v14 = vadd.f32 %v2891_v35, %v2851_v41  ;;  %v2812_v45 = vpop.f32.mrf.mxu0 }
 0x28e   :  { %v2932_v54 = vpop.f32.mrf.mxu3 }
 0x28f   :  { %v2933_v17 = vadd.f32 %v2932_v54, %v2892_v14  ;;  %v2853_v57 = vpop.f32.mrf.mxu1 }
 0x290   :  { %v2854_v35 = vadd.f32 %v2853_v57, %v2812_v45 }
 0x294   :  { %v2894_v22 = vpop.f32.mrf.mxu2 }
 0x295   :  { %v7130_v33 = vpop.f32.mrf.mxu0 }
 0x296   :  { %v2935_v38 = vpop.f32.mrf.mxu3 }
 0x297   :  { %v2856_v39 = vpop.f32.mrf.mxu1 }
 0x29c   :  { %v7132_v61 = vpop.f32.mrf.mxu2 }
 0x29d   :  { %v2958_v58 = vpop.f32.mrf.mxu0 }
 0x29e   :  { %v7134_v2 = vpop.f32.mrf.mxu3  ;;  %v2959_v20 = vadd.f32 %v2958_v58, %v2918_v44  ;;  %v7933_v44 = vld [vmem:[#allocation130_spill] sm:$0xff] }
 0x29f   :  { %v2999_v53 = vpop.f32.mrf.mxu1 }
 0x2a0   :  { %v3000_v42 = vadd.f32 %v2999_v53, %v2959_v20  ;;  %v2895_v53 = vadd.f32 %v2894_v22, %v2854_v35 }
 0x2a4   :  { %v3040_v43 = vpop.f32.mrf.mxu2 }
 0x2a5   :  { %v3041_v0 = vadd.f32 %v3040_v43, %v3000_v42  ;;  %v2961_v4 = vpop.f32.mrf.mxu0  ;;  %v7936_v42 = vld [vmem:[#allocation132_spill] sm:$0xff] }
 0x2a6   :  { %v2962_v28 = vadd.f32 %v2961_v4, %v2921_v3  ;;  %v3081_v27 = vpop.f32.mrf.mxu3 }
 0x2a7   :  { %v3082_v63 = vadd.f32 %v3081_v27, %v3041_v0  ;;  %v3002_v50 = vpop.f32.mrf.mxu1 }
 0x2a8   :  { %v3003_v1 = vadd.f32 %v3002_v50, %v2962_v28  ;;  %v2936_v28 = vadd.f32 %v2935_v38, %v2895_v53  ;;  %v2857_v50 = vadd.f32 %v2856_v39, %v7130_v33  ;;  %v7938_v33 = vld [vmem:[#allocation18_spill] sm:$0xff] }
 0x2a9   :  { %v3106_v31 = vmul.f32 %v3082_v63, %v7932_v52 }
 0x2aa   :  { %v2898_v45 = vadd.f32 %v7132_v61, %v2857_v50  ;;  %v3128_v61 = vrot.slane %v7128_v5, 4 }
 0x2ac   :  { %v3043_v56 = vpop.f32.mrf.mxu2 }
 0x2ad   :  { %v3044_v59 = vadd.f32 %v3043_v56, %v3003_v1  ;;  %v2964_v11 = vpop.f32.mrf.mxu0 }
 0x2ae   :  { %v2965_v26 = vadd.f32 %v2964_v11, %v2924_v21  ;;  %v3084_v6 = vpop.f32.mrf.mxu3 }
 0x2af   :  { %v3085_v23 = vadd.f32 %v3084_v6, %v3044_v59  ;;  %v3005_v18 = vpop.f32.mrf.mxu1 }
 0x2b0   :  { %v3006_v12 = vadd.f32 %v3005_v18, %v2965_v26  ;;  %v2939_v26 = vadd.f32 %v7134_v2, %v2898_v45 }
 0x2b1   :  { %v3108_v10 = vmul.f32 %v3085_v23, %v7933_v44 }
 0x2b3   :  { %v3134_v32 = vadd.f32 %v3108_v10, %v3106_v31 }
 0x2b4   :  { %v3046_v9 = vpop.f32.mrf.mxu2 }
 0x2b5   :  { %v3047_v8 = vadd.f32 %v3046_v9, %v3006_v12  ;;  %v2967_v3 = vpop.f32.mrf.mxu0 }
 0x2b6   :  { %v2968_v15 = vadd.f32 %v2967_v3, %v2927_v13  ;;  %v3087_v16 = vpop.f32.mrf.mxu3 }
 0x2b7   :  { %v3088_v40 = vadd.f32 %v3087_v16, %v3047_v8  ;;  %v3008_v62 = vpop.f32.mrf.mxu1  ;;  %v3129_v16 = vadd.f32 %v3128_v61, %v7128_v5 }
 0x2b8   :  { %v3009_v48 = vadd.f32 %v3008_v62, %v2968_v15 }
 0x2b9   :  { %v3110_v37 = vmul.f32 %v3088_v40, %v7934_v36  ;;  %v7939_v40 = vld [vmem:[#allocation136_spill] sm:$0xff]  ;;  %v3130_v36 = vrot.slane %v3129_v16, 2 }
 0x2bb   :  { %v3135_v34 = vadd.f32 %v3134_v32, %v3110_v37 }
 0x2bc   :  { %v3049_v19 = vpop.f32.mrf.mxu2 }
 0x2bd   :  { %v3050_v21 = vadd.f32 %v3049_v19, %v3009_v48  ;;  %v2970_v60 = vpop.f32.mrf.mxu0 }
 0x2be   :  { %v2971_v7 = vadd.f32 %v2970_v60, %v2930_v51  ;;  %v3090_v24 = vpop.f32.mrf.mxu3 }
 0x2bf   :  { %v3091_v55 = vadd.f32 %v3090_v24, %v3050_v21  ;;  %v3011_v49 = vpop.f32.mrf.mxu1 }
 0x2c0   :  { %v3012_v30 = vadd.f32 %v3011_v49, %v2971_v7  ;;  %v7940_v49 = vlaneseq }
 0x2c1   :  { %v3112_v25 = vmul.f32 %v3091_v55, %v7935_v29 }
 0x2c2   :  { %vm3155_vm1 = vcmp.lt.s32.totalorder %v7940_v49, 256 }
 0x2c3   :  { %v3136_v47 = vadd.f32 %v3135_v34, %v3112_v25  ;;  %v3131_v34 = vadd.f32 %v3130_v36, %v3129_v16 }
 0x2c4   :  { %v3052_v46 = vpop.f32.mrf.mxu2 }
 0x2c5   :  { %v3053_v13 = vadd.f32 %v3052_v46, %v3012_v30  ;;  %v2973_v41 = vpop.f32.mrf.mxu0  ;;  %v3132_v60 = vrot.slane %v3131_v34, 1 }
 0x2c6   :  { %v2974_v14 = vadd.f32 %v2973_v41, %v2933_v17  ;;  %v3093_v54 = vpop.f32.mrf.mxu3  ;;  %v7937_v17 = vld [vmem:[#allocation16_spill] sm:$0xff] }
 0x2c7   :  { %v3094_v58 = vadd.f32 %v3093_v54, %v3053_v13  ;;  %v3014_v20 = vpop.f32.mrf.mxu1  ;;  %v3133_v5 = vadd.f32 %v3132_v60, %v3131_v34 }
 0x2c8   :  { %v3015_v0 = vadd.f32 %v3014_v20, %v2974_v14 }
 0x2c9   :  { %v3114_v43 = vmul.f32 %v3094_v58, %v7936_v42 }
 0x2cb   :  { %v3137_v51 = vadd.f32 %v3136_v47, %v3114_v43 }
 0x2cc   :  { %v3055_v4 = vpop.f32.mrf.mxu2 }
 0x2cd   :  { %v3056_v27 = vadd.f32 %v3055_v4, %v3015_v0  ;;  %v2976_v63 = vpop.f32.mrf.mxu0 }
 0x2ce   :  { %v2977_v52 = vadd.f32 %v2976_v63, %v2936_v28  ;;  %v3096_v31 = vpop.f32.mrf.mxu3 }
 0x2cf   :  { %v3097_v1 = vadd.f32 %v3096_v31, %v3056_v27  ;;  %v3017_v56 = vpop.f32.mrf.mxu1 }
 0x2d0   :  { %v3018_v59 = vadd.f32 %v3017_v56, %v2977_v52 }
 0x2d1   :  { %v3116_v57 = vmul.f32 %v3097_v1, %v7937_v17 }
 0x2d3   :  { %v3138_v22 = vadd.f32 %v3137_v51, %v3116_v57 }
 0x2d4   :  { %v3058_v11 = vpop.f32.mrf.mxu2 }
 0x2d5   :  { %v3059_v6 = vadd.f32 %v3058_v11, %v3018_v59  ;;  %v2979_v23 = vpop.f32.mrf.mxu0 }
 0x2d6   :  { %v2980_v38 = vadd.f32 %v2979_v23, %v2939_v26  ;;  %v3099_v18 = vpop.f32.mrf.mxu3 }
 0x2d7   :  { %v3100_v44 = vadd.f32 %v3099_v18, %v3059_v6  ;;  %v3020_v10 = vpop.f32.mrf.mxu1 }
 0x2d8   :  { %v3021_v12 = vadd.f32 %v3020_v10, %v2980_v38 }
 0x2d9   :  { %v3118_v39 = vmul.f32 %v3100_v44, %v7938_v33 }
 0x2db   :  { %v3139_v32 = vadd.f32 %v3138_v22, %v3118_v39 }
 0x2dc   :  { %v3061_v9 = vpop.f32.mrf.mxu2 }
 0x2dd   :  { %v3062_v8 = vadd.f32 %v3061_v9, %v3021_v12 }
 0x2de   :  { %v3102_v3 = vpop.f32.mrf.mxu3 }
 0x2df   :  { %v3103_v15 = vadd.f32 %v3102_v3, %v3062_v8 }
 0x2e1   :  { %v3120_v2 = vmul.f32 %v3103_v15, %v7939_v40 }
 0x2e3   :  { %v3140_v62 = vadd.f32 %v3139_v32, %v3120_v2 }
 0x2e5   :  { %v3141_v37 = vrot.slane %v3140_v62, 4 }
 0x2e7   :  { %v3142_v48 = vadd.f32 %v3141_v37, %v3140_v62 }
 0x2e9   :  { %v3143_v19 = vrot.slane %v3142_v48, 2 }
 0x2eb   :  { %v3144_v21 = vadd.f32 %v3143_v19, %v3142_v48 }
 0x2ed   :  { %v3145_v7 = vrot.slane %v3144_v21, 1 }
 0x2ef   :  { %v3146_v24 = vadd.f32 %v3145_v7, %v3144_v21 }
 0x2f1   :  { %v3149_v55 = vrot.slane %v3146_v24, 7 }
 0x2f3   :  { %v3151_v29 = vsel %vm3150_vm0, %v3133_v5, %v3149_v55 }
 0x2f4   :  { %3157 = vst.msk [vmem:[#allocation8] sm:$0x3] %vm3155_vm1, %v3151_v29 }
 0x2f5   :  { %3168 = dma.vmem_to_hbm [thread:$0]  %s3164_s2, 32, %s3166_s30, [#allocation4]  }
 0x2f6   :  { %4373 = dma.done.wait [#allocation4], 32  }
 0x2f7   :  { %4374 = vsyncadd [#allocation4], 4294967264 }
 0x2f8   :  { %3173 = vsyncpa [#allocation3], 1 }
 0x2f9   :  { %3174 = vsyncpa [#allocation6], 1 }
 0x2fa   :  { %3175 = vsyncpa [#allocation4], 1 }

</bundles_post_ra>
